<compile_context>
chip_gen: v7x
topology: tpu7x:2x2x1
jax: 0.10.0
libtpu: 0.0.40
codegen_flags: <defaults>
</compile_context>

<pallas_src>
import jax
import jax.numpy as jnp
from jax.experimental import pallas as pl
from jax.experimental.pallas import tpu as pltpu


def _round_up(x, m):
    return (x + m - 1) // m * m


# ----------------------------------------------------------------------------
# Fused kernel factory (all shapes / offsets are static, closed over).
# ----------------------------------------------------------------------------
def _make_aelstm_kernel(T, B, hidden_size, num_layers, layer_dims,
                        lstm_offsets, fc_offsets):
    """layer_dims[i] = (d_in, H); lstm_offsets[i] = (row_ih, row_hh, row_b)."""

    def kernel(x_ref, w_ref, pred_ref, recon_ref):

        def run_layer(idx, seq):
            d_in, H = layer_dims[idx]
            o_ih, o_hh, o_b = lstm_offsets[idx]

            # Static, 8-aligned slices of the packed weight slab.
            w_ih = w_ref[pl.ds(o_ih, d_in), :][:, :4 * H]   # (d_in, 4H) [i,f,g,o]
            w_hh = w_ref[pl.ds(o_hh, H), :][:, :4 * H]      # (H, 4H)
            b = w_ref[pl.ds(o_b, 1), :][:, :4 * H]          # (1, 4H) = b_ih + b_hh

            # Batched input projection: all T timesteps in ONE matmul, off the
            # serial recurrence chain.
            xp = jnp.dot(seq.reshape(B * T, d_in), w_ih,
                         preferred_element_type=jnp.float32) + b
            xp = xp.reshape(B, T, 4 * H)

            h = jnp.zeros((B, H), jnp.float32)
            c = jnp.zeros((B, H), jnp.float32)
            hs = []
            for t in range(T):  # statically unrolled; T is small
                gates = xp[:, t, :] + jnp.dot(
                    h, w_hh, preferred_element_type=jnp.float32)
                # One sigmoid over the full (B, 4H) vreg; slice i/f/o from it.
                sg = jax.nn.sigmoid(gates)
                i = sg[:, 0 * H:1 * H]
                f = sg[:, 1 * H:2 * H]
                o = sg[:, 3 * H:4 * H]
                g = jnp.tanh(gates[:, 2 * H:3 * H])
                c = f * c + i * g
                h = o * jnp.tanh(c)
                hs.append(h)
            return jnp.stack(hs, axis=1), h     # (B, T, H), (B, H)

        x = x_ref[...]                          # (B, T, input) -- no transpose
        # Encoder: input -> intr -> code (code reused by decoder and forecast).
        intr, _ = run_layer(0, x)
        code, _ = run_layer(1, intr)
        # Decoder: code -> intr -> reproduced input (written once, directly).
        dec_intr, _ = run_layer(2, code)
        recon, _ = run_layer(3, dec_intr)
        recon_ref[...] = recon
        # Forecast stack: code -> hidden (num_layers), FC head fused on h_last.
        seq = code
        h_last = None
        for l in range(num_layers):
            seq, h_last = run_layer(4 + l, seq)

        o_fcw, o_fcb = fc_offsets
        fc_w = w_ref[pl.ds(o_fcw, hidden_size), :][:, :1]   # (H, 1)
        fc_b = w_ref[pl.ds(o_fcb, 1), :][:, :1]             # (1, 1)
        pred_ref[...] = (jnp.dot(h_last, fc_w,
                                 preferred_element_type=jnp.float32) + fc_b)

    return kernel


# ----------------------------------------------------------------------------
# Forward pass equivalent to AELSTM.forward(batch) -> (prediction, reproduced_X)
# ----------------------------------------------------------------------------
@jax.jit
def aelstm_forward(params, batch):
    batch = batch.astype(jnp.float32)
    B, T, input_size = batch.shape
    intr_size = params["enc_lstm1"][1].shape[0]
    code_size = params["enc_lstm2"][1].shape[0]
    hidden_size = params["fc_w"].shape[0]
    num_layers = len(params["forecast_lstm"])

    layers = [params["enc_lstm1"], params["enc_lstm2"],
              params["dec_lstm3"], params["dec_lstm4"],
              *params["forecast_lstm"]]
    layer_dims = tuple((w_ih.shape[0], w_hh.shape[0])
                       for (w_ih, w_hh, _) in layers)
    slab_width = max(128, max(4 * h for (_, h) in layer_dims))

    # Pack every weight into ONE lane-padded, row-aligned f32 slab: a single
    # dense DMA into VMEM instead of ~21 tiny per-tensor transfers.
    # (For repeated inference, pack once outside the forward and reuse.)
    chunks = []
    row = 0

    def _add(arr):
        nonlocal row
        r, c = arr.shape
        rp = _round_up(r, 8)
        chunks.append(jnp.pad(arr.astype(jnp.float32),
                              ((0, rp - r), (0, slab_width - c))))
        off = row
        row += rp
        return off

    lstm_offsets = []
    for (w_ih, w_hh, b) in layers:
        lstm_offsets.append((_add(w_ih), _add(w_hh), _add(b)))
    fc_offsets = (_add(params["fc_w"]), _add(params["fc_b"]))
    w_slab = jnp.concatenate(chunks, axis=0)

    kernel = _make_aelstm_kernel(T, B, hidden_size, num_layers, layer_dims,
                                 tuple(lstm_offsets), fc_offsets)

    pred, recon = pl.pallas_call(
        kernel,
        out_shape=(jax.ShapeDtypeStruct((B, 1), jnp.float32),
                   jax.ShapeDtypeStruct((B, T, input_size), jnp.float32)),
        in_specs=[pl.BlockSpec(memory_space=pltpu.MemorySpace.VMEM),
                  pl.BlockSpec(memory_space=pltpu.MemorySpace.VMEM)],
        out_specs=(pl.BlockSpec(memory_space=pltpu.MemorySpace.VMEM),
                   pl.BlockSpec(memory_space=pltpu.MemorySpace.VMEM)),
    )(batch, w_slab)

    return pred, recon


# ----------------------------------------------------------------------------
# Deterministic parameter init (mirrors the PyTorch init_weights semantics):
#   weight_ih : kaiming_normal  (std = sqrt(2 / fan_in))
#   weight_hh : orthogonal
#   biases    : 0 (b_ih + b_hh combined)
#   fc.weight : kaiming_uniform_ then constant_(0)  -> zeros
#   fc.bias   : default Linear uniform(-1/sqrt(H), 1/sqrt(H))
# Weights are stored gate-concatenated and transposed for x @ W layouts:
#   w_ih (D, 4H), w_hh (H, 4H), b (1, 4H), gate order [i, f, g, o].
# ----------------------------------------------------------------------------
def init_lstm_layer(key, input_size, hidden_size):
    k1, k2 = jax.random.split(key)
    std = (2.0 / input_size) ** 0.5
    w_ih = std * jax.random.normal(k1, (4 * hidden_size, input_size), jnp.float32)
    a = jax.random.normal(k2, (4 * hidden_size, hidden_size), jnp.float32)
    q, r = jnp.linalg.qr(a)
    w_hh = q * jnp.sign(jnp.diagonal(r))        # (4H, H), orthonormal columns
    w_ih_cat = jnp.transpose(w_ih)              # (D, 4H)
    w_hh_cat = jnp.transpose(w_hh)              # (H, 4H)
    b = jnp.zeros((1, 4 * hidden_size), jnp.float32)
    return (w_ih_cat, w_hh_cat, b)


def init_aelstm_params(key, input_size, code_size, intr_size, hidden_size,
                       num_layers):
    keys = jax.random.split(key, 5 + num_layers)
    params = {
        "enc_lstm1": init_lstm_layer(keys[0], input_size, intr_size),
        "enc_lstm2": init_lstm_layer(keys[1], intr_size, code_size),
        "dec_lstm3": init_lstm_layer(keys[2], code_size, intr_size),
        "dec_lstm4": init_lstm_layer(keys[3], intr_size, input_size),
    }
    forecast = []
    in_sz = code_size
    for l in range(num_layers):
        forecast.append(init_lstm_layer(keys[4 + l], in_sz, hidden_size))
        in_sz = hidden_size
    params["forecast_lstm"] = forecast
    params["fc_w"] = jnp.zeros((hidden_size, 1), jnp.float32)
    bound = 1.0 / (hidden_size ** 0.5)
    params["fc_b"] = jax.random.uniform(keys[-1], (1, 1), jnp.float32,
                                        minval=-bound, maxval=bound)
    return params


if __name__ == "__main__":
    B, T = 2, 8
    input_size, code_size, intr_size, hidden_size, num_layers = 16, 8, 12, 32, 2

    root = jax.random.PRNGKey(0)
    k_param, k_data = jax.random.split(root)
    params = init_aelstm_params(k_param, input_size, code_size, intr_size,
                                hidden_size, num_layers)
    batch = jax.random.normal(k_data, (B, T, input_size), jnp.float32)

    prediction, reproduced_X = aelstm_forward(params, batch)
    jax.block_until_ready((prediction, reproduced_X))

    assert prediction.shape == (B, 1)
    assert reproduced_X.shape == (B, T, input_size)
    assert bool(jnp.all(jnp.isfinite(prediction)))
    assert bool(jnp.all(jnp.isfinite(reproduced_X)))
    print("KERNEL_OK")
</pallas_src>

<mosaic_0001>
module attributes {stable_mosaic.version = 11 : i64} {
  func.func @kernel(%arg0: memref<2x8x16xf32, #tpu.memory_space<vmem>>, %arg1: memref<304x128xf32, #tpu.memory_space<vmem>>, %arg2: memref<2x1xf32, #tpu.memory_space<vmem>>, %arg3: memref<2x8x16xf32, #tpu.memory_space<vmem>>) attributes {dimension_semantics = [], scalar_prefetch = 0 : i64, scratch_operands = 0 : i64, tpu.core_type = #tpu.core_type<tc>} {
    %c0 = arith.constant 0 : index
    %c0_0 = arith.constant 0 : index
    %c0_1 = arith.constant 0 : index
    %0 = vector.load %arg0[%c0, %c0_0, %c0_1] : memref<2x8x16xf32, #tpu.memory_space<vmem>>, vector<2x8x16xf32>
    %c0_2 = arith.constant 0 : index
    %c0_3 = arith.constant 0 : index
    %1 = vector.load %arg1[%c0_2, %c0_3] : memref<304x128xf32, #tpu.memory_space<vmem>>, vector<16x128xf32>
    %2 = vector.extract_strided_slice %1 {offsets = [0, 0], sizes = [16, 48], strides = [1, 1]} : vector<16x128xf32> to vector<16x48xf32>
    %c16 = arith.constant 16 : index
    %c0_4 = arith.constant 0 : index
    %3 = vector.load %arg1[%c16, %c0_4] : memref<304x128xf32, #tpu.memory_space<vmem>>, vector<12x128xf32>
    %4 = vector.extract_strided_slice %3 {offsets = [0, 0], sizes = [12, 48], strides = [1, 1]} : vector<12x128xf32> to vector<12x48xf32>
    %c32 = arith.constant 32 : index
    %c0_5 = arith.constant 0 : index
    %5 = vector.load %arg1[%c32, %c0_5] : memref<304x128xf32, #tpu.memory_space<vmem>>, vector<1x128xf32>
    %6 = vector.extract_strided_slice %5 {offsets = [0, 0], sizes = [1, 48], strides = [1, 1]} : vector<1x128xf32> to vector<1x48xf32>
    %7 = vector.shape_cast %0 : vector<2x8x16xf32> to vector<16x16xf32>
    %cst = arith.constant dense<0.000000e+00> : vector<16x48xf32>
    %8 = tpu.matmul %7, %2, %cst {dimension_numbers = #tpu.dot_dimension_numbers<[1], [0], [0], [1], [0, 0, 1, 1], [], []>} : vector<16x16xf32>, vector<16x48xf32>, vector<16x48xf32> -> vector<16x48xf32>
    %9 = vector.broadcast %6 : vector<1x48xf32> to vector<16x48xf32>
    %10 = arith.addf %8, %9 : vector<16x48xf32>
    %11 = vector.shape_cast %10 : vector<16x48xf32> to vector<2x8x48xf32>
    %cst_6 = arith.constant 0.000000e+00 : f32
    %12 = vector.broadcast %cst_6 : f32 to vector<2x12xf32>
    %cst_7 = arith.constant 0.000000e+00 : f32
    %13 = vector.broadcast %cst_7 : f32 to vector<2x12xf32>
    %14 = vector.extract_strided_slice %11 {offsets = [0, 0, 0], sizes = [2, 1, 48], strides = [1, 1, 1]} : vector<2x8x48xf32> to vector<2x1x48xf32>
    %15 = vector.shape_cast %14 : vector<2x1x48xf32> to vector<2x48xf32>
    %cst_8 = arith.constant dense<0.000000e+00> : vector<2x48xf32>
    %16 = tpu.matmul %12, %4, %cst_8 {dimension_numbers = #tpu.dot_dimension_numbers<[1], [0], [0], [1], [0, 0, 1, 1], [], []>} : vector<2x12xf32>, vector<12x48xf32>, vector<2x48xf32> -> vector<2x48xf32>
    %17 = arith.addf %15, %16 : vector<2x48xf32>
    %18 = arith.negf %17 : vector<2x48xf32>
    %19 = math.exp %18 : vector<2x48xf32>
    %cst_9 = arith.constant 1.000000e+00 : f32
    %20 = vector.broadcast %cst_9 : f32 to vector<2x48xf32>
    %21 = arith.addf %20, %19 : vector<2x48xf32>
    %22 = arith.divf %20, %21 : vector<2x48xf32>
    %23 = vector.extract_strided_slice %22 {offsets = [0, 0], sizes = [2, 12], strides = [1, 1]} : vector<2x48xf32> to vector<2x12xf32>
    %24 = vector.extract_strided_slice %22 {offsets = [0, 12], sizes = [2, 12], strides = [1, 1]} : vector<2x48xf32> to vector<2x12xf32>
    %25 = vector.extract_strided_slice %22 {offsets = [0, 36], sizes = [2, 12], strides = [1, 1]} : vector<2x48xf32> to vector<2x12xf32>
    %26 = vector.extract_strided_slice %17 {offsets = [0, 24], sizes = [2, 12], strides = [1, 1]} : vector<2x48xf32> to vector<2x12xf32>
    %27 = math.tanh %26 : vector<2x12xf32>
    %28 = arith.mulf %24, %13 : vector<2x12xf32>
    %29 = arith.mulf %23, %27 : vector<2x12xf32>
    %30 = arith.addf %28, %29 : vector<2x12xf32>
    %31 = math.tanh %30 : vector<2x12xf32>
    %32 = arith.mulf %25, %31 : vector<2x12xf32>
    %33 = vector.extract_strided_slice %11 {offsets = [0, 1, 0], sizes = [2, 1, 48], strides = [1, 1, 1]} : vector<2x8x48xf32> to vector<2x1x48xf32>
    %34 = vector.shape_cast %33 : vector<2x1x48xf32> to vector<2x48xf32>
    %cst_10 = arith.constant dense<0.000000e+00> : vector<2x48xf32>
    %35 = tpu.matmul %32, %4, %cst_10 {dimension_numbers = #tpu.dot_dimension_numbers<[1], [0], [0], [1], [0, 0, 1, 1], [], []>} : vector<2x12xf32>, vector<12x48xf32>, vector<2x48xf32> -> vector<2x48xf32>
    %36 = arith.addf %34, %35 : vector<2x48xf32>
    %37 = arith.negf %36 : vector<2x48xf32>
    %38 = math.exp %37 : vector<2x48xf32>
    %cst_11 = arith.constant 1.000000e+00 : f32
    %39 = vector.broadcast %cst_11 : f32 to vector<2x48xf32>
    %40 = arith.addf %39, %38 : vector<2x48xf32>
    %41 = arith.divf %39, %40 : vector<2x48xf32>
    %42 = vector.extract_strided_slice %41 {offsets = [0, 0], sizes = [2, 12], strides = [1, 1]} : vector<2x48xf32> to vector<2x12xf32>
    %43 = vector.extract_strided_slice %41 {offsets = [0, 12], sizes = [2, 12], strides = [1, 1]} : vector<2x48xf32> to vector<2x12xf32>
    %44 = vector.extract_strided_slice %41 {offsets = [0, 36], sizes = [2, 12], strides = [1, 1]} : vector<2x48xf32> to vector<2x12xf32>
    %45 = vector.extract_strided_slice %36 {offsets = [0, 24], sizes = [2, 12], strides = [1, 1]} : vector<2x48xf32> to vector<2x12xf32>
    %46 = math.tanh %45 : vector<2x12xf32>
    %47 = arith.mulf %43, %30 : vector<2x12xf32>
    %48 = arith.mulf %42, %46 : vector<2x12xf32>
    %49 = arith.addf %47, %48 : vector<2x12xf32>
    %50 = math.tanh %49 : vector<2x12xf32>
    %51 = arith.mulf %44, %50 : vector<2x12xf32>
    %52 = vector.extract_strided_slice %11 {offsets = [0, 2, 0], sizes = [2, 1, 48], strides = [1, 1, 1]} : vector<2x8x48xf32> to vector<2x1x48xf32>
    %53 = vector.shape_cast %52 : vector<2x1x48xf32> to vector<2x48xf32>
    %cst_12 = arith.constant dense<0.000000e+00> : vector<2x48xf32>
    %54 = tpu.matmul %51, %4, %cst_12 {dimension_numbers = #tpu.dot_dimension_numbers<[1], [0], [0], [1], [0, 0, 1, 1], [], []>} : vector<2x12xf32>, vector<12x48xf32>, vector<2x48xf32> -> vector<2x48xf32>
    %55 = arith.addf %53, %54 : vector<2x48xf32>
    %56 = arith.negf %55 : vector<2x48xf32>
    %57 = math.exp %56 : vector<2x48xf32>
    %cst_13 = arith.constant 1.000000e+00 : f32
    %58 = vector.broadcast %cst_13 : f32 to vector<2x48xf32>
    %59 = arith.addf %58, %57 : vector<2x48xf32>
    %60 = arith.divf %58, %59 : vector<2x48xf32>
    %61 = vector.extract_strided_slice %60 {offsets = [0, 0], sizes = [2, 12], strides = [1, 1]} : vector<2x48xf32> to vector<2x12xf32>
    %62 = vector.extract_strided_slice %60 {offsets = [0, 12], sizes = [2, 12], strides = [1, 1]} : vector<2x48xf32> to vector<2x12xf32>
    %63 = vector.extract_strided_slice %60 {offsets = [0, 36], sizes = [2, 12], strides = [1, 1]} : vector<2x48xf32> to vector<2x12xf32>
    %64 = vector.extract_strided_slice %55 {offsets = [0, 24], sizes = [2, 12], strides = [1, 1]} : vector<2x48xf32> to vector<2x12xf32>
    %65 = math.tanh %64 : vector<2x12xf32>
    %66 = arith.mulf %62, %49 : vector<2x12xf32>
    %67 = arith.mulf %61, %65 : vector<2x12xf32>
    %68 = arith.addf %66, %67 : vector<2x12xf32>
    %69 = math.tanh %68 : vector<2x12xf32>
    %70 = arith.mulf %63, %69 : vector<2x12xf32>
    %71 = vector.extract_strided_slice %11 {offsets = [0, 3, 0], sizes = [2, 1, 48], strides = [1, 1, 1]} : vector<2x8x48xf32> to vector<2x1x48xf32>
    %72 = vector.shape_cast %71 : vector<2x1x48xf32> to vector<2x48xf32>
    %cst_14 = arith.constant dense<0.000000e+00> : vector<2x48xf32>
    %73 = tpu.matmul %70, %4, %cst_14 {dimension_numbers = #tpu.dot_dimension_numbers<[1], [0], [0], [1], [0, 0, 1, 1], [], []>} : vector<2x12xf32>, vector<12x48xf32>, vector<2x48xf32> -> vector<2x48xf32>
    %74 = arith.addf %72, %73 : vector<2x48xf32>
    %75 = arith.negf %74 : vector<2x48xf32>
    %76 = math.exp %75 : vector<2x48xf32>
    %cst_15 = arith.constant 1.000000e+00 : f32
    %77 = vector.broadcast %cst_15 : f32 to vector<2x48xf32>
    %78 = arith.addf %77, %76 : vector<2x48xf32>
    %79 = arith.divf %77, %78 : vector<2x48xf32>
    %80 = vector.extract_strided_slice %79 {offsets = [0, 0], sizes = [2, 12], strides = [1, 1]} : vector<2x48xf32> to vector<2x12xf32>
    %81 = vector.extract_strided_slice %79 {offsets = [0, 12], sizes = [2, 12], strides = [1, 1]} : vector<2x48xf32> to vector<2x12xf32>
    %82 = vector.extract_strided_slice %79 {offsets = [0, 36], sizes = [2, 12], strides = [1, 1]} : vector<2x48xf32> to vector<2x12xf32>
    %83 = vector.extract_strided_slice %74 {offsets = [0, 24], sizes = [2, 12], strides = [1, 1]} : vector<2x48xf32> to vector<2x12xf32>
    %84 = math.tanh %83 : vector<2x12xf32>
    %85 = arith.mulf %81, %68 : vector<2x12xf32>
    %86 = arith.mulf %80, %84 : vector<2x12xf32>
    %87 = arith.addf %85, %86 : vector<2x12xf32>
    %88 = math.tanh %87 : vector<2x12xf32>
    %89 = arith.mulf %82, %88 : vector<2x12xf32>
    %90 = vector.extract_strided_slice %11 {offsets = [0, 4, 0], sizes = [2, 1, 48], strides = [1, 1, 1]} : vector<2x8x48xf32> to vector<2x1x48xf32>
    %91 = vector.shape_cast %90 : vector<2x1x48xf32> to vector<2x48xf32>
    %cst_16 = arith.constant dense<0.000000e+00> : vector<2x48xf32>
    %92 = tpu.matmul %89, %4, %cst_16 {dimension_numbers = #tpu.dot_dimension_numbers<[1], [0], [0], [1], [0, 0, 1, 1], [], []>} : vector<2x12xf32>, vector<12x48xf32>, vector<2x48xf32> -> vector<2x48xf32>
    %93 = arith.addf %91, %92 : vector<2x48xf32>
    %94 = arith.negf %93 : vector<2x48xf32>
    %95 = math.exp %94 : vector<2x48xf32>
    %cst_17 = arith.constant 1.000000e+00 : f32
    %96 = vector.broadcast %cst_17 : f32 to vector<2x48xf32>
    %97 = arith.addf %96, %95 : vector<2x48xf32>
    %98 = arith.divf %96, %97 : vector<2x48xf32>
    %99 = vector.extract_strided_slice %98 {offsets = [0, 0], sizes = [2, 12], strides = [1, 1]} : vector<2x48xf32> to vector<2x12xf32>
    %100 = vector.extract_strided_slice %98 {offsets = [0, 12], sizes = [2, 12], strides = [1, 1]} : vector<2x48xf32> to vector<2x12xf32>
    %101 = vector.extract_strided_slice %98 {offsets = [0, 36], sizes = [2, 12], strides = [1, 1]} : vector<2x48xf32> to vector<2x12xf32>
    %102 = vector.extract_strided_slice %93 {offsets = [0, 24], sizes = [2, 12], strides = [1, 1]} : vector<2x48xf32> to vector<2x12xf32>
    %103 = math.tanh %102 : vector<2x12xf32>
    %104 = arith.mulf %100, %87 : vector<2x12xf32>
    %105 = arith.mulf %99, %103 : vector<2x12xf32>
    %106 = arith.addf %104, %105 : vector<2x12xf32>
    %107 = math.tanh %106 : vector<2x12xf32>
    %108 = arith.mulf %101, %107 : vector<2x12xf32>
    %109 = vector.extract_strided_slice %11 {offsets = [0, 5, 0], sizes = [2, 1, 48], strides = [1, 1, 1]} : vector<2x8x48xf32> to vector<2x1x48xf32>
    %110 = vector.shape_cast %109 : vector<2x1x48xf32> to vector<2x48xf32>
    %cst_18 = arith.constant dense<0.000000e+00> : vector<2x48xf32>
    %111 = tpu.matmul %108, %4, %cst_18 {dimension_numbers = #tpu.dot_dimension_numbers<[1], [0], [0], [1], [0, 0, 1, 1], [], []>} : vector<2x12xf32>, vector<12x48xf32>, vector<2x48xf32> -> vector<2x48xf32>
    %112 = arith.addf %110, %111 : vector<2x48xf32>
    %113 = arith.negf %112 : vector<2x48xf32>
    %114 = math.exp %113 : vector<2x48xf32>
    %cst_19 = arith.constant 1.000000e+00 : f32
    %115 = vector.broadcast %cst_19 : f32 to vector<2x48xf32>
    %116 = arith.addf %115, %114 : vector<2x48xf32>
    %117 = arith.divf %115, %116 : vector<2x48xf32>
    %118 = vector.extract_strided_slice %117 {offsets = [0, 0], sizes = [2, 12], strides = [1, 1]} : vector<2x48xf32> to vector<2x12xf32>
    %119 = vector.extract_strided_slice %117 {offsets = [0, 12], sizes = [2, 12], strides = [1, 1]} : vector<2x48xf32> to vector<2x12xf32>
    %120 = vector.extract_strided_slice %117 {offsets = [0, 36], sizes = [2, 12], strides = [1, 1]} : vector<2x48xf32> to vector<2x12xf32>
    %121 = vector.extract_strided_slice %112 {offsets = [0, 24], sizes = [2, 12], strides = [1, 1]} : vector<2x48xf32> to vector<2x12xf32>
    %122 = math.tanh %121 : vector<2x12xf32>
    %123 = arith.mulf %119, %106 : vector<2x12xf32>
    %124 = arith.mulf %118, %122 : vector<2x12xf32>
    %125 = arith.addf %123, %124 : vector<2x12xf32>
    %126 = math.tanh %125 : vector<2x12xf32>
    %127 = arith.mulf %120, %126 : vector<2x12xf32>
    %128 = vector.extract_strided_slice %11 {offsets = [0, 6, 0], sizes = [2, 1, 48], strides = [1, 1, 1]} : vector<2x8x48xf32> to vector<2x1x48xf32>
    %129 = vector.shape_cast %128 : vector<2x1x48xf32> to vector<2x48xf32>
    %cst_20 = arith.constant dense<0.000000e+00> : vector<2x48xf32>
    %130 = tpu.matmul %127, %4, %cst_20 {dimension_numbers = #tpu.dot_dimension_numbers<[1], [0], [0], [1], [0, 0, 1, 1], [], []>} : vector<2x12xf32>, vector<12x48xf32>, vector<2x48xf32> -> vector<2x48xf32>
    %131 = arith.addf %129, %130 : vector<2x48xf32>
    %132 = arith.negf %131 : vector<2x48xf32>
    %133 = math.exp %132 : vector<2x48xf32>
    %cst_21 = arith.constant 1.000000e+00 : f32
    %134 = vector.broadcast %cst_21 : f32 to vector<2x48xf32>
    %135 = arith.addf %134, %133 : vector<2x48xf32>
    %136 = arith.divf %134, %135 : vector<2x48xf32>
    %137 = vector.extract_strided_slice %136 {offsets = [0, 0], sizes = [2, 12], strides = [1, 1]} : vector<2x48xf32> to vector<2x12xf32>
    %138 = vector.extract_strided_slice %136 {offsets = [0, 12], sizes = [2, 12], strides = [1, 1]} : vector<2x48xf32> to vector<2x12xf32>
    %139 = vector.extract_strided_slice %136 {offsets = [0, 36], sizes = [2, 12], strides = [1, 1]} : vector<2x48xf32> to vector<2x12xf32>
    %140 = vector.extract_strided_slice %131 {offsets = [0, 24], sizes = [2, 12], strides = [1, 1]} : vector<2x48xf32> to vector<2x12xf32>
    %141 = math.tanh %140 : vector<2x12xf32>
    %142 = arith.mulf %138, %125 : vector<2x12xf32>
    %143 = arith.mulf %137, %141 : vector<2x12xf32>
    %144 = arith.addf %142, %143 : vector<2x12xf32>
    %145 = math.tanh %144 : vector<2x12xf32>
    %146 = arith.mulf %139, %145 : vector<2x12xf32>
    %147 = vector.extract_strided_slice %11 {offsets = [0, 7, 0], sizes = [2, 1, 48], strides = [1, 1, 1]} : vector<2x8x48xf32> to vector<2x1x48xf32>
    %148 = vector.shape_cast %147 : vector<2x1x48xf32> to vector<2x48xf32>
    %cst_22 = arith.constant dense<0.000000e+00> : vector<2x48xf32>
    %149 = tpu.matmul %146, %4, %cst_22 {dimension_numbers = #tpu.dot_dimension_numbers<[1], [0], [0], [1], [0, 0, 1, 1], [], []>} : vector<2x12xf32>, vector<12x48xf32>, vector<2x48xf32> -> vector<2x48xf32>
    %150 = arith.addf %148, %149 : vector<2x48xf32>
    %151 = arith.negf %150 : vector<2x48xf32>
    %152 = math.exp %151 : vector<2x48xf32>
    %cst_23 = arith.constant 1.000000e+00 : f32
    %153 = vector.broadcast %cst_23 : f32 to vector<2x48xf32>
    %154 = arith.addf %153, %152 : vector<2x48xf32>
    %155 = arith.divf %153, %154 : vector<2x48xf32>
    %156 = vector.extract_strided_slice %155 {offsets = [0, 0], sizes = [2, 12], strides = [1, 1]} : vector<2x48xf32> to vector<2x12xf32>
    %157 = vector.extract_strided_slice %155 {offsets = [0, 12], sizes = [2, 12], strides = [1, 1]} : vector<2x48xf32> to vector<2x12xf32>
    %158 = vector.extract_strided_slice %155 {offsets = [0, 36], sizes = [2, 12], strides = [1, 1]} : vector<2x48xf32> to vector<2x12xf32>
    %159 = vector.extract_strided_slice %150 {offsets = [0, 24], sizes = [2, 12], strides = [1, 1]} : vector<2x48xf32> to vector<2x12xf32>
    %160 = math.tanh %159 : vector<2x12xf32>
    %161 = arith.mulf %157, %144 : vector<2x12xf32>
    %162 = arith.mulf %156, %160 : vector<2x12xf32>
    %163 = arith.addf %161, %162 : vector<2x12xf32>
    %164 = math.tanh %163 : vector<2x12xf32>
    %165 = arith.mulf %158, %164 : vector<2x12xf32>
    %166 = vector.shape_cast %32 : vector<2x12xf32> to vector<2x1x12xf32>
    %167 = vector.shape_cast %51 : vector<2x12xf32> to vector<2x1x12xf32>
    %168 = vector.shape_cast %70 : vector<2x12xf32> to vector<2x1x12xf32>
    %169 = vector.shape_cast %89 : vector<2x12xf32> to vector<2x1x12xf32>
    %170 = vector.shape_cast %108 : vector<2x12xf32> to vector<2x1x12xf32>
    %171 = vector.shape_cast %127 : vector<2x12xf32> to vector<2x1x12xf32>
    %172 = vector.shape_cast %146 : vector<2x12xf32> to vector<2x1x12xf32>
    %173 = vector.shape_cast %165 : vector<2x12xf32> to vector<2x1x12xf32>
    %174 = tpu.concatenate %166, %167, %168, %169, %170, %171, %172, %173 in 1 : vector<2x1x12xf32>, vector<2x1x12xf32>, vector<2x1x12xf32>, vector<2x1x12xf32>, vector<2x1x12xf32>, vector<2x1x12xf32>, vector<2x1x12xf32>, vector<2x1x12xf32> -> vector<2x8x12xf32>
    %c40 = arith.constant 40 : index
    %c0_24 = arith.constant 0 : index
    %175 = vector.load %arg1[%c40, %c0_24] : memref<304x128xf32, #tpu.memory_space<vmem>>, vector<12x128xf32>
    %176 = vector.extract_strided_slice %175 {offsets = [0, 0], sizes = [12, 32], strides = [1, 1]} : vector<12x128xf32> to vector<12x32xf32>
    %c56 = arith.constant 56 : index
    %c0_25 = arith.constant 0 : index
    %177 = vector.load %arg1[%c56, %c0_25] : memref<304x128xf32, #tpu.memory_space<vmem>>, vector<8x128xf32>
    %178 = vector.extract_strided_slice %177 {offsets = [0, 0], sizes = [8, 32], strides = [1, 1]} : vector<8x128xf32> to vector<8x32xf32>
    %c64 = arith.constant 64 : index
    %c0_26 = arith.constant 0 : index
    %179 = vector.load %arg1[%c64, %c0_26] : memref<304x128xf32, #tpu.memory_space<vmem>>, vector<1x128xf32>
    %180 = vector.extract_strided_slice %179 {offsets = [0, 0], sizes = [1, 32], strides = [1, 1]} : vector<1x128xf32> to vector<1x32xf32>
    %181 = vector.shape_cast %174 : vector<2x8x12xf32> to vector<16x12xf32>
    %cst_27 = arith.constant dense<0.000000e+00> : vector<16x32xf32>
    %182 = tpu.matmul %181, %176, %cst_27 {dimension_numbers = #tpu.dot_dimension_numbers<[1], [0], [0], [1], [0, 0, 1, 1], [], []>} : vector<16x12xf32>, vector<12x32xf32>, vector<16x32xf32> -> vector<16x32xf32>
    %183 = vector.broadcast %180 : vector<1x32xf32> to vector<16x32xf32>
    %184 = arith.addf %182, %183 : vector<16x32xf32>
    %185 = vector.shape_cast %184 : vector<16x32xf32> to vector<2x8x32xf32>
    %cst_28 = arith.constant 0.000000e+00 : f32
    %186 = vector.broadcast %cst_28 : f32 to vector<2x8xf32>
    %cst_29 = arith.constant 0.000000e+00 : f32
    %187 = vector.broadcast %cst_29 : f32 to vector<2x8xf32>
    %188 = vector.extract_strided_slice %185 {offsets = [0, 0, 0], sizes = [2, 1, 32], strides = [1, 1, 1]} : vector<2x8x32xf32> to vector<2x1x32xf32>
    %189 = vector.shape_cast %188 : vector<2x1x32xf32> to vector<2x32xf32>
    %cst_30 = arith.constant dense<0.000000e+00> : vector<2x32xf32>
    %190 = tpu.matmul %186, %178, %cst_30 {dimension_numbers = #tpu.dot_dimension_numbers<[1], [0], [0], [1], [0, 0, 1, 1], [], []>} : vector<2x8xf32>, vector<8x32xf32>, vector<2x32xf32> -> vector<2x32xf32>
    %191 = arith.addf %189, %190 : vector<2x32xf32>
    %192 = arith.negf %191 : vector<2x32xf32>
    %193 = math.exp %192 : vector<2x32xf32>
    %cst_31 = arith.constant 1.000000e+00 : f32
    %194 = vector.broadcast %cst_31 : f32 to vector<2x32xf32>
    %195 = arith.addf %194, %193 : vector<2x32xf32>
    %196 = arith.divf %194, %195 : vector<2x32xf32>
    %197 = vector.extract_strided_slice %196 {offsets = [0, 0], sizes = [2, 8], strides = [1, 1]} : vector<2x32xf32> to vector<2x8xf32>
    %198 = vector.extract_strided_slice %196 {offsets = [0, 8], sizes = [2, 8], strides = [1, 1]} : vector<2x32xf32> to vector<2x8xf32>
    %199 = vector.extract_strided_slice %196 {offsets = [0, 24], sizes = [2, 8], strides = [1, 1]} : vector<2x32xf32> to vector<2x8xf32>
    %200 = vector.extract_strided_slice %191 {offsets = [0, 16], sizes = [2, 8], strides = [1, 1]} : vector<2x32xf32> to vector<2x8xf32>
    %201 = math.tanh %200 : vector<2x8xf32>
    %202 = arith.mulf %198, %187 : vector<2x8xf32>
    %203 = arith.mulf %197, %201 : vector<2x8xf32>
    %204 = arith.addf %202, %203 : vector<2x8xf32>
    %205 = math.tanh %204 : vector<2x8xf32>
    %206 = arith.mulf %199, %205 : vector<2x8xf32>
    %207 = vector.extract_strided_slice %185 {offsets = [0, 1, 0], sizes = [2, 1, 32], strides = [1, 1, 1]} : vector<2x8x32xf32> to vector<2x1x32xf32>
    %208 = vector.shape_cast %207 : vector<2x1x32xf32> to vector<2x32xf32>
    %cst_32 = arith.constant dense<0.000000e+00> : vector<2x32xf32>
    %209 = tpu.matmul %206, %178, %cst_32 {dimension_numbers = #tpu.dot_dimension_numbers<[1], [0], [0], [1], [0, 0, 1, 1], [], []>} : vector<2x8xf32>, vector<8x32xf32>, vector<2x32xf32> -> vector<2x32xf32>
    %210 = arith.addf %208, %209 : vector<2x32xf32>
    %211 = arith.negf %210 : vector<2x32xf32>
    %212 = math.exp %211 : vector<2x32xf32>
    %cst_33 = arith.constant 1.000000e+00 : f32
    %213 = vector.broadcast %cst_33 : f32 to vector<2x32xf32>
    %214 = arith.addf %213, %212 : vector<2x32xf32>
    %215 = arith.divf %213, %214 : vector<2x32xf32>
    %216 = vector.extract_strided_slice %215 {offsets = [0, 0], sizes = [2, 8], strides = [1, 1]} : vector<2x32xf32> to vector<2x8xf32>
    %217 = vector.extract_strided_slice %215 {offsets = [0, 8], sizes = [2, 8], strides = [1, 1]} : vector<2x32xf32> to vector<2x8xf32>
    %218 = vector.extract_strided_slice %215 {offsets = [0, 24], sizes = [2, 8], strides = [1, 1]} : vector<2x32xf32> to vector<2x8xf32>
    %219 = vector.extract_strided_slice %210 {offsets = [0, 16], sizes = [2, 8], strides = [1, 1]} : vector<2x32xf32> to vector<2x8xf32>
    %220 = math.tanh %219 : vector<2x8xf32>
    %221 = arith.mulf %217, %204 : vector<2x8xf32>
    %222 = arith.mulf %216, %220 : vector<2x8xf32>
    %223 = arith.addf %221, %222 : vector<2x8xf32>
    %224 = math.tanh %223 : vector<2x8xf32>
    %225 = arith.mulf %218, %224 : vector<2x8xf32>
    %226 = vector.extract_strided_slice %185 {offsets = [0, 2, 0], sizes = [2, 1, 32], strides = [1, 1, 1]} : vector<2x8x32xf32> to vector<2x1x32xf32>
    %227 = vector.shape_cast %226 : vector<2x1x32xf32> to vector<2x32xf32>
    %cst_34 = arith.constant dense<0.000000e+00> : vector<2x32xf32>
    %228 = tpu.matmul %225, %178, %cst_34 {dimension_numbers = #tpu.dot_dimension_numbers<[1], [0], [0], [1], [0, 0, 1, 1], [], []>} : vector<2x8xf32>, vector<8x32xf32>, vector<2x32xf32> -> vector<2x32xf32>
    %229 = arith.addf %227, %228 : vector<2x32xf32>
    %230 = arith.negf %229 : vector<2x32xf32>
    %231 = math.exp %230 : vector<2x32xf32>
    %cst_35 = arith.constant 1.000000e+00 : f32
    %232 = vector.broadcast %cst_35 : f32 to vector<2x32xf32>
    %233 = arith.addf %232, %231 : vector<2x32xf32>
    %234 = arith.divf %232, %233 : vector<2x32xf32>
    %235 = vector.extract_strided_slice %234 {offsets = [0, 0], sizes = [2, 8], strides = [1, 1]} : vector<2x32xf32> to vector<2x8xf32>
    %236 = vector.extract_strided_slice %234 {offsets = [0, 8], sizes = [2, 8], strides = [1, 1]} : vector<2x32xf32> to vector<2x8xf32>
    %237 = vector.extract_strided_slice %234 {offsets = [0, 24], sizes = [2, 8], strides = [1, 1]} : vector<2x32xf32> to vector<2x8xf32>
    %238 = vector.extract_strided_slice %229 {offsets = [0, 16], sizes = [2, 8], strides = [1, 1]} : vector<2x32xf32> to vector<2x8xf32>
    %239 = math.tanh %238 : vector<2x8xf32>
    %240 = arith.mulf %236, %223 : vector<2x8xf32>
    %241 = arith.mulf %235, %239 : vector<2x8xf32>
    %242 = arith.addf %240, %241 : vector<2x8xf32>
    %243 = math.tanh %242 : vector<2x8xf32>
    %244 = arith.mulf %237, %243 : vector<2x8xf32>
    %245 = vector.extract_strided_slice %185 {offsets = [0, 3, 0], sizes = [2, 1, 32], strides = [1, 1, 1]} : vector<2x8x32xf32> to vector<2x1x32xf32>
    %246 = vector.shape_cast %245 : vector<2x1x32xf32> to vector<2x32xf32>
    %cst_36 = arith.constant dense<0.000000e+00> : vector<2x32xf32>
    %247 = tpu.matmul %244, %178, %cst_36 {dimension_numbers = #tpu.dot_dimension_numbers<[1], [0], [0], [1], [0, 0, 1, 1], [], []>} : vector<2x8xf32>, vector<8x32xf32>, vector<2x32xf32> -> vector<2x32xf32>
    %248 = arith.addf %246, %247 : vector<2x32xf32>
    %249 = arith.negf %248 : vector<2x32xf32>
    %250 = math.exp %249 : vector<2x32xf32>
    %cst_37 = arith.constant 1.000000e+00 : f32
    %251 = vector.broadcast %cst_37 : f32 to vector<2x32xf32>
    %252 = arith.addf %251, %250 : vector<2x32xf32>
    %253 = arith.divf %251, %252 : vector<2x32xf32>
    %254 = vector.extract_strided_slice %253 {offsets = [0, 0], sizes = [2, 8], strides = [1, 1]} : vector<2x32xf32> to vector<2x8xf32>
    %255 = vector.extract_strided_slice %253 {offsets = [0, 8], sizes = [2, 8], strides = [1, 1]} : vector<2x32xf32> to vector<2x8xf32>
    %256 = vector.extract_strided_slice %253 {offsets = [0, 24], sizes = [2, 8], strides = [1, 1]} : vector<2x32xf32> to vector<2x8xf32>
    %257 = vector.extract_strided_slice %248 {offsets = [0, 16], sizes = [2, 8], strides = [1, 1]} : vector<2x32xf32> to vector<2x8xf32>
    %258 = math.tanh %257 : vector<2x8xf32>
    %259 = arith.mulf %255, %242 : vector<2x8xf32>
    %260 = arith.mulf %254, %258 : vector<2x8xf32>
    %261 = arith.addf %259, %260 : vector<2x8xf32>
    %262 = math.tanh %261 : vector<2x8xf32>
    %263 = arith.mulf %256, %262 : vector<2x8xf32>
    %264 = vector.extract_strided_slice %185 {offsets = [0, 4, 0], sizes = [2, 1, 32], strides = [1, 1, 1]} : vector<2x8x32xf32> to vector<2x1x32xf32>
    %265 = vector.shape_cast %264 : vector<2x1x32xf32> to vector<2x32xf32>
    %cst_38 = arith.constant dense<0.000000e+00> : vector<2x32xf32>
    %266 = tpu.matmul %263, %178, %cst_38 {dimension_numbers = #tpu.dot_dimension_numbers<[1], [0], [0], [1], [0, 0, 1, 1], [], []>} : vector<2x8xf32>, vector<8x32xf32>, vector<2x32xf32> -> vector<2x32xf32>
    %267 = arith.addf %265, %266 : vector<2x32xf32>
    %268 = arith.negf %267 : vector<2x32xf32>
    %269 = math.exp %268 : vector<2x32xf32>
    %cst_39 = arith.constant 1.000000e+00 : f32
    %270 = vector.broadcast %cst_39 : f32 to vector<2x32xf32>
    %271 = arith.addf %270, %269 : vector<2x32xf32>
    %272 = arith.divf %270, %271 : vector<2x32xf32>
    %273 = vector.extract_strided_slice %272 {offsets = [0, 0], sizes = [2, 8], strides = [1, 1]} : vector<2x32xf32> to vector<2x8xf32>
    %274 = vector.extract_strided_slice %272 {offsets = [0, 8], sizes = [2, 8], strides = [1, 1]} : vector<2x32xf32> to vector<2x8xf32>
    %275 = vector.extract_strided_slice %272 {offsets = [0, 24], sizes = [2, 8], strides = [1, 1]} : vector<2x32xf32> to vector<2x8xf32>
    %276 = vector.extract_strided_slice %267 {offsets = [0, 16], sizes = [2, 8], strides = [1, 1]} : vector<2x32xf32> to vector<2x8xf32>
    %277 = math.tanh %276 : vector<2x8xf32>
    %278 = arith.mulf %274, %261 : vector<2x8xf32>
    %279 = arith.mulf %273, %277 : vector<2x8xf32>
    %280 = arith.addf %278, %279 : vector<2x8xf32>
    %281 = math.tanh %280 : vector<2x8xf32>
    %282 = arith.mulf %275, %281 : vector<2x8xf32>
    %283 = vector.extract_strided_slice %185 {offsets = [0, 5, 0], sizes = [2, 1, 32], strides = [1, 1, 1]} : vector<2x8x32xf32> to vector<2x1x32xf32>
    %284 = vector.shape_cast %283 : vector<2x1x32xf32> to vector<2x32xf32>
    %cst_40 = arith.constant dense<0.000000e+00> : vector<2x32xf32>
    %285 = tpu.matmul %282, %178, %cst_40 {dimension_numbers = #tpu.dot_dimension_numbers<[1], [0], [0], [1], [0, 0, 1, 1], [], []>} : vector<2x8xf32>, vector<8x32xf32>, vector<2x32xf32> -> vector<2x32xf32>
    %286 = arith.addf %284, %285 : vector<2x32xf32>
    %287 = arith.negf %286 : vector<2x32xf32>
    %288 = math.exp %287 : vector<2x32xf32>
    %cst_41 = arith.constant 1.000000e+00 : f32
    %289 = vector.broadcast %cst_41 : f32 to vector<2x32xf32>
    %290 = arith.addf %289, %288 : vector<2x32xf32>
    %291 = arith.divf %289, %290 : vector<2x32xf32>
    %292 = vector.extract_strided_slice %291 {offsets = [0, 0], sizes = [2, 8], strides = [1, 1]} : vector<2x32xf32> to vector<2x8xf32>
    %293 = vector.extract_strided_slice %291 {offsets = [0, 8], sizes = [2, 8], strides = [1, 1]} : vector<2x32xf32> to vector<2x8xf32>
    %294 = vector.extract_strided_slice %291 {offsets = [0, 24], sizes = [2, 8], strides = [1, 1]} : vector<2x32xf32> to vector<2x8xf32>
    %295 = vector.extract_strided_slice %286 {offsets = [0, 16], sizes = [2, 8], strides = [1, 1]} : vector<2x32xf32> to vector<2x8xf32>
    %296 = math.tanh %295 : vector<2x8xf32>
    %297 = arith.mulf %293, %280 : vector<2x8xf32>
    %298 = arith.mulf %292, %296 : vector<2x8xf32>
    %299 = arith.addf %297, %298 : vector<2x8xf32>
    %300 = math.tanh %299 : vector<2x8xf32>
    %301 = arith.mulf %294, %300 : vector<2x8xf32>
    %302 = vector.extract_strided_slice %185 {offsets = [0, 6, 0], sizes = [2, 1, 32], strides = [1, 1, 1]} : vector<2x8x32xf32> to vector<2x1x32xf32>
    %303 = vector.shape_cast %302 : vector<2x1x32xf32> to vector<2x32xf32>
    %cst_42 = arith.constant dense<0.000000e+00> : vector<2x32xf32>
    %304 = tpu.matmul %301, %178, %cst_42 {dimension_numbers = #tpu.dot_dimension_numbers<[1], [0], [0], [1], [0, 0, 1, 1], [], []>} : vector<2x8xf32>, vector<8x32xf32>, vector<2x32xf32> -> vector<2x32xf32>
    %305 = arith.addf %303, %304 : vector<2x32xf32>
    %306 = arith.negf %305 : vector<2x32xf32>
    %307 = math.exp %306 : vector<2x32xf32>
    %cst_43 = arith.constant 1.000000e+00 : f32
    %308 = vector.broadcast %cst_43 : f32 to vector<2x32xf32>
    %309 = arith.addf %308, %307 : vector<2x32xf32>
    %310 = arith.divf %308, %309 : vector<2x32xf32>
    %311 = vector.extract_strided_slice %310 {offsets = [0, 0], sizes = [2, 8], strides = [1, 1]} : vector<2x32xf32> to vector<2x8xf32>
    %312 = vector.extract_strided_slice %310 {offsets = [0, 8], sizes = [2, 8], strides = [1, 1]} : vector<2x32xf32> to vector<2x8xf32>
    %313 = vector.extract_strided_slice %310 {offsets = [0, 24], sizes = [2, 8], strides = [1, 1]} : vector<2x32xf32> to vector<2x8xf32>
    %314 = vector.extract_strided_slice %305 {offsets = [0, 16], sizes = [2, 8], strides = [1, 1]} : vector<2x32xf32> to vector<2x8xf32>
    %315 = math.tanh %314 : vector<2x8xf32>
    %316 = arith.mulf %312, %299 : vector<2x8xf32>
    %317 = arith.mulf %311, %315 : vector<2x8xf32>
    %318 = arith.addf %316, %317 : vector<2x8xf32>
    %319 = math.tanh %318 : vector<2x8xf32>
    %320 = arith.mulf %313, %319 : vector<2x8xf32>
    %321 = vector.extract_strided_slice %185 {offsets = [0, 7, 0], sizes = [2, 1, 32], strides = [1, 1, 1]} : vector<2x8x32xf32> to vector<2x1x32xf32>
    %322 = vector.shape_cast %321 : vector<2x1x32xf32> to vector<2x32xf32>
    %cst_44 = arith.constant dense<0.000000e+00> : vector<2x32xf32>
    %323 = tpu.matmul %320, %178, %cst_44 {dimension_numbers = #tpu.dot_dimension_numbers<[1], [0], [0], [1], [0, 0, 1, 1], [], []>} : vector<2x8xf32>, vector<8x32xf32>, vector<2x32xf32> -> vector<2x32xf32>
    %324 = arith.addf %322, %323 : vector<2x32xf32>
    %325 = arith.negf %324 : vector<2x32xf32>
    %326 = math.exp %325 : vector<2x32xf32>
    %cst_45 = arith.constant 1.000000e+00 : f32
    %327 = vector.broadcast %cst_45 : f32 to vector<2x32xf32>
    %328 = arith.addf %327, %326 : vector<2x32xf32>
    %329 = arith.divf %327, %328 : vector<2x32xf32>
    %330 = vector.extract_strided_slice %329 {offsets = [0, 0], sizes = [2, 8], strides = [1, 1]} : vector<2x32xf32> to vector<2x8xf32>
    %331 = vector.extract_strided_slice %329 {offsets = [0, 8], sizes = [2, 8], strides = [1, 1]} : vector<2x32xf32> to vector<2x8xf32>
    %332 = vector.extract_strided_slice %329 {offsets = [0, 24], sizes = [2, 8], strides = [1, 1]} : vector<2x32xf32> to vector<2x8xf32>
    %333 = vector.extract_strided_slice %324 {offsets = [0, 16], sizes = [2, 8], strides = [1, 1]} : vector<2x32xf32> to vector<2x8xf32>
    %334 = math.tanh %333 : vector<2x8xf32>
    %335 = arith.mulf %331, %318 : vector<2x8xf32>
    %336 = arith.mulf %330, %334 : vector<2x8xf32>
    %337 = arith.addf %335, %336 : vector<2x8xf32>
    %338 = math.tanh %337 : vector<2x8xf32>
    %339 = arith.mulf %332, %338 : vector<2x8xf32>
    %340 = vector.shape_cast %206 : vector<2x8xf32> to vector<2x1x8xf32>
    %341 = vector.shape_cast %225 : vector<2x8xf32> to vector<2x1x8xf32>
    %342 = vector.shape_cast %244 : vector<2x8xf32> to vector<2x1x8xf32>
    %343 = vector.shape_cast %263 : vector<2x8xf32> to vector<2x1x8xf32>
    %344 = vector.shape_cast %282 : vector<2x8xf32> to vector<2x1x8xf32>
    %345 = vector.shape_cast %301 : vector<2x8xf32> to vector<2x1x8xf32>
    %346 = vector.shape_cast %320 : vector<2x8xf32> to vector<2x1x8xf32>
    %347 = vector.shape_cast %339 : vector<2x8xf32> to vector<2x1x8xf32>
    %348 = tpu.concatenate %340, %341, %342, %343, %344, %345, %346, %347 in 1 : vector<2x1x8xf32>, vector<2x1x8xf32>, vector<2x1x8xf32>, vector<2x1x8xf32>, vector<2x1x8xf32>, vector<2x1x8xf32>, vector<2x1x8xf32>, vector<2x1x8xf32> -> vector<2x8x8xf32>
    %c72 = arith.constant 72 : index
    %c0_46 = arith.constant 0 : index
    %349 = vector.load %arg1[%c72, %c0_46] : memref<304x128xf32, #tpu.memory_space<vmem>>, vector<8x128xf32>
    %350 = vector.extract_strided_slice %349 {offsets = [0, 0], sizes = [8, 48], strides = [1, 1]} : vector<8x128xf32> to vector<8x48xf32>
    %c80 = arith.constant 80 : index
    %c0_47 = arith.constant 0 : index
    %351 = vector.load %arg1[%c80, %c0_47] : memref<304x128xf32, #tpu.memory_space<vmem>>, vector<12x128xf32>
    %352 = vector.extract_strided_slice %351 {offsets = [0, 0], sizes = [12, 48], strides = [1, 1]} : vector<12x128xf32> to vector<12x48xf32>
    %c96 = arith.constant 96 : index
    %c0_48 = arith.constant 0 : index
    %353 = vector.load %arg1[%c96, %c0_48] : memref<304x128xf32, #tpu.memory_space<vmem>>, vector<1x128xf32>
    %354 = vector.extract_strided_slice %353 {offsets = [0, 0], sizes = [1, 48], strides = [1, 1]} : vector<1x128xf32> to vector<1x48xf32>
    %355 = vector.shape_cast %348 : vector<2x8x8xf32> to vector<16x8xf32>
    %cst_49 = arith.constant dense<0.000000e+00> : vector<16x48xf32>
    %356 = tpu.matmul %355, %350, %cst_49 {dimension_numbers = #tpu.dot_dimension_numbers<[1], [0], [0], [1], [0, 0, 1, 1], [], []>} : vector<16x8xf32>, vector<8x48xf32>, vector<16x48xf32> -> vector<16x48xf32>
    %357 = vector.broadcast %354 : vector<1x48xf32> to vector<16x48xf32>
    %358 = arith.addf %356, %357 : vector<16x48xf32>
    %359 = vector.shape_cast %358 : vector<16x48xf32> to vector<2x8x48xf32>
    %cst_50 = arith.constant 0.000000e+00 : f32
    %360 = vector.broadcast %cst_50 : f32 to vector<2x12xf32>
    %cst_51 = arith.constant 0.000000e+00 : f32
    %361 = vector.broadcast %cst_51 : f32 to vector<2x12xf32>
    %362 = vector.extract_strided_slice %359 {offsets = [0, 0, 0], sizes = [2, 1, 48], strides = [1, 1, 1]} : vector<2x8x48xf32> to vector<2x1x48xf32>
    %363 = vector.shape_cast %362 : vector<2x1x48xf32> to vector<2x48xf32>
    %cst_52 = arith.constant dense<0.000000e+00> : vector<2x48xf32>
    %364 = tpu.matmul %360, %352, %cst_52 {dimension_numbers = #tpu.dot_dimension_numbers<[1], [0], [0], [1], [0, 0, 1, 1], [], []>} : vector<2x12xf32>, vector<12x48xf32>, vector<2x48xf32> -> vector<2x48xf32>
    %365 = arith.addf %363, %364 : vector<2x48xf32>
    %366 = arith.negf %365 : vector<2x48xf32>
    %367 = math.exp %366 : vector<2x48xf32>
    %cst_53 = arith.constant 1.000000e+00 : f32
    %368 = vector.broadcast %cst_53 : f32 to vector<2x48xf32>
    %369 = arith.addf %368, %367 : vector<2x48xf32>
    %370 = arith.divf %368, %369 : vector<2x48xf32>
    %371 = vector.extract_strided_slice %370 {offsets = [0, 0], sizes = [2, 12], strides = [1, 1]} : vector<2x48xf32> to vector<2x12xf32>
    %372 = vector.extract_strided_slice %370 {offsets = [0, 12], sizes = [2, 12], strides = [1, 1]} : vector<2x48xf32> to vector<2x12xf32>
    %373 = vector.extract_strided_slice %370 {offsets = [0, 36], sizes = [2, 12], strides = [1, 1]} : vector<2x48xf32> to vector<2x12xf32>
    %374 = vector.extract_strided_slice %365 {offsets = [0, 24], sizes = [2, 12], strides = [1, 1]} : vector<2x48xf32> to vector<2x12xf32>
    %375 = math.tanh %374 : vector<2x12xf32>
    %376 = arith.mulf %372, %361 : vector<2x12xf32>
    %377 = arith.mulf %371, %375 : vector<2x12xf32>
    %378 = arith.addf %376, %377 : vector<2x12xf32>
    %379 = math.tanh %378 : vector<2x12xf32>
    %380 = arith.mulf %373, %379 : vector<2x12xf32>
    %381 = vector.extract_strided_slice %359 {offsets = [0, 1, 0], sizes = [2, 1, 48], strides = [1, 1, 1]} : vector<2x8x48xf32> to vector<2x1x48xf32>
    %382 = vector.shape_cast %381 : vector<2x1x48xf32> to vector<2x48xf32>
    %cst_54 = arith.constant dense<0.000000e+00> : vector<2x48xf32>
    %383 = tpu.matmul %380, %352, %cst_54 {dimension_numbers = #tpu.dot_dimension_numbers<[1], [0], [0], [1], [0, 0, 1, 1], [], []>} : vector<2x12xf32>, vector<12x48xf32>, vector<2x48xf32> -> vector<2x48xf32>
    %384 = arith.addf %382, %383 : vector<2x48xf32>
    %385 = arith.negf %384 : vector<2x48xf32>
    %386 = math.exp %385 : vector<2x48xf32>
    %cst_55 = arith.constant 1.000000e+00 : f32
    %387 = vector.broadcast %cst_55 : f32 to vector<2x48xf32>
    %388 = arith.addf %387, %386 : vector<2x48xf32>
    %389 = arith.divf %387, %388 : vector<2x48xf32>
    %390 = vector.extract_strided_slice %389 {offsets = [0, 0], sizes = [2, 12], strides = [1, 1]} : vector<2x48xf32> to vector<2x12xf32>
    %391 = vector.extract_strided_slice %389 {offsets = [0, 12], sizes = [2, 12], strides = [1, 1]} : vector<2x48xf32> to vector<2x12xf32>
    %392 = vector.extract_strided_slice %389 {offsets = [0, 36], sizes = [2, 12], strides = [1, 1]} : vector<2x48xf32> to vector<2x12xf32>
    %393 = vector.extract_strided_slice %384 {offsets = [0, 24], sizes = [2, 12], strides = [1, 1]} : vector<2x48xf32> to vector<2x12xf32>
    %394 = math.tanh %393 : vector<2x12xf32>
    %395 = arith.mulf %391, %378 : vector<2x12xf32>
    %396 = arith.mulf %390, %394 : vector<2x12xf32>
    %397 = arith.addf %395, %396 : vector<2x12xf32>
    %398 = math.tanh %397 : vector<2x12xf32>
    %399 = arith.mulf %392, %398 : vector<2x12xf32>
    %400 = vector.extract_strided_slice %359 {offsets = [0, 2, 0], sizes = [2, 1, 48], strides = [1, 1, 1]} : vector<2x8x48xf32> to vector<2x1x48xf32>
    %401 = vector.shape_cast %400 : vector<2x1x48xf32> to vector<2x48xf32>
    %cst_56 = arith.constant dense<0.000000e+00> : vector<2x48xf32>
    %402 = tpu.matmul %399, %352, %cst_56 {dimension_numbers = #tpu.dot_dimension_numbers<[1], [0], [0], [1], [0, 0, 1, 1], [], []>} : vector<2x12xf32>, vector<12x48xf32>, vector<2x48xf32> -> vector<2x48xf32>
    %403 = arith.addf %401, %402 : vector<2x48xf32>
    %404 = arith.negf %403 : vector<2x48xf32>
    %405 = math.exp %404 : vector<2x48xf32>
    %cst_57 = arith.constant 1.000000e+00 : f32
    %406 = vector.broadcast %cst_57 : f32 to vector<2x48xf32>
    %407 = arith.addf %406, %405 : vector<2x48xf32>
    %408 = arith.divf %406, %407 : vector<2x48xf32>
    %409 = vector.extract_strided_slice %408 {offsets = [0, 0], sizes = [2, 12], strides = [1, 1]} : vector<2x48xf32> to vector<2x12xf32>
    %410 = vector.extract_strided_slice %408 {offsets = [0, 12], sizes = [2, 12], strides = [1, 1]} : vector<2x48xf32> to vector<2x12xf32>
    %411 = vector.extract_strided_slice %408 {offsets = [0, 36], sizes = [2, 12], strides = [1, 1]} : vector<2x48xf32> to vector<2x12xf32>
    %412 = vector.extract_strided_slice %403 {offsets = [0, 24], sizes = [2, 12], strides = [1, 1]} : vector<2x48xf32> to vector<2x12xf32>
    %413 = math.tanh %412 : vector<2x12xf32>
    %414 = arith.mulf %410, %397 : vector<2x12xf32>
    %415 = arith.mulf %409, %413 : vector<2x12xf32>
    %416 = arith.addf %414, %415 : vector<2x12xf32>
    %417 = math.tanh %416 : vector<2x12xf32>
    %418 = arith.mulf %411, %417 : vector<2x12xf32>
    %419 = vector.extract_strided_slice %359 {offsets = [0, 3, 0], sizes = [2, 1, 48], strides = [1, 1, 1]} : vector<2x8x48xf32> to vector<2x1x48xf32>
    %420 = vector.shape_cast %419 : vector<2x1x48xf32> to vector<2x48xf32>
    %cst_58 = arith.constant dense<0.000000e+00> : vector<2x48xf32>
    %421 = tpu.matmul %418, %352, %cst_58 {dimension_numbers = #tpu.dot_dimension_numbers<[1], [0], [0], [1], [0, 0, 1, 1], [], []>} : vector<2x12xf32>, vector<12x48xf32>, vector<2x48xf32> -> vector<2x48xf32>
    %422 = arith.addf %420, %421 : vector<2x48xf32>
    %423 = arith.negf %422 : vector<2x48xf32>
    %424 = math.exp %423 : vector<2x48xf32>
    %cst_59 = arith.constant 1.000000e+00 : f32
    %425 = vector.broadcast %cst_59 : f32 to vector<2x48xf32>
    %426 = arith.addf %425, %424 : vector<2x48xf32>
    %427 = arith.divf %425, %426 : vector<2x48xf32>
    %428 = vector.extract_strided_slice %427 {offsets = [0, 0], sizes = [2, 12], strides = [1, 1]} : vector<2x48xf32> to vector<2x12xf32>
    %429 = vector.extract_strided_slice %427 {offsets = [0, 12], sizes = [2, 12], strides = [1, 1]} : vector<2x48xf32> to vector<2x12xf32>
    %430 = vector.extract_strided_slice %427 {offsets = [0, 36], sizes = [2, 12], strides = [1, 1]} : vector<2x48xf32> to vector<2x12xf32>
    %431 = vector.extract_strided_slice %422 {offsets = [0, 24], sizes = [2, 12], strides = [1, 1]} : vector<2x48xf32> to vector<2x12xf32>
    %432 = math.tanh %431 : vector<2x12xf32>
    %433 = arith.mulf %429, %416 : vector<2x12xf32>
    %434 = arith.mulf %428, %432 : vector<2x12xf32>
    %435 = arith.addf %433, %434 : vector<2x12xf32>
    %436 = math.tanh %435 : vector<2x12xf32>
    %437 = arith.mulf %430, %436 : vector<2x12xf32>
    %438 = vector.extract_strided_slice %359 {offsets = [0, 4, 0], sizes = [2, 1, 48], strides = [1, 1, 1]} : vector<2x8x48xf32> to vector<2x1x48xf32>
    %439 = vector.shape_cast %438 : vector<2x1x48xf32> to vector<2x48xf32>
    %cst_60 = arith.constant dense<0.000000e+00> : vector<2x48xf32>
    %440 = tpu.matmul %437, %352, %cst_60 {dimension_numbers = #tpu.dot_dimension_numbers<[1], [0], [0], [1], [0, 0, 1, 1], [], []>} : vector<2x12xf32>, vector<12x48xf32>, vector<2x48xf32> -> vector<2x48xf32>
    %441 = arith.addf %439, %440 : vector<2x48xf32>
    %442 = arith.negf %441 : vector<2x48xf32>
    %443 = math.exp %442 : vector<2x48xf32>
    %cst_61 = arith.constant 1.000000e+00 : f32
    %444 = vector.broadcast %cst_61 : f32 to vector<2x48xf32>
    %445 = arith.addf %444, %443 : vector<2x48xf32>
    %446 = arith.divf %444, %445 : vector<2x48xf32>
    %447 = vector.extract_strided_slice %446 {offsets = [0, 0], sizes = [2, 12], strides = [1, 1]} : vector<2x48xf32> to vector<2x12xf32>
    %448 = vector.extract_strided_slice %446 {offsets = [0, 12], sizes = [2, 12], strides = [1, 1]} : vector<2x48xf32> to vector<2x12xf32>
    %449 = vector.extract_strided_slice %446 {offsets = [0, 36], sizes = [2, 12], strides = [1, 1]} : vector<2x48xf32> to vector<2x12xf32>
    %450 = vector.extract_strided_slice %441 {offsets = [0, 24], sizes = [2, 12], strides = [1, 1]} : vector<2x48xf32> to vector<2x12xf32>
    %451 = math.tanh %450 : vector<2x12xf32>
    %452 = arith.mulf %448, %435 : vector<2x12xf32>
    %453 = arith.mulf %447, %451 : vector<2x12xf32>
    %454 = arith.addf %452, %453 : vector<2x12xf32>
    %455 = math.tanh %454 : vector<2x12xf32>
    %456 = arith.mulf %449, %455 : vector<2x12xf32>
    %457 = vector.extract_strided_slice %359 {offsets = [0, 5, 0], sizes = [2, 1, 48], strides = [1, 1, 1]} : vector<2x8x48xf32> to vector<2x1x48xf32>
    %458 = vector.shape_cast %457 : vector<2x1x48xf32> to vector<2x48xf32>
    %cst_62 = arith.constant dense<0.000000e+00> : vector<2x48xf32>
    %459 = tpu.matmul %456, %352, %cst_62 {dimension_numbers = #tpu.dot_dimension_numbers<[1], [0], [0], [1], [0, 0, 1, 1], [], []>} : vector<2x12xf32>, vector<12x48xf32>, vector<2x48xf32> -> vector<2x48xf32>
    %460 = arith.addf %458, %459 : vector<2x48xf32>
    %461 = arith.negf %460 : vector<2x48xf32>
    %462 = math.exp %461 : vector<2x48xf32>
    %cst_63 = arith.constant 1.000000e+00 : f32
    %463 = vector.broadcast %cst_63 : f32 to vector<2x48xf32>
    %464 = arith.addf %463, %462 : vector<2x48xf32>
    %465 = arith.divf %463, %464 : vector<2x48xf32>
    %466 = vector.extract_strided_slice %465 {offsets = [0, 0], sizes = [2, 12], strides = [1, 1]} : vector<2x48xf32> to vector<2x12xf32>
    %467 = vector.extract_strided_slice %465 {offsets = [0, 12], sizes = [2, 12], strides = [1, 1]} : vector<2x48xf32> to vector<2x12xf32>
    %468 = vector.extract_strided_slice %465 {offsets = [0, 36], sizes = [2, 12], strides = [1, 1]} : vector<2x48xf32> to vector<2x12xf32>
    %469 = vector.extract_strided_slice %460 {offsets = [0, 24], sizes = [2, 12], strides = [1, 1]} : vector<2x48xf32> to vector<2x12xf32>
    %470 = math.tanh %469 : vector<2x12xf32>
    %471 = arith.mulf %467, %454 : vector<2x12xf32>
    %472 = arith.mulf %466, %470 : vector<2x12xf32>
    %473 = arith.addf %471, %472 : vector<2x12xf32>
    %474 = math.tanh %473 : vector<2x12xf32>
    %475 = arith.mulf %468, %474 : vector<2x12xf32>
    %476 = vector.extract_strided_slice %359 {offsets = [0, 6, 0], sizes = [2, 1, 48], strides = [1, 1, 1]} : vector<2x8x48xf32> to vector<2x1x48xf32>
    %477 = vector.shape_cast %476 : vector<2x1x48xf32> to vector<2x48xf32>
    %cst_64 = arith.constant dense<0.000000e+00> : vector<2x48xf32>
    %478 = tpu.matmul %475, %352, %cst_64 {dimension_numbers = #tpu.dot_dimension_numbers<[1], [0], [0], [1], [0, 0, 1, 1], [], []>} : vector<2x12xf32>, vector<12x48xf32>, vector<2x48xf32> -> vector<2x48xf32>
    %479 = arith.addf %477, %478 : vector<2x48xf32>
    %480 = arith.negf %479 : vector<2x48xf32>
    %481 = math.exp %480 : vector<2x48xf32>
    %cst_65 = arith.constant 1.000000e+00 : f32
    %482 = vector.broadcast %cst_65 : f32 to vector<2x48xf32>
    %483 = arith.addf %482, %481 : vector<2x48xf32>
    %484 = arith.divf %482, %483 : vector<2x48xf32>
    %485 = vector.extract_strided_slice %484 {offsets = [0, 0], sizes = [2, 12], strides = [1, 1]} : vector<2x48xf32> to vector<2x12xf32>
    %486 = vector.extract_strided_slice %484 {offsets = [0, 12], sizes = [2, 12], strides = [1, 1]} : vector<2x48xf32> to vector<2x12xf32>
    %487 = vector.extract_strided_slice %484 {offsets = [0, 36], sizes = [2, 12], strides = [1, 1]} : vector<2x48xf32> to vector<2x12xf32>
    %488 = vector.extract_strided_slice %479 {offsets = [0, 24], sizes = [2, 12], strides = [1, 1]} : vector<2x48xf32> to vector<2x12xf32>
    %489 = math.tanh %488 : vector<2x12xf32>
    %490 = arith.mulf %486, %473 : vector<2x12xf32>
    %491 = arith.mulf %485, %489 : vector<2x12xf32>
    %492 = arith.addf %490, %491 : vector<2x12xf32>
    %493 = math.tanh %492 : vector<2x12xf32>
    %494 = arith.mulf %487, %493 : vector<2x12xf32>
    %495 = vector.extract_strided_slice %359 {offsets = [0, 7, 0], sizes = [2, 1, 48], strides = [1, 1, 1]} : vector<2x8x48xf32> to vector<2x1x48xf32>
    %496 = vector.shape_cast %495 : vector<2x1x48xf32> to vector<2x48xf32>
    %cst_66 = arith.constant dense<0.000000e+00> : vector<2x48xf32>
    %497 = tpu.matmul %494, %352, %cst_66 {dimension_numbers = #tpu.dot_dimension_numbers<[1], [0], [0], [1], [0, 0, 1, 1], [], []>} : vector<2x12xf32>, vector<12x48xf32>, vector<2x48xf32> -> vector<2x48xf32>
    %498 = arith.addf %496, %497 : vector<2x48xf32>
    %499 = arith.negf %498 : vector<2x48xf32>
    %500 = math.exp %499 : vector<2x48xf32>
    %cst_67 = arith.constant 1.000000e+00 : f32
    %501 = vector.broadcast %cst_67 : f32 to vector<2x48xf32>
    %502 = arith.addf %501, %500 : vector<2x48xf32>
    %503 = arith.divf %501, %502 : vector<2x48xf32>
    %504 = vector.extract_strided_slice %503 {offsets = [0, 0], sizes = [2, 12], strides = [1, 1]} : vector<2x48xf32> to vector<2x12xf32>
    %505 = vector.extract_strided_slice %503 {offsets = [0, 12], sizes = [2, 12], strides = [1, 1]} : vector<2x48xf32> to vector<2x12xf32>
    %506 = vector.extract_strided_slice %503 {offsets = [0, 36], sizes = [2, 12], strides = [1, 1]} : vector<2x48xf32> to vector<2x12xf32>
    %507 = vector.extract_strided_slice %498 {offsets = [0, 24], sizes = [2, 12], strides = [1, 1]} : vector<2x48xf32> to vector<2x12xf32>
    %508 = math.tanh %507 : vector<2x12xf32>
    %509 = arith.mulf %505, %492 : vector<2x12xf32>
    %510 = arith.mulf %504, %508 : vector<2x12xf32>
    %511 = arith.addf %509, %510 : vector<2x12xf32>
    %512 = math.tanh %511 : vector<2x12xf32>
    %513 = arith.mulf %506, %512 : vector<2x12xf32>
    %514 = vector.shape_cast %380 : vector<2x12xf32> to vector<2x1x12xf32>
    %515 = vector.shape_cast %399 : vector<2x12xf32> to vector<2x1x12xf32>
    %516 = vector.shape_cast %418 : vector<2x12xf32> to vector<2x1x12xf32>
    %517 = vector.shape_cast %437 : vector<2x12xf32> to vector<2x1x12xf32>
    %518 = vector.shape_cast %456 : vector<2x12xf32> to vector<2x1x12xf32>
    %519 = vector.shape_cast %475 : vector<2x12xf32> to vector<2x1x12xf32>
    %520 = vector.shape_cast %494 : vector<2x12xf32> to vector<2x1x12xf32>
    %521 = vector.shape_cast %513 : vector<2x12xf32> to vector<2x1x12xf32>
    %522 = tpu.concatenate %514, %515, %516, %517, %518, %519, %520, %521 in 1 : vector<2x1x12xf32>, vector<2x1x12xf32>, vector<2x1x12xf32>, vector<2x1x12xf32>, vector<2x1x12xf32>, vector<2x1x12xf32>, vector<2x1x12xf32>, vector<2x1x12xf32> -> vector<2x8x12xf32>
    %c104 = arith.constant 104 : index
    %c0_68 = arith.constant 0 : index
    %523 = vector.load %arg1[%c104, %c0_68] : memref<304x128xf32, #tpu.memory_space<vmem>>, vector<12x128xf32>
    %524 = vector.extract_strided_slice %523 {offsets = [0, 0], sizes = [12, 64], strides = [1, 1]} : vector<12x128xf32> to vector<12x64xf32>
    %c120 = arith.constant 120 : index
    %c0_69 = arith.constant 0 : index
    %525 = vector.load %arg1[%c120, %c0_69] : memref<304x128xf32, #tpu.memory_space<vmem>>, vector<16x128xf32>
    %526 = vector.extract_strided_slice %525 {offsets = [0, 0], sizes = [16, 64], strides = [1, 1]} : vector<16x128xf32> to vector<16x64xf32>
    %c136 = arith.constant 136 : index
    %c0_70 = arith.constant 0 : index
    %527 = vector.load %arg1[%c136, %c0_70] : memref<304x128xf32, #tpu.memory_space<vmem>>, vector<1x128xf32>
    %528 = vector.extract_strided_slice %527 {offsets = [0, 0], sizes = [1, 64], strides = [1, 1]} : vector<1x128xf32> to vector<1x64xf32>
    %529 = vector.shape_cast %522 : vector<2x8x12xf32> to vector<16x12xf32>
    %cst_71 = arith.constant dense<0.000000e+00> : vector<16x64xf32>
    %530 = tpu.matmul %529, %524, %cst_71 {dimension_numbers = #tpu.dot_dimension_numbers<[1], [0], [0], [1], [0, 0, 1, 1], [], []>} : vector<16x12xf32>, vector<12x64xf32>, vector<16x64xf32> -> vector<16x64xf32>
    %531 = vector.broadcast %528 : vector<1x64xf32> to vector<16x64xf32>
    %532 = arith.addf %530, %531 : vector<16x64xf32>
    %533 = vector.shape_cast %532 : vector<16x64xf32> to vector<2x8x64xf32>
    %cst_72 = arith.constant 0.000000e+00 : f32
    %534 = vector.broadcast %cst_72 : f32 to vector<2x16xf32>
    %cst_73 = arith.constant 0.000000e+00 : f32
    %535 = vector.broadcast %cst_73 : f32 to vector<2x16xf32>
    %536 = vector.extract_strided_slice %533 {offsets = [0, 0, 0], sizes = [2, 1, 64], strides = [1, 1, 1]} : vector<2x8x64xf32> to vector<2x1x64xf32>
    %537 = vector.shape_cast %536 : vector<2x1x64xf32> to vector<2x64xf32>
    %cst_74 = arith.constant dense<0.000000e+00> : vector<2x64xf32>
    %538 = tpu.matmul %534, %526, %cst_74 {dimension_numbers = #tpu.dot_dimension_numbers<[1], [0], [0], [1], [0, 0, 1, 1], [], []>} : vector<2x16xf32>, vector<16x64xf32>, vector<2x64xf32> -> vector<2x64xf32>
    %539 = arith.addf %537, %538 : vector<2x64xf32>
    %540 = arith.negf %539 : vector<2x64xf32>
    %541 = math.exp %540 : vector<2x64xf32>
    %cst_75 = arith.constant 1.000000e+00 : f32
    %542 = vector.broadcast %cst_75 : f32 to vector<2x64xf32>
    %543 = arith.addf %542, %541 : vector<2x64xf32>
    %544 = arith.divf %542, %543 : vector<2x64xf32>
    %545 = vector.extract_strided_slice %544 {offsets = [0, 0], sizes = [2, 16], strides = [1, 1]} : vector<2x64xf32> to vector<2x16xf32>
    %546 = vector.extract_strided_slice %544 {offsets = [0, 16], sizes = [2, 16], strides = [1, 1]} : vector<2x64xf32> to vector<2x16xf32>
    %547 = vector.extract_strided_slice %544 {offsets = [0, 48], sizes = [2, 16], strides = [1, 1]} : vector<2x64xf32> to vector<2x16xf32>
    %548 = vector.extract_strided_slice %539 {offsets = [0, 32], sizes = [2, 16], strides = [1, 1]} : vector<2x64xf32> to vector<2x16xf32>
    %549 = math.tanh %548 : vector<2x16xf32>
    %550 = arith.mulf %546, %535 : vector<2x16xf32>
    %551 = arith.mulf %545, %549 : vector<2x16xf32>
    %552 = arith.addf %550, %551 : vector<2x16xf32>
    %553 = math.tanh %552 : vector<2x16xf32>
    %554 = arith.mulf %547, %553 : vector<2x16xf32>
    %555 = vector.extract_strided_slice %533 {offsets = [0, 1, 0], sizes = [2, 1, 64], strides = [1, 1, 1]} : vector<2x8x64xf32> to vector<2x1x64xf32>
    %556 = vector.shape_cast %555 : vector<2x1x64xf32> to vector<2x64xf32>
    %cst_76 = arith.constant dense<0.000000e+00> : vector<2x64xf32>
    %557 = tpu.matmul %554, %526, %cst_76 {dimension_numbers = #tpu.dot_dimension_numbers<[1], [0], [0], [1], [0, 0, 1, 1], [], []>} : vector<2x16xf32>, vector<16x64xf32>, vector<2x64xf32> -> vector<2x64xf32>
    %558 = arith.addf %556, %557 : vector<2x64xf32>
    %559 = arith.negf %558 : vector<2x64xf32>
    %560 = math.exp %559 : vector<2x64xf32>
    %cst_77 = arith.constant 1.000000e+00 : f32
    %561 = vector.broadcast %cst_77 : f32 to vector<2x64xf32>
    %562 = arith.addf %561, %560 : vector<2x64xf32>
    %563 = arith.divf %561, %562 : vector<2x64xf32>
    %564 = vector.extract_strided_slice %563 {offsets = [0, 0], sizes = [2, 16], strides = [1, 1]} : vector<2x64xf32> to vector<2x16xf32>
    %565 = vector.extract_strided_slice %563 {offsets = [0, 16], sizes = [2, 16], strides = [1, 1]} : vector<2x64xf32> to vector<2x16xf32>
    %566 = vector.extract_strided_slice %563 {offsets = [0, 48], sizes = [2, 16], strides = [1, 1]} : vector<2x64xf32> to vector<2x16xf32>
    %567 = vector.extract_strided_slice %558 {offsets = [0, 32], sizes = [2, 16], strides = [1, 1]} : vector<2x64xf32> to vector<2x16xf32>
    %568 = math.tanh %567 : vector<2x16xf32>
    %569 = arith.mulf %565, %552 : vector<2x16xf32>
    %570 = arith.mulf %564, %568 : vector<2x16xf32>
    %571 = arith.addf %569, %570 : vector<2x16xf32>
    %572 = math.tanh %571 : vector<2x16xf32>
    %573 = arith.mulf %566, %572 : vector<2x16xf32>
    %574 = vector.extract_strided_slice %533 {offsets = [0, 2, 0], sizes = [2, 1, 64], strides = [1, 1, 1]} : vector<2x8x64xf32> to vector<2x1x64xf32>
    %575 = vector.shape_cast %574 : vector<2x1x64xf32> to vector<2x64xf32>
    %cst_78 = arith.constant dense<0.000000e+00> : vector<2x64xf32>
    %576 = tpu.matmul %573, %526, %cst_78 {dimension_numbers = #tpu.dot_dimension_numbers<[1], [0], [0], [1], [0, 0, 1, 1], [], []>} : vector<2x16xf32>, vector<16x64xf32>, vector<2x64xf32> -> vector<2x64xf32>
    %577 = arith.addf %575, %576 : vector<2x64xf32>
    %578 = arith.negf %577 : vector<2x64xf32>
    %579 = math.exp %578 : vector<2x64xf32>
    %cst_79 = arith.constant 1.000000e+00 : f32
    %580 = vector.broadcast %cst_79 : f32 to vector<2x64xf32>
    %581 = arith.addf %580, %579 : vector<2x64xf32>
    %582 = arith.divf %580, %581 : vector<2x64xf32>
    %583 = vector.extract_strided_slice %582 {offsets = [0, 0], sizes = [2, 16], strides = [1, 1]} : vector<2x64xf32> to vector<2x16xf32>
    %584 = vector.extract_strided_slice %582 {offsets = [0, 16], sizes = [2, 16], strides = [1, 1]} : vector<2x64xf32> to vector<2x16xf32>
    %585 = vector.extract_strided_slice %582 {offsets = [0, 48], sizes = [2, 16], strides = [1, 1]} : vector<2x64xf32> to vector<2x16xf32>
    %586 = vector.extract_strided_slice %577 {offsets = [0, 32], sizes = [2, 16], strides = [1, 1]} : vector<2x64xf32> to vector<2x16xf32>
    %587 = math.tanh %586 : vector<2x16xf32>
    %588 = arith.mulf %584, %571 : vector<2x16xf32>
    %589 = arith.mulf %583, %587 : vector<2x16xf32>
    %590 = arith.addf %588, %589 : vector<2x16xf32>
    %591 = math.tanh %590 : vector<2x16xf32>
    %592 = arith.mulf %585, %591 : vector<2x16xf32>
    %593 = vector.extract_strided_slice %533 {offsets = [0, 3, 0], sizes = [2, 1, 64], strides = [1, 1, 1]} : vector<2x8x64xf32> to vector<2x1x64xf32>
    %594 = vector.shape_cast %593 : vector<2x1x64xf32> to vector<2x64xf32>
    %cst_80 = arith.constant dense<0.000000e+00> : vector<2x64xf32>
    %595 = tpu.matmul %592, %526, %cst_80 {dimension_numbers = #tpu.dot_dimension_numbers<[1], [0], [0], [1], [0, 0, 1, 1], [], []>} : vector<2x16xf32>, vector<16x64xf32>, vector<2x64xf32> -> vector<2x64xf32>
    %596 = arith.addf %594, %595 : vector<2x64xf32>
    %597 = arith.negf %596 : vector<2x64xf32>
    %598 = math.exp %597 : vector<2x64xf32>
    %cst_81 = arith.constant 1.000000e+00 : f32
    %599 = vector.broadcast %cst_81 : f32 to vector<2x64xf32>
    %600 = arith.addf %599, %598 : vector<2x64xf32>
    %601 = arith.divf %599, %600 : vector<2x64xf32>
    %602 = vector.extract_strided_slice %601 {offsets = [0, 0], sizes = [2, 16], strides = [1, 1]} : vector<2x64xf32> to vector<2x16xf32>
    %603 = vector.extract_strided_slice %601 {offsets = [0, 16], sizes = [2, 16], strides = [1, 1]} : vector<2x64xf32> to vector<2x16xf32>
    %604 = vector.extract_strided_slice %601 {offsets = [0, 48], sizes = [2, 16], strides = [1, 1]} : vector<2x64xf32> to vector<2x16xf32>
    %605 = vector.extract_strided_slice %596 {offsets = [0, 32], sizes = [2, 16], strides = [1, 1]} : vector<2x64xf32> to vector<2x16xf32>
    %606 = math.tanh %605 : vector<2x16xf32>
    %607 = arith.mulf %603, %590 : vector<2x16xf32>
    %608 = arith.mulf %602, %606 : vector<2x16xf32>
    %609 = arith.addf %607, %608 : vector<2x16xf32>
    %610 = math.tanh %609 : vector<2x16xf32>
    %611 = arith.mulf %604, %610 : vector<2x16xf32>
    %612 = vector.extract_strided_slice %533 {offsets = [0, 4, 0], sizes = [2, 1, 64], strides = [1, 1, 1]} : vector<2x8x64xf32> to vector<2x1x64xf32>
    %613 = vector.shape_cast %612 : vector<2x1x64xf32> to vector<2x64xf32>
    %cst_82 = arith.constant dense<0.000000e+00> : vector<2x64xf32>
    %614 = tpu.matmul %611, %526, %cst_82 {dimension_numbers = #tpu.dot_dimension_numbers<[1], [0], [0], [1], [0, 0, 1, 1], [], []>} : vector<2x16xf32>, vector<16x64xf32>, vector<2x64xf32> -> vector<2x64xf32>
    %615 = arith.addf %613, %614 : vector<2x64xf32>
    %616 = arith.negf %615 : vector<2x64xf32>
    %617 = math.exp %616 : vector<2x64xf32>
    %cst_83 = arith.constant 1.000000e+00 : f32
    %618 = vector.broadcast %cst_83 : f32 to vector<2x64xf32>
    %619 = arith.addf %618, %617 : vector<2x64xf32>
    %620 = arith.divf %618, %619 : vector<2x64xf32>
    %621 = vector.extract_strided_slice %620 {offsets = [0, 0], sizes = [2, 16], strides = [1, 1]} : vector<2x64xf32> to vector<2x16xf32>
    %622 = vector.extract_strided_slice %620 {offsets = [0, 16], sizes = [2, 16], strides = [1, 1]} : vector<2x64xf32> to vector<2x16xf32>
    %623 = vector.extract_strided_slice %620 {offsets = [0, 48], sizes = [2, 16], strides = [1, 1]} : vector<2x64xf32> to vector<2x16xf32>
    %624 = vector.extract_strided_slice %615 {offsets = [0, 32], sizes = [2, 16], strides = [1, 1]} : vector<2x64xf32> to vector<2x16xf32>
    %625 = math.tanh %624 : vector<2x16xf32>
    %626 = arith.mulf %622, %609 : vector<2x16xf32>
    %627 = arith.mulf %621, %625 : vector<2x16xf32>
    %628 = arith.addf %626, %627 : vector<2x16xf32>
    %629 = math.tanh %628 : vector<2x16xf32>
    %630 = arith.mulf %623, %629 : vector<2x16xf32>
    %631 = vector.extract_strided_slice %533 {offsets = [0, 5, 0], sizes = [2, 1, 64], strides = [1, 1, 1]} : vector<2x8x64xf32> to vector<2x1x64xf32>
    %632 = vector.shape_cast %631 : vector<2x1x64xf32> to vector<2x64xf32>
    %cst_84 = arith.constant dense<0.000000e+00> : vector<2x64xf32>
    %633 = tpu.matmul %630, %526, %cst_84 {dimension_numbers = #tpu.dot_dimension_numbers<[1], [0], [0], [1], [0, 0, 1, 1], [], []>} : vector<2x16xf32>, vector<16x64xf32>, vector<2x64xf32> -> vector<2x64xf32>
    %634 = arith.addf %632, %633 : vector<2x64xf32>
    %635 = arith.negf %634 : vector<2x64xf32>
    %636 = math.exp %635 : vector<2x64xf32>
    %cst_85 = arith.constant 1.000000e+00 : f32
    %637 = vector.broadcast %cst_85 : f32 to vector<2x64xf32>
    %638 = arith.addf %637, %636 : vector<2x64xf32>
    %639 = arith.divf %637, %638 : vector<2x64xf32>
    %640 = vector.extract_strided_slice %639 {offsets = [0, 0], sizes = [2, 16], strides = [1, 1]} : vector<2x64xf32> to vector<2x16xf32>
    %641 = vector.extract_strided_slice %639 {offsets = [0, 16], sizes = [2, 16], strides = [1, 1]} : vector<2x64xf32> to vector<2x16xf32>
    %642 = vector.extract_strided_slice %639 {offsets = [0, 48], sizes = [2, 16], strides = [1, 1]} : vector<2x64xf32> to vector<2x16xf32>
    %643 = vector.extract_strided_slice %634 {offsets = [0, 32], sizes = [2, 16], strides = [1, 1]} : vector<2x64xf32> to vector<2x16xf32>
    %644 = math.tanh %643 : vector<2x16xf32>
    %645 = arith.mulf %641, %628 : vector<2x16xf32>
    %646 = arith.mulf %640, %644 : vector<2x16xf32>
    %647 = arith.addf %645, %646 : vector<2x16xf32>
    %648 = math.tanh %647 : vector<2x16xf32>
    %649 = arith.mulf %642, %648 : vector<2x16xf32>
    %650 = vector.extract_strided_slice %533 {offsets = [0, 6, 0], sizes = [2, 1, 64], strides = [1, 1, 1]} : vector<2x8x64xf32> to vector<2x1x64xf32>
    %651 = vector.shape_cast %650 : vector<2x1x64xf32> to vector<2x64xf32>
    %cst_86 = arith.constant dense<0.000000e+00> : vector<2x64xf32>
    %652 = tpu.matmul %649, %526, %cst_86 {dimension_numbers = #tpu.dot_dimension_numbers<[1], [0], [0], [1], [0, 0, 1, 1], [], []>} : vector<2x16xf32>, vector<16x64xf32>, vector<2x64xf32> -> vector<2x64xf32>
    %653 = arith.addf %651, %652 : vector<2x64xf32>
    %654 = arith.negf %653 : vector<2x64xf32>
    %655 = math.exp %654 : vector<2x64xf32>
    %cst_87 = arith.constant 1.000000e+00 : f32
    %656 = vector.broadcast %cst_87 : f32 to vector<2x64xf32>
    %657 = arith.addf %656, %655 : vector<2x64xf32>
    %658 = arith.divf %656, %657 : vector<2x64xf32>
    %659 = vector.extract_strided_slice %658 {offsets = [0, 0], sizes = [2, 16], strides = [1, 1]} : vector<2x64xf32> to vector<2x16xf32>
    %660 = vector.extract_strided_slice %658 {offsets = [0, 16], sizes = [2, 16], strides = [1, 1]} : vector<2x64xf32> to vector<2x16xf32>
    %661 = vector.extract_strided_slice %658 {offsets = [0, 48], sizes = [2, 16], strides = [1, 1]} : vector<2x64xf32> to vector<2x16xf32>
    %662 = vector.extract_strided_slice %653 {offsets = [0, 32], sizes = [2, 16], strides = [1, 1]} : vector<2x64xf32> to vector<2x16xf32>
    %663 = math.tanh %662 : vector<2x16xf32>
    %664 = arith.mulf %660, %647 : vector<2x16xf32>
    %665 = arith.mulf %659, %663 : vector<2x16xf32>
    %666 = arith.addf %664, %665 : vector<2x16xf32>
    %667 = math.tanh %666 : vector<2x16xf32>
    %668 = arith.mulf %661, %667 : vector<2x16xf32>
    %669 = vector.extract_strided_slice %533 {offsets = [0, 7, 0], sizes = [2, 1, 64], strides = [1, 1, 1]} : vector<2x8x64xf32> to vector<2x1x64xf32>
    %670 = vector.shape_cast %669 : vector<2x1x64xf32> to vector<2x64xf32>
    %cst_88 = arith.constant dense<0.000000e+00> : vector<2x64xf32>
    %671 = tpu.matmul %668, %526, %cst_88 {dimension_numbers = #tpu.dot_dimension_numbers<[1], [0], [0], [1], [0, 0, 1, 1], [], []>} : vector<2x16xf32>, vector<16x64xf32>, vector<2x64xf32> -> vector<2x64xf32>
    %672 = arith.addf %670, %671 : vector<2x64xf32>
    %673 = arith.negf %672 : vector<2x64xf32>
    %674 = math.exp %673 : vector<2x64xf32>
    %cst_89 = arith.constant 1.000000e+00 : f32
    %675 = vector.broadcast %cst_89 : f32 to vector<2x64xf32>
    %676 = arith.addf %675, %674 : vector<2x64xf32>
    %677 = arith.divf %675, %676 : vector<2x64xf32>
    %678 = vector.extract_strided_slice %677 {offsets = [0, 0], sizes = [2, 16], strides = [1, 1]} : vector<2x64xf32> to vector<2x16xf32>
    %679 = vector.extract_strided_slice %677 {offsets = [0, 16], sizes = [2, 16], strides = [1, 1]} : vector<2x64xf32> to vector<2x16xf32>
    %680 = vector.extract_strided_slice %677 {offsets = [0, 48], sizes = [2, 16], strides = [1, 1]} : vector<2x64xf32> to vector<2x16xf32>
    %681 = vector.extract_strided_slice %672 {offsets = [0, 32], sizes = [2, 16], strides = [1, 1]} : vector<2x64xf32> to vector<2x16xf32>
    %682 = math.tanh %681 : vector<2x16xf32>
    %683 = arith.mulf %679, %666 : vector<2x16xf32>
    %684 = arith.mulf %678, %682 : vector<2x16xf32>
    %685 = arith.addf %683, %684 : vector<2x16xf32>
    %686 = math.tanh %685 : vector<2x16xf32>
    %687 = arith.mulf %680, %686 : vector<2x16xf32>
    %688 = vector.shape_cast %554 : vector<2x16xf32> to vector<2x1x16xf32>
    %689 = vector.shape_cast %573 : vector<2x16xf32> to vector<2x1x16xf32>
    %690 = vector.shape_cast %592 : vector<2x16xf32> to vector<2x1x16xf32>
    %691 = vector.shape_cast %611 : vector<2x16xf32> to vector<2x1x16xf32>
    %692 = vector.shape_cast %630 : vector<2x16xf32> to vector<2x1x16xf32>
    %693 = vector.shape_cast %649 : vector<2x16xf32> to vector<2x1x16xf32>
    %694 = vector.shape_cast %668 : vector<2x16xf32> to vector<2x1x16xf32>
    %695 = vector.shape_cast %687 : vector<2x16xf32> to vector<2x1x16xf32>
    %696 = tpu.concatenate %688, %689, %690, %691, %692, %693, %694, %695 in 1 : vector<2x1x16xf32>, vector<2x1x16xf32>, vector<2x1x16xf32>, vector<2x1x16xf32>, vector<2x1x16xf32>, vector<2x1x16xf32>, vector<2x1x16xf32>, vector<2x1x16xf32> -> vector<2x8x16xf32>
    %c0_90 = arith.constant 0 : index
    %c0_91 = arith.constant 0 : index
    %c0_92 = arith.constant 0 : index
    %697 = vector.load %arg3[%c0_90, %c0_91, %c0_92] : memref<2x8x16xf32, #tpu.memory_space<vmem>>, vector<2x8x16xf32>
    tpu.vector_store %arg3[%c0_90, %c0_91, %c0_92], %696 {strides = array<i32>} : memref<2x8x16xf32, #tpu.memory_space<vmem>>, vector<2x8x16xf32>,
    %c144 = arith.constant 144 : index
    %c0_93 = arith.constant 0 : index
    %698 = vector.load %arg1[%c144, %c0_93] : memref<304x128xf32, #tpu.memory_space<vmem>>, vector<8x128xf32>
    %c152 = arith.constant 152 : index
    %c0_94 = arith.constant 0 : index
    %699 = vector.load %arg1[%c152, %c0_94] : memref<304x128xf32, #tpu.memory_space<vmem>>, vector<32x128xf32>
    %c184 = arith.constant 184 : index
    %c0_95 = arith.constant 0 : index
    %700 = vector.load %arg1[%c184, %c0_95] : memref<304x128xf32, #tpu.memory_space<vmem>>, vector<1x128xf32>
    %701 = vector.shape_cast %348 : vector<2x8x8xf32> to vector<16x8xf32>
    %cst_96 = arith.constant dense<0.000000e+00> : vector<16x128xf32>
    %702 = tpu.matmul %701, %698, %cst_96 {dimension_numbers = #tpu.dot_dimension_numbers<[1], [0], [0], [1], [0, 0, 1, 1], [], []>} : vector<16x8xf32>, vector<8x128xf32>, vector<16x128xf32> -> vector<16x128xf32>
    %703 = vector.broadcast %700 : vector<1x128xf32> to vector<16x128xf32>
    %704 = arith.addf %702, %703 : vector<16x128xf32>
    %705 = vector.shape_cast %704 : vector<16x128xf32> to vector<2x8x128xf32>
    %cst_97 = arith.constant 0.000000e+00 : f32
    %706 = vector.broadcast %cst_97 : f32 to vector<2x32xf32>
    %cst_98 = arith.constant 0.000000e+00 : f32
    %707 = vector.broadcast %cst_98 : f32 to vector<2x32xf32>
    %708 = vector.extract_strided_slice %705 {offsets = [0, 0, 0], sizes = [2, 1, 128], strides = [1, 1, 1]} : vector<2x8x128xf32> to vector<2x1x128xf32>
    %709 = vector.shape_cast %708 : vector<2x1x128xf32> to vector<2x128xf32>
    %cst_99 = arith.constant dense<0.000000e+00> : vector<2x128xf32>
    %710 = tpu.matmul %706, %699, %cst_99 {dimension_numbers = #tpu.dot_dimension_numbers<[1], [0], [0], [1], [0, 0, 1, 1], [], []>} : vector<2x32xf32>, vector<32x128xf32>, vector<2x128xf32> -> vector<2x128xf32>
    %711 = arith.addf %709, %710 : vector<2x128xf32>
    %712 = arith.negf %711 : vector<2x128xf32>
    %713 = math.exp %712 : vector<2x128xf32>
    %cst_100 = arith.constant 1.000000e+00 : f32
    %714 = vector.broadcast %cst_100 : f32 to vector<2x128xf32>
    %715 = arith.addf %714, %713 : vector<2x128xf32>
    %716 = arith.divf %714, %715 : vector<2x128xf32>
    %717 = vector.extract_strided_slice %716 {offsets = [0, 0], sizes = [2, 32], strides = [1, 1]} : vector<2x128xf32> to vector<2x32xf32>
    %718 = vector.extract_strided_slice %716 {offsets = [0, 32], sizes = [2, 32], strides = [1, 1]} : vector<2x128xf32> to vector<2x32xf32>
    %719 = vector.extract_strided_slice %716 {offsets = [0, 96], sizes = [2, 32], strides = [1, 1]} : vector<2x128xf32> to vector<2x32xf32>
    %720 = vector.extract_strided_slice %711 {offsets = [0, 64], sizes = [2, 32], strides = [1, 1]} : vector<2x128xf32> to vector<2x32xf32>
    %721 = math.tanh %720 : vector<2x32xf32>
    %722 = arith.mulf %718, %707 : vector<2x32xf32>
    %723 = arith.mulf %717, %721 : vector<2x32xf32>
    %724 = arith.addf %722, %723 : vector<2x32xf32>
    %725 = math.tanh %724 : vector<2x32xf32>
    %726 = arith.mulf %719, %725 : vector<2x32xf32>
    %727 = vector.extract_strided_slice %705 {offsets = [0, 1, 0], sizes = [2, 1, 128], strides = [1, 1, 1]} : vector<2x8x128xf32> to vector<2x1x128xf32>
    %728 = vector.shape_cast %727 : vector<2x1x128xf32> to vector<2x128xf32>
    %cst_101 = arith.constant dense<0.000000e+00> : vector<2x128xf32>
    %729 = tpu.matmul %726, %699, %cst_101 {dimension_numbers = #tpu.dot_dimension_numbers<[1], [0], [0], [1], [0, 0, 1, 1], [], []>} : vector<2x32xf32>, vector<32x128xf32>, vector<2x128xf32> -> vector<2x128xf32>
    %730 = arith.addf %728, %729 : vector<2x128xf32>
    %731 = arith.negf %730 : vector<2x128xf32>
    %732 = math.exp %731 : vector<2x128xf32>
    %cst_102 = arith.constant 1.000000e+00 : f32
    %733 = vector.broadcast %cst_102 : f32 to vector<2x128xf32>
    %734 = arith.addf %733, %732 : vector<2x128xf32>
    %735 = arith.divf %733, %734 : vector<2x128xf32>
    %736 = vector.extract_strided_slice %735 {offsets = [0, 0], sizes = [2, 32], strides = [1, 1]} : vector<2x128xf32> to vector<2x32xf32>
    %737 = vector.extract_strided_slice %735 {offsets = [0, 32], sizes = [2, 32], strides = [1, 1]} : vector<2x128xf32> to vector<2x32xf32>
    %738 = vector.extract_strided_slice %735 {offsets = [0, 96], sizes = [2, 32], strides = [1, 1]} : vector<2x128xf32> to vector<2x32xf32>
    %739 = vector.extract_strided_slice %730 {offsets = [0, 64], sizes = [2, 32], strides = [1, 1]} : vector<2x128xf32> to vector<2x32xf32>
    %740 = math.tanh %739 : vector<2x32xf32>
    %741 = arith.mulf %737, %724 : vector<2x32xf32>
    %742 = arith.mulf %736, %740 : vector<2x32xf32>
    %743 = arith.addf %741, %742 : vector<2x32xf32>
    %744 = math.tanh %743 : vector<2x32xf32>
    %745 = arith.mulf %738, %744 : vector<2x32xf32>
    %746 = vector.extract_strided_slice %705 {offsets = [0, 2, 0], sizes = [2, 1, 128], strides = [1, 1, 1]} : vector<2x8x128xf32> to vector<2x1x128xf32>
    %747 = vector.shape_cast %746 : vector<2x1x128xf32> to vector<2x128xf32>
    %cst_103 = arith.constant dense<0.000000e+00> : vector<2x128xf32>
    %748 = tpu.matmul %745, %699, %cst_103 {dimension_numbers = #tpu.dot_dimension_numbers<[1], [0], [0], [1], [0, 0, 1, 1], [], []>} : vector<2x32xf32>, vector<32x128xf32>, vector<2x128xf32> -> vector<2x128xf32>
    %749 = arith.addf %747, %748 : vector<2x128xf32>
    %750 = arith.negf %749 : vector<2x128xf32>
    %751 = math.exp %750 : vector<2x128xf32>
    %cst_104 = arith.constant 1.000000e+00 : f32
    %752 = vector.broadcast %cst_104 : f32 to vector<2x128xf32>
    %753 = arith.addf %752, %751 : vector<2x128xf32>
    %754 = arith.divf %752, %753 : vector<2x128xf32>
    %755 = vector.extract_strided_slice %754 {offsets = [0, 0], sizes = [2, 32], strides = [1, 1]} : vector<2x128xf32> to vector<2x32xf32>
    %756 = vector.extract_strided_slice %754 {offsets = [0, 32], sizes = [2, 32], strides = [1, 1]} : vector<2x128xf32> to vector<2x32xf32>
    %757 = vector.extract_strided_slice %754 {offsets = [0, 96], sizes = [2, 32], strides = [1, 1]} : vector<2x128xf32> to vector<2x32xf32>
    %758 = vector.extract_strided_slice %749 {offsets = [0, 64], sizes = [2, 32], strides = [1, 1]} : vector<2x128xf32> to vector<2x32xf32>
    %759 = math.tanh %758 : vector<2x32xf32>
    %760 = arith.mulf %756, %743 : vector<2x32xf32>
    %761 = arith.mulf %755, %759 : vector<2x32xf32>
    %762 = arith.addf %760, %761 : vector<2x32xf32>
    %763 = math.tanh %762 : vector<2x32xf32>
    %764 = arith.mulf %757, %763 : vector<2x32xf32>
    %765 = vector.extract_strided_slice %705 {offsets = [0, 3, 0], sizes = [2, 1, 128], strides = [1, 1, 1]} : vector<2x8x128xf32> to vector<2x1x128xf32>
    %766 = vector.shape_cast %765 : vector<2x1x128xf32> to vector<2x128xf32>
    %cst_105 = arith.constant dense<0.000000e+00> : vector<2x128xf32>
    %767 = tpu.matmul %764, %699, %cst_105 {dimension_numbers = #tpu.dot_dimension_numbers<[1], [0], [0], [1], [0, 0, 1, 1], [], []>} : vector<2x32xf32>, vector<32x128xf32>, vector<2x128xf32> -> vector<2x128xf32>
    %768 = arith.addf %766, %767 : vector<2x128xf32>
    %769 = arith.negf %768 : vector<2x128xf32>
    %770 = math.exp %769 : vector<2x128xf32>
    %cst_106 = arith.constant 1.000000e+00 : f32
    %771 = vector.broadcast %cst_106 : f32 to vector<2x128xf32>
    %772 = arith.addf %771, %770 : vector<2x128xf32>
    %773 = arith.divf %771, %772 : vector<2x128xf32>
    %774 = vector.extract_strided_slice %773 {offsets = [0, 0], sizes = [2, 32], strides = [1, 1]} : vector<2x128xf32> to vector<2x32xf32>
    %775 = vector.extract_strided_slice %773 {offsets = [0, 32], sizes = [2, 32], strides = [1, 1]} : vector<2x128xf32> to vector<2x32xf32>
    %776 = vector.extract_strided_slice %773 {offsets = [0, 96], sizes = [2, 32], strides = [1, 1]} : vector<2x128xf32> to vector<2x32xf32>
    %777 = vector.extract_strided_slice %768 {offsets = [0, 64], sizes = [2, 32], strides = [1, 1]} : vector<2x128xf32> to vector<2x32xf32>
    %778 = math.tanh %777 : vector<2x32xf32>
    %779 = arith.mulf %775, %762 : vector<2x32xf32>
    %780 = arith.mulf %774, %778 : vector<2x32xf32>
    %781 = arith.addf %779, %780 : vector<2x32xf32>
    %782 = math.tanh %781 : vector<2x32xf32>
    %783 = arith.mulf %776, %782 : vector<2x32xf32>
    %784 = vector.extract_strided_slice %705 {offsets = [0, 4, 0], sizes = [2, 1, 128], strides = [1, 1, 1]} : vector<2x8x128xf32> to vector<2x1x128xf32>
    %785 = vector.shape_cast %784 : vector<2x1x128xf32> to vector<2x128xf32>
    %cst_107 = arith.constant dense<0.000000e+00> : vector<2x128xf32>
    %786 = tpu.matmul %783, %699, %cst_107 {dimension_numbers = #tpu.dot_dimension_numbers<[1], [0], [0], [1], [0, 0, 1, 1], [], []>} : vector<2x32xf32>, vector<32x128xf32>, vector<2x128xf32> -> vector<2x128xf32>
    %787 = arith.addf %785, %786 : vector<2x128xf32>
    %788 = arith.negf %787 : vector<2x128xf32>
    %789 = math.exp %788 : vector<2x128xf32>
    %cst_108 = arith.constant 1.000000e+00 : f32
    %790 = vector.broadcast %cst_108 : f32 to vector<2x128xf32>
    %791 = arith.addf %790, %789 : vector<2x128xf32>
    %792 = arith.divf %790, %791 : vector<2x128xf32>
    %793 = vector.extract_strided_slice %792 {offsets = [0, 0], sizes = [2, 32], strides = [1, 1]} : vector<2x128xf32> to vector<2x32xf32>
    %794 = vector.extract_strided_slice %792 {offsets = [0, 32], sizes = [2, 32], strides = [1, 1]} : vector<2x128xf32> to vector<2x32xf32>
    %795 = vector.extract_strided_slice %792 {offsets = [0, 96], sizes = [2, 32], strides = [1, 1]} : vector<2x128xf32> to vector<2x32xf32>
    %796 = vector.extract_strided_slice %787 {offsets = [0, 64], sizes = [2, 32], strides = [1, 1]} : vector<2x128xf32> to vector<2x32xf32>
    %797 = math.tanh %796 : vector<2x32xf32>
    %798 = arith.mulf %794, %781 : vector<2x32xf32>
    %799 = arith.mulf %793, %797 : vector<2x32xf32>
    %800 = arith.addf %798, %799 : vector<2x32xf32>
    %801 = math.tanh %800 : vector<2x32xf32>
    %802 = arith.mulf %795, %801 : vector<2x32xf32>
    %803 = vector.extract_strided_slice %705 {offsets = [0, 5, 0], sizes = [2, 1, 128], strides = [1, 1, 1]} : vector<2x8x128xf32> to vector<2x1x128xf32>
    %804 = vector.shape_cast %803 : vector<2x1x128xf32> to vector<2x128xf32>
    %cst_109 = arith.constant dense<0.000000e+00> : vector<2x128xf32>
    %805 = tpu.matmul %802, %699, %cst_109 {dimension_numbers = #tpu.dot_dimension_numbers<[1], [0], [0], [1], [0, 0, 1, 1], [], []>} : vector<2x32xf32>, vector<32x128xf32>, vector<2x128xf32> -> vector<2x128xf32>
    %806 = arith.addf %804, %805 : vector<2x128xf32>
    %807 = arith.negf %806 : vector<2x128xf32>
    %808 = math.exp %807 : vector<2x128xf32>
    %cst_110 = arith.constant 1.000000e+00 : f32
    %809 = vector.broadcast %cst_110 : f32 to vector<2x128xf32>
    %810 = arith.addf %809, %808 : vector<2x128xf32>
    %811 = arith.divf %809, %810 : vector<2x128xf32>
    %812 = vector.extract_strided_slice %811 {offsets = [0, 0], sizes = [2, 32], strides = [1, 1]} : vector<2x128xf32> to vector<2x32xf32>
    %813 = vector.extract_strided_slice %811 {offsets = [0, 32], sizes = [2, 32], strides = [1, 1]} : vector<2x128xf32> to vector<2x32xf32>
    %814 = vector.extract_strided_slice %811 {offsets = [0, 96], sizes = [2, 32], strides = [1, 1]} : vector<2x128xf32> to vector<2x32xf32>
    %815 = vector.extract_strided_slice %806 {offsets = [0, 64], sizes = [2, 32], strides = [1, 1]} : vector<2x128xf32> to vector<2x32xf32>
    %816 = math.tanh %815 : vector<2x32xf32>
    %817 = arith.mulf %813, %800 : vector<2x32xf32>
    %818 = arith.mulf %812, %816 : vector<2x32xf32>
    %819 = arith.addf %817, %818 : vector<2x32xf32>
    %820 = math.tanh %819 : vector<2x32xf32>
    %821 = arith.mulf %814, %820 : vector<2x32xf32>
    %822 = vector.extract_strided_slice %705 {offsets = [0, 6, 0], sizes = [2, 1, 128], strides = [1, 1, 1]} : vector<2x8x128xf32> to vector<2x1x128xf32>
    %823 = vector.shape_cast %822 : vector<2x1x128xf32> to vector<2x128xf32>
    %cst_111 = arith.constant dense<0.000000e+00> : vector<2x128xf32>
    %824 = tpu.matmul %821, %699, %cst_111 {dimension_numbers = #tpu.dot_dimension_numbers<[1], [0], [0], [1], [0, 0, 1, 1], [], []>} : vector<2x32xf32>, vector<32x128xf32>, vector<2x128xf32> -> vector<2x128xf32>
    %825 = arith.addf %823, %824 : vector<2x128xf32>
    %826 = arith.negf %825 : vector<2x128xf32>
    %827 = math.exp %826 : vector<2x128xf32>
    %cst_112 = arith.constant 1.000000e+00 : f32
    %828 = vector.broadcast %cst_112 : f32 to vector<2x128xf32>
    %829 = arith.addf %828, %827 : vector<2x128xf32>
    %830 = arith.divf %828, %829 : vector<2x128xf32>
    %831 = vector.extract_strided_slice %830 {offsets = [0, 0], sizes = [2, 32], strides = [1, 1]} : vector<2x128xf32> to vector<2x32xf32>
    %832 = vector.extract_strided_slice %830 {offsets = [0, 32], sizes = [2, 32], strides = [1, 1]} : vector<2x128xf32> to vector<2x32xf32>
    %833 = vector.extract_strided_slice %830 {offsets = [0, 96], sizes = [2, 32], strides = [1, 1]} : vector<2x128xf32> to vector<2x32xf32>
    %834 = vector.extract_strided_slice %825 {offsets = [0, 64], sizes = [2, 32], strides = [1, 1]} : vector<2x128xf32> to vector<2x32xf32>
    %835 = math.tanh %834 : vector<2x32xf32>
    %836 = arith.mulf %832, %819 : vector<2x32xf32>
    %837 = arith.mulf %831, %835 : vector<2x32xf32>
    %838 = arith.addf %836, %837 : vector<2x32xf32>
    %839 = math.tanh %838 : vector<2x32xf32>
    %840 = arith.mulf %833, %839 : vector<2x32xf32>
    %841 = vector.extract_strided_slice %705 {offsets = [0, 7, 0], sizes = [2, 1, 128], strides = [1, 1, 1]} : vector<2x8x128xf32> to vector<2x1x128xf32>
    %842 = vector.shape_cast %841 : vector<2x1x128xf32> to vector<2x128xf32>
    %cst_113 = arith.constant dense<0.000000e+00> : vector<2x128xf32>
    %843 = tpu.matmul %840, %699, %cst_113 {dimension_numbers = #tpu.dot_dimension_numbers<[1], [0], [0], [1], [0, 0, 1, 1], [], []>} : vector<2x32xf32>, vector<32x128xf32>, vector<2x128xf32> -> vector<2x128xf32>
    %844 = arith.addf %842, %843 : vector<2x128xf32>
    %845 = arith.negf %844 : vector<2x128xf32>
    %846 = math.exp %845 : vector<2x128xf32>
    %cst_114 = arith.constant 1.000000e+00 : f32
    %847 = vector.broadcast %cst_114 : f32 to vector<2x128xf32>
    %848 = arith.addf %847, %846 : vector<2x128xf32>
    %849 = arith.divf %847, %848 : vector<2x128xf32>
    %850 = vector.extract_strided_slice %849 {offsets = [0, 0], sizes = [2, 32], strides = [1, 1]} : vector<2x128xf32> to vector<2x32xf32>
    %851 = vector.extract_strided_slice %849 {offsets = [0, 32], sizes = [2, 32], strides = [1, 1]} : vector<2x128xf32> to vector<2x32xf32>
    %852 = vector.extract_strided_slice %849 {offsets = [0, 96], sizes = [2, 32], strides = [1, 1]} : vector<2x128xf32> to vector<2x32xf32>
    %853 = vector.extract_strided_slice %844 {offsets = [0, 64], sizes = [2, 32], strides = [1, 1]} : vector<2x128xf32> to vector<2x32xf32>
    %854 = math.tanh %853 : vector<2x32xf32>
    %855 = arith.mulf %851, %838 : vector<2x32xf32>
    %856 = arith.mulf %850, %854 : vector<2x32xf32>
    %857 = arith.addf %855, %856 : vector<2x32xf32>
    %858 = math.tanh %857 : vector<2x32xf32>
    %859 = arith.mulf %852, %858 : vector<2x32xf32>
    %860 = vector.shape_cast %726 : vector<2x32xf32> to vector<2x1x32xf32>
    %861 = vector.shape_cast %745 : vector<2x32xf32> to vector<2x1x32xf32>
    %862 = vector.shape_cast %764 : vector<2x32xf32> to vector<2x1x32xf32>
    %863 = vector.shape_cast %783 : vector<2x32xf32> to vector<2x1x32xf32>
    %864 = vector.shape_cast %802 : vector<2x32xf32> to vector<2x1x32xf32>
    %865 = vector.shape_cast %821 : vector<2x32xf32> to vector<2x1x32xf32>
    %866 = vector.shape_cast %840 : vector<2x32xf32> to vector<2x1x32xf32>
    %867 = vector.shape_cast %859 : vector<2x32xf32> to vector<2x1x32xf32>
    %868 = tpu.concatenate %860, %861, %862, %863, %864, %865, %866, %867 in 1 : vector<2x1x32xf32>, vector<2x1x32xf32>, vector<2x1x32xf32>, vector<2x1x32xf32>, vector<2x1x32xf32>, vector<2x1x32xf32>, vector<2x1x32xf32>, vector<2x1x32xf32> -> vector<2x8x32xf32>
    %c192 = arith.constant 192 : index
    %c0_115 = arith.constant 0 : index
    %869 = vector.load %arg1[%c192, %c0_115] : memref<304x128xf32, #tpu.memory_space<vmem>>, vector<32x128xf32>
    %c224 = arith.constant 224 : index
    %c0_116 = arith.constant 0 : index
    %870 = vector.load %arg1[%c224, %c0_116] : memref<304x128xf32, #tpu.memory_space<vmem>>, vector<32x128xf32>
    %c256 = arith.constant 256 : index
    %c0_117 = arith.constant 0 : index
    %871 = vector.load %arg1[%c256, %c0_117] : memref<304x128xf32, #tpu.memory_space<vmem>>, vector<1x128xf32>
    %872 = vector.shape_cast %868 : vector<2x8x32xf32> to vector<16x32xf32>
    %cst_118 = arith.constant dense<0.000000e+00> : vector<16x128xf32>
    %873 = tpu.matmul %872, %869, %cst_118 {dimension_numbers = #tpu.dot_dimension_numbers<[1], [0], [0], [1], [0, 0, 1, 1], [], []>} : vector<16x32xf32>, vector<32x128xf32>, vector<16x128xf32> -> vector<16x128xf32>
    %874 = vector.broadcast %871 : vector<1x128xf32> to vector<16x128xf32>
    %875 = arith.addf %873, %874 : vector<16x128xf32>
    %876 = vector.shape_cast %875 : vector<16x128xf32> to vector<2x8x128xf32>
    %cst_119 = arith.constant 0.000000e+00 : f32
    %877 = vector.broadcast %cst_119 : f32 to vector<2x32xf32>
    %cst_120 = arith.constant 0.000000e+00 : f32
    %878 = vector.broadcast %cst_120 : f32 to vector<2x32xf32>
    %879 = vector.extract_strided_slice %876 {offsets = [0, 0, 0], sizes = [2, 1, 128], strides = [1, 1, 1]} : vector<2x8x128xf32> to vector<2x1x128xf32>
    %880 = vector.shape_cast %879 : vector<2x1x128xf32> to vector<2x128xf32>
    %cst_121 = arith.constant dense<0.000000e+00> : vector<2x128xf32>
    %881 = tpu.matmul %877, %870, %cst_121 {dimension_numbers = #tpu.dot_dimension_numbers<[1], [0], [0], [1], [0, 0, 1, 1], [], []>} : vector<2x32xf32>, vector<32x128xf32>, vector<2x128xf32> -> vector<2x128xf32>
    %882 = arith.addf %880, %881 : vector<2x128xf32>
    %883 = arith.negf %882 : vector<2x128xf32>
    %884 = math.exp %883 : vector<2x128xf32>
    %cst_122 = arith.constant 1.000000e+00 : f32
    %885 = vector.broadcast %cst_122 : f32 to vector<2x128xf32>
    %886 = arith.addf %885, %884 : vector<2x128xf32>
    %887 = arith.divf %885, %886 : vector<2x128xf32>
    %888 = vector.extract_strided_slice %887 {offsets = [0, 0], sizes = [2, 32], strides = [1, 1]} : vector<2x128xf32> to vector<2x32xf32>
    %889 = vector.extract_strided_slice %887 {offsets = [0, 32], sizes = [2, 32], strides = [1, 1]} : vector<2x128xf32> to vector<2x32xf32>
    %890 = vector.extract_strided_slice %887 {offsets = [0, 96], sizes = [2, 32], strides = [1, 1]} : vector<2x128xf32> to vector<2x32xf32>
    %891 = vector.extract_strided_slice %882 {offsets = [0, 64], sizes = [2, 32], strides = [1, 1]} : vector<2x128xf32> to vector<2x32xf32>
    %892 = math.tanh %891 : vector<2x32xf32>
    %893 = arith.mulf %889, %878 : vector<2x32xf32>
    %894 = arith.mulf %888, %892 : vector<2x32xf32>
    %895 = arith.addf %893, %894 : vector<2x32xf32>
    %896 = math.tanh %895 : vector<2x32xf32>
    %897 = arith.mulf %890, %896 : vector<2x32xf32>
    %898 = vector.extract_strided_slice %876 {offsets = [0, 1, 0], sizes = [2, 1, 128], strides = [1, 1, 1]} : vector<2x8x128xf32> to vector<2x1x128xf32>
    %899 = vector.shape_cast %898 : vector<2x1x128xf32> to vector<2x128xf32>
    %cst_123 = arith.constant dense<0.000000e+00> : vector<2x128xf32>
    %900 = tpu.matmul %897, %870, %cst_123 {dimension_numbers = #tpu.dot_dimension_numbers<[1], [0], [0], [1], [0, 0, 1, 1], [], []>} : vector<2x32xf32>, vector<32x128xf32>, vector<2x128xf32> -> vector<2x128xf32>
    %901 = arith.addf %899, %900 : vector<2x128xf32>
    %902 = arith.negf %901 : vector<2x128xf32>
    %903 = math.exp %902 : vector<2x128xf32>
    %cst_124 = arith.constant 1.000000e+00 : f32
    %904 = vector.broadcast %cst_124 : f32 to vector<2x128xf32>
    %905 = arith.addf %904, %903 : vector<2x128xf32>
    %906 = arith.divf %904, %905 : vector<2x128xf32>
    %907 = vector.extract_strided_slice %906 {offsets = [0, 0], sizes = [2, 32], strides = [1, 1]} : vector<2x128xf32> to vector<2x32xf32>
    %908 = vector.extract_strided_slice %906 {offsets = [0, 32], sizes = [2, 32], strides = [1, 1]} : vector<2x128xf32> to vector<2x32xf32>
    %909 = vector.extract_strided_slice %906 {offsets = [0, 96], sizes = [2, 32], strides = [1, 1]} : vector<2x128xf32> to vector<2x32xf32>
    %910 = vector.extract_strided_slice %901 {offsets = [0, 64], sizes = [2, 32], strides = [1, 1]} : vector<2x128xf32> to vector<2x32xf32>
    %911 = math.tanh %910 : vector<2x32xf32>
    %912 = arith.mulf %908, %895 : vector<2x32xf32>
    %913 = arith.mulf %907, %911 : vector<2x32xf32>
    %914 = arith.addf %912, %913 : vector<2x32xf32>
    %915 = math.tanh %914 : vector<2x32xf32>
    %916 = arith.mulf %909, %915 : vector<2x32xf32>
    %917 = vector.extract_strided_slice %876 {offsets = [0, 2, 0], sizes = [2, 1, 128], strides = [1, 1, 1]} : vector<2x8x128xf32> to vector<2x1x128xf32>
    %918 = vector.shape_cast %917 : vector<2x1x128xf32> to vector<2x128xf32>
    %cst_125 = arith.constant dense<0.000000e+00> : vector<2x128xf32>
    %919 = tpu.matmul %916, %870, %cst_125 {dimension_numbers = #tpu.dot_dimension_numbers<[1], [0], [0], [1], [0, 0, 1, 1], [], []>} : vector<2x32xf32>, vector<32x128xf32>, vector<2x128xf32> -> vector<2x128xf32>
    %920 = arith.addf %918, %919 : vector<2x128xf32>
    %921 = arith.negf %920 : vector<2x128xf32>
    %922 = math.exp %921 : vector<2x128xf32>
    %cst_126 = arith.constant 1.000000e+00 : f32
    %923 = vector.broadcast %cst_126 : f32 to vector<2x128xf32>
    %924 = arith.addf %923, %922 : vector<2x128xf32>
    %925 = arith.divf %923, %924 : vector<2x128xf32>
    %926 = vector.extract_strided_slice %925 {offsets = [0, 0], sizes = [2, 32], strides = [1, 1]} : vector<2x128xf32> to vector<2x32xf32>
    %927 = vector.extract_strided_slice %925 {offsets = [0, 32], sizes = [2, 32], strides = [1, 1]} : vector<2x128xf32> to vector<2x32xf32>
    %928 = vector.extract_strided_slice %925 {offsets = [0, 96], sizes = [2, 32], strides = [1, 1]} : vector<2x128xf32> to vector<2x32xf32>
    %929 = vector.extract_strided_slice %920 {offsets = [0, 64], sizes = [2, 32], strides = [1, 1]} : vector<2x128xf32> to vector<2x32xf32>
    %930 = math.tanh %929 : vector<2x32xf32>
    %931 = arith.mulf %927, %914 : vector<2x32xf32>
    %932 = arith.mulf %926, %930 : vector<2x32xf32>
    %933 = arith.addf %931, %932 : vector<2x32xf32>
    %934 = math.tanh %933 : vector<2x32xf32>
    %935 = arith.mulf %928, %934 : vector<2x32xf32>
    %936 = vector.extract_strided_slice %876 {offsets = [0, 3, 0], sizes = [2, 1, 128], strides = [1, 1, 1]} : vector<2x8x128xf32> to vector<2x1x128xf32>
    %937 = vector.shape_cast %936 : vector<2x1x128xf32> to vector<2x128xf32>
    %cst_127 = arith.constant dense<0.000000e+00> : vector<2x128xf32>
    %938 = tpu.matmul %935, %870, %cst_127 {dimension_numbers = #tpu.dot_dimension_numbers<[1], [0], [0], [1], [0, 0, 1, 1], [], []>} : vector<2x32xf32>, vector<32x128xf32>, vector<2x128xf32> -> vector<2x128xf32>
    %939 = arith.addf %937, %938 : vector<2x128xf32>
    %940 = arith.negf %939 : vector<2x128xf32>
    %941 = math.exp %940 : vector<2x128xf32>
    %cst_128 = arith.constant 1.000000e+00 : f32
    %942 = vector.broadcast %cst_128 : f32 to vector<2x128xf32>
    %943 = arith.addf %942, %941 : vector<2x128xf32>
    %944 = arith.divf %942, %943 : vector<2x128xf32>
    %945 = vector.extract_strided_slice %944 {offsets = [0, 0], sizes = [2, 32], strides = [1, 1]} : vector<2x128xf32> to vector<2x32xf32>
    %946 = vector.extract_strided_slice %944 {offsets = [0, 32], sizes = [2, 32], strides = [1, 1]} : vector<2x128xf32> to vector<2x32xf32>
    %947 = vector.extract_strided_slice %944 {offsets = [0, 96], sizes = [2, 32], strides = [1, 1]} : vector<2x128xf32> to vector<2x32xf32>
    %948 = vector.extract_strided_slice %939 {offsets = [0, 64], sizes = [2, 32], strides = [1, 1]} : vector<2x128xf32> to vector<2x32xf32>
    %949 = math.tanh %948 : vector<2x32xf32>
    %950 = arith.mulf %946, %933 : vector<2x32xf32>
    %951 = arith.mulf %945, %949 : vector<2x32xf32>
    %952 = arith.addf %950, %951 : vector<2x32xf32>
    %953 = math.tanh %952 : vector<2x32xf32>
    %954 = arith.mulf %947, %953 : vector<2x32xf32>
    %955 = vector.extract_strided_slice %876 {offsets = [0, 4, 0], sizes = [2, 1, 128], strides = [1, 1, 1]} : vector<2x8x128xf32> to vector<2x1x128xf32>
    %956 = vector.shape_cast %955 : vector<2x1x128xf32> to vector<2x128xf32>
    %cst_129 = arith.constant dense<0.000000e+00> : vector<2x128xf32>
    %957 = tpu.matmul %954, %870, %cst_129 {dimension_numbers = #tpu.dot_dimension_numbers<[1], [0], [0], [1], [0, 0, 1, 1], [], []>} : vector<2x32xf32>, vector<32x128xf32>, vector<2x128xf32> -> vector<2x128xf32>
    %958 = arith.addf %956, %957 : vector<2x128xf32>
    %959 = arith.negf %958 : vector<2x128xf32>
    %960 = math.exp %959 : vector<2x128xf32>
    %cst_130 = arith.constant 1.000000e+00 : f32
    %961 = vector.broadcast %cst_130 : f32 to vector<2x128xf32>
    %962 = arith.addf %961, %960 : vector<2x128xf32>
    %963 = arith.divf %961, %962 : vector<2x128xf32>
    %964 = vector.extract_strided_slice %963 {offsets = [0, 0], sizes = [2, 32], strides = [1, 1]} : vector<2x128xf32> to vector<2x32xf32>
    %965 = vector.extract_strided_slice %963 {offsets = [0, 32], sizes = [2, 32], strides = [1, 1]} : vector<2x128xf32> to vector<2x32xf32>
    %966 = vector.extract_strided_slice %963 {offsets = [0, 96], sizes = [2, 32], strides = [1, 1]} : vector<2x128xf32> to vector<2x32xf32>
    %967 = vector.extract_strided_slice %958 {offsets = [0, 64], sizes = [2, 32], strides = [1, 1]} : vector<2x128xf32> to vector<2x32xf32>
    %968 = math.tanh %967 : vector<2x32xf32>
    %969 = arith.mulf %965, %952 : vector<2x32xf32>
    %970 = arith.mulf %964, %968 : vector<2x32xf32>
    %971 = arith.addf %969, %970 : vector<2x32xf32>
    %972 = math.tanh %971 : vector<2x32xf32>
    %973 = arith.mulf %966, %972 : vector<2x32xf32>
    %974 = vector.extract_strided_slice %876 {offsets = [0, 5, 0], sizes = [2, 1, 128], strides = [1, 1, 1]} : vector<2x8x128xf32> to vector<2x1x128xf32>
    %975 = vector.shape_cast %974 : vector<2x1x128xf32> to vector<2x128xf32>
    %cst_131 = arith.constant dense<0.000000e+00> : vector<2x128xf32>
    %976 = tpu.matmul %973, %870, %cst_131 {dimension_numbers = #tpu.dot_dimension_numbers<[1], [0], [0], [1], [0, 0, 1, 1], [], []>} : vector<2x32xf32>, vector<32x128xf32>, vector<2x128xf32> -> vector<2x128xf32>
    %977 = arith.addf %975, %976 : vector<2x128xf32>
    %978 = arith.negf %977 : vector<2x128xf32>
    %979 = math.exp %978 : vector<2x128xf32>
    %cst_132 = arith.constant 1.000000e+00 : f32
    %980 = vector.broadcast %cst_132 : f32 to vector<2x128xf32>
    %981 = arith.addf %980, %979 : vector<2x128xf32>
    %982 = arith.divf %980, %981 : vector<2x128xf32>
    %983 = vector.extract_strided_slice %982 {offsets = [0, 0], sizes = [2, 32], strides = [1, 1]} : vector<2x128xf32> to vector<2x32xf32>
    %984 = vector.extract_strided_slice %982 {offsets = [0, 32], sizes = [2, 32], strides = [1, 1]} : vector<2x128xf32> to vector<2x32xf32>
    %985 = vector.extract_strided_slice %982 {offsets = [0, 96], sizes = [2, 32], strides = [1, 1]} : vector<2x128xf32> to vector<2x32xf32>
    %986 = vector.extract_strided_slice %977 {offsets = [0, 64], sizes = [2, 32], strides = [1, 1]} : vector<2x128xf32> to vector<2x32xf32>
    %987 = math.tanh %986 : vector<2x32xf32>
    %988 = arith.mulf %984, %971 : vector<2x32xf32>
    %989 = arith.mulf %983, %987 : vector<2x32xf32>
    %990 = arith.addf %988, %989 : vector<2x32xf32>
    %991 = math.tanh %990 : vector<2x32xf32>
    %992 = arith.mulf %985, %991 : vector<2x32xf32>
    %993 = vector.extract_strided_slice %876 {offsets = [0, 6, 0], sizes = [2, 1, 128], strides = [1, 1, 1]} : vector<2x8x128xf32> to vector<2x1x128xf32>
    %994 = vector.shape_cast %993 : vector<2x1x128xf32> to vector<2x128xf32>
    %cst_133 = arith.constant dense<0.000000e+00> : vector<2x128xf32>
    %995 = tpu.matmul %992, %870, %cst_133 {dimension_numbers = #tpu.dot_dimension_numbers<[1], [0], [0], [1], [0, 0, 1, 1], [], []>} : vector<2x32xf32>, vector<32x128xf32>, vector<2x128xf32> -> vector<2x128xf32>
    %996 = arith.addf %994, %995 : vector<2x128xf32>
    %997 = arith.negf %996 : vector<2x128xf32>
    %998 = math.exp %997 : vector<2x128xf32>
    %cst_134 = arith.constant 1.000000e+00 : f32
    %999 = vector.broadcast %cst_134 : f32 to vector<2x128xf32>
    %1000 = arith.addf %999, %998 : vector<2x128xf32>
    %1001 = arith.divf %999, %1000 : vector<2x128xf32>
    %1002 = vector.extract_strided_slice %1001 {offsets = [0, 0], sizes = [2, 32], strides = [1, 1]} : vector<2x128xf32> to vector<2x32xf32>
    %1003 = vector.extract_strided_slice %1001 {offsets = [0, 32], sizes = [2, 32], strides = [1, 1]} : vector<2x128xf32> to vector<2x32xf32>
    %1004 = vector.extract_strided_slice %1001 {offsets = [0, 96], sizes = [2, 32], strides = [1, 1]} : vector<2x128xf32> to vector<2x32xf32>
    %1005 = vector.extract_strided_slice %996 {offsets = [0, 64], sizes = [2, 32], strides = [1, 1]} : vector<2x128xf32> to vector<2x32xf32>
    %1006 = math.tanh %1005 : vector<2x32xf32>
    %1007 = arith.mulf %1003, %990 : vector<2x32xf32>
    %1008 = arith.mulf %1002, %1006 : vector<2x32xf32>
    %1009 = arith.addf %1007, %1008 : vector<2x32xf32>
    %1010 = math.tanh %1009 : vector<2x32xf32>
    %1011 = arith.mulf %1004, %1010 : vector<2x32xf32>
    %1012 = vector.extract_strided_slice %876 {offsets = [0, 7, 0], sizes = [2, 1, 128], strides = [1, 1, 1]} : vector<2x8x128xf32> to vector<2x1x128xf32>
    %1013 = vector.shape_cast %1012 : vector<2x1x128xf32> to vector<2x128xf32>
    %cst_135 = arith.constant dense<0.000000e+00> : vector<2x128xf32>
    %1014 = tpu.matmul %1011, %870, %cst_135 {dimension_numbers = #tpu.dot_dimension_numbers<[1], [0], [0], [1], [0, 0, 1, 1], [], []>} : vector<2x32xf32>, vector<32x128xf32>, vector<2x128xf32> -> vector<2x128xf32>
    %1015 = arith.addf %1013, %1014 : vector<2x128xf32>
    %1016 = arith.negf %1015 : vector<2x128xf32>
    %1017 = math.exp %1016 : vector<2x128xf32>
    %cst_136 = arith.constant 1.000000e+00 : f32
    %1018 = vector.broadcast %cst_136 : f32 to vector<2x128xf32>
    %1019 = arith.addf %1018, %1017 : vector<2x128xf32>
    %1020 = arith.divf %1018, %1019 : vector<2x128xf32>
    %1021 = vector.extract_strided_slice %1020 {offsets = [0, 0], sizes = [2, 32], strides = [1, 1]} : vector<2x128xf32> to vector<2x32xf32>
    %1022 = vector.extract_strided_slice %1020 {offsets = [0, 32], sizes = [2, 32], strides = [1, 1]} : vector<2x128xf32> to vector<2x32xf32>
    %1023 = vector.extract_strided_slice %1020 {offsets = [0, 96], sizes = [2, 32], strides = [1, 1]} : vector<2x128xf32> to vector<2x32xf32>
    %1024 = vector.extract_strided_slice %1015 {offsets = [0, 64], sizes = [2, 32], strides = [1, 1]} : vector<2x128xf32> to vector<2x32xf32>
    %1025 = math.tanh %1024 : vector<2x32xf32>
    %1026 = arith.mulf %1022, %1009 : vector<2x32xf32>
    %1027 = arith.mulf %1021, %1025 : vector<2x32xf32>
    %1028 = arith.addf %1026, %1027 : vector<2x32xf32>
    %1029 = math.tanh %1028 : vector<2x32xf32>
    %1030 = arith.mulf %1023, %1029 : vector<2x32xf32>
    %c264 = arith.constant 264 : index
    %c0_137 = arith.constant 0 : index
    %1031 = vector.load %arg1[%c264, %c0_137] : memref<304x128xf32, #tpu.memory_space<vmem>>, vector<32x128xf32>
    %1032 = vector.extract_strided_slice %1031 {offsets = [0, 0], sizes = [32, 1], strides = [1, 1]} : vector<32x128xf32> to vector<32x1xf32>
    %c296 = arith.constant 296 : index
    %c0_138 = arith.constant 0 : index
    %1033 = vector.load %arg1[%c296, %c0_138] : memref<304x128xf32, #tpu.memory_space<vmem>>, vector<1x128xf32>
    %1034 = vector.extract_strided_slice %1033 {offsets = [0, 0], sizes = [1, 1], strides = [1, 1]} : vector<1x128xf32> to vector<1x1xf32>
    %cst_139 = arith.constant dense<0.000000e+00> : vector<2x1xf32>
    %1035 = tpu.matmul %1030, %1032, %cst_139 {dimension_numbers = #tpu.dot_dimension_numbers<[1], [0], [0], [1], [0, 0, 1, 1], [], []>} : vector<2x32xf32>, vector<32x1xf32>, vector<2x1xf32> -> vector<2x1xf32>
    %1036 = vector.broadcast %1034 : vector<1x1xf32> to vector<2x1xf32>
    %1037 = arith.addf %1035, %1036 : vector<2x1xf32>
    %c0_140 = arith.constant 0 : index
    %c0_141 = arith.constant 0 : index
    %1038 = vector.load %arg2[%c0_140, %c0_141] : memref<2x1xf32, #tpu.memory_space<vmem>>, vector<2x1xf32>
    tpu.vector_store %arg2[%c0_140, %c0_141], %1037 {strides = array<i32>} : memref<2x1xf32, #tpu.memory_space<vmem>>, vector<2x1xf32>,
    return
  }
}

</mosaic_0001>

<bundles_post_ra>
// kernel: aelstm_forward.1
= control target key start
LH: loop header
LB: loop body
LE: loop exit
PB: predicated region body
PF: predicated region fallthrough
CT: control target
= control target key end

     0   :  { %vm111_vm0 = vcmask 1043456   ;;  %v9231_v3 = vmov 0.0|0.0   ;;  %vm9232_vm1 = vmmov 1   ;;  %vm25_vm3 = vcmask 130048   ;;  %s10432_s0 = inlined_call_operand.vmem [shape: f32[2,8,16], index: 0, kind: input, shape index: {}]   ;;  %s10433_s1 = inlined_call_operand.vmem [shape: f32[304,128], index: 1, kind: input, shape index: {}]   ;;  %s10434_s2 = inlined_call_operand.vmem [shape: f32[2,1], index: 2, kind: output, shape index: {0}]   ;;  %s10435_s3 = inlined_call_operand.hbm [shape: f32[2,8,16], index: 3, kind: output, shape index: {1}]  }
   0x1   :  { %v16_v0 = vld [vmem:[%s10433_s1] sm:$0xff]  ;;  %v17_v1 = vld [vmem:[%s10433_s1 + $0x8] sm:$0xff]  ;;  %v18_v2 = vld [vmem:[%s10433_s1 + $0x10] sm:$0xff]  ;;  %8212 = vmatprep.subr.bf16.mxu1 %v9231_v3  ;;  %vm9233_vm4 = vmmov 0   ;;  %v9234_v9 = vmov 0.0  }
   0x2   :  { %v8208_v4 = vpack.c.bf16 %v17_v1, %v16_v0  ;;  %v19_v5 = vld [vmem:[%s10433_s1 + $0x18] sm:$0xf]  ;;  %vm9282_vm2 = vmpackc.low %vm111_vm0, %vm9232_vm1  ;;  %v14_v7 = vld [vmem:[%s10432_s0] sm:$0xff]  ;;  %7782 = vmatprep.mubr.msk.f32.mxu1 %vm9233_vm4, %v9234_v9 }
   0x3   :  { %v9289_v8 = vpack.c.bf16 %v19_v5, %v18_v2  ;;  %7775 = vmatprep.mubr.msk.f32.mxu0 %vm25_vm3, %v14_v7 }
   0x4   :  { %9 = vsyncpa [#allocation3], 0  ;;  %8209 = vmatprep.subr.bf16.mxu0 %v8208_v4  ;;  %v15_v10 = vld [vmem:[%s10432_s0 + $0x8] sm:$0xff]  ;;  %v7398_v11 = vld [vmem:[%s10433_s1 + $0x20] ss:$0 sm:$0xff]  ;;  %s9235_s25 = smov 104  }
   0x5   :  { %8215 = vmatpush3.bf16.msk.msra.mxu1 %vm9282_vm2, %v9289_v8  ;;  %8211 = vmatpush3.bf16.msra.mxu0 %v8208_v4  ;;  %s9236_s26 = smov 12   ;;  %s9237_s27 = smov 24   ;;  %vm242_vm5 = vcmask 1041409   ;;  %vm107_vm6 = vcmask 97280   ;;  %vm1217_vm7 = vcmask 1040384   ;;  %vm1220_vm8 = vcmask 1041408  }
   0x6   :  { %8216 = vmatprep.subr.bf16.mxu0 %v9231_v3  ;;  %8220 = vmatprep.subr.bf16.mxu1 %v9231_v3  ;;  %s9238_s28 = smov 92   ;;  %vm1223_vm9 = vcmask 1042432   ;;  %vm1228_vm10 = vcmask 1044480   ;;  %vm1231_vm11 = vcmask 1045504   ;;  %vm1234_vm12 = vcmask 1046528   ;;  %s9239_s10 = smov 112  }
   0x7   :  { %s9240_s11 = smov 8   ;;  %s9241_s12 = smov 16   ;;  %vm1333_vm13 = vcmask 64512   ;;  %vm4971_vm14 = vcmask 261120   ;;  %vm7376_vm15 = vcmask 1024  }
   0x8   :  { %7783 = vmatmul.mubr.f32.vlgmr.msra.gmra.mrb[0].mxu1 %v9234_v9  ;;  %7776 = vmatmul.mubr.msk.f32.vlgmr.msra.gmra.mrb[0].mxu0 %vm25_vm3, %v15_v10  ;;  %s9243_s4 = smov 32   ;;  %s9244_s5 = smov 80  }
   0x9   :  { %8219 = vmatpush3.bf16.msk.msra.mxu0 %vm9282_vm2, %v9289_v8  ;;  %7789 = vmatprep.mubr.msk.f32.mxu0 %vm9233_vm4, %v9234_v9  ;;  %s9245_s20 = smov 64  }
   0xa   :  { %8223 = vmatpush3.bf16.msk.msra.mxu1 %vm9282_vm2, %v9289_v8  ;;  %7796 = vmatprep.mubr.msk.f32.mxu1 %vm9233_vm4, %v9234_v9 }
   0xb   :  { %8224 = vmatprep.subr.bf16.mxu0 %v9231_v3  ;;  %8228 = vmatprep.subr.bf16.mxu1 %v9231_v3 }
  0xdb   :  { %v181_v12 = vpop.f32.mrb[0].mxu1  ;;  %v7777_v13 = vpop.f32.mrb[0].mxu0 }
  0xdc   :  { %v186_v14 = vrot.slane %v181_v12, 1  ;;  %v9319_v15 = vadd.f32 %v7777_v13, %v7398_v11  ;;  %v7784_v16 = vpop.f32.mrb[1].mxu1  ;;  %v98_v17 = vpop.f32.mrb[1].mxu0 }
  0xdd   :  { %v9321_v18 = vadd.f32 %v7398_v11, %v98_v17 }
  0xde   :  { %v190_v19 = vadd.f32 %v186_v14, %v9319_v15 }
  0xdf   :  { %v189_v20 = vadd.f32 %v181_v12, %v9321_v18 }
  0xe0   :  { %8439 = vtanh.f32 %v190_v19  ;;  %v7403_v23 = vmul.f32 -1.442695, %v190_v19 }
  0xe1   :  { %8441 = vtanh.f32 %v189_v20  ;;  %v7402_v24 = vmul.f32 -1.442695, %v189_v20 }
  0xe2   :  { %8443 = vpow2.f32 %v7403_v23 }
  0xe3   :  { %8445 = vpow2.f32 %v7402_v24 }
  0xea   :  { %v8440_v21 = vpop.eup %8439 }
  0xeb   :  { %211 = vrot.lane.b32.xlu0 %v8440_v21, %s9235_s25  ;;  %v8442_v22 = vpop.eup %8441 }
  0xec   :  { %v8444_v25 = vpop.eup %8443 }
  0xed   :  { %v198_v26 = vadd.f32 1.0, %v8444_v25  ;;  %v8446_v27 = vpop.eup %8445 }
  0xee   :  { %v197_v28 = vadd.f32 1.0, %v8446_v27 }
  0xef   :  { %209 = vrot.lane.b32.xlu0 %v8442_v22, %s9235_s25  ;;  %8447 = vrcp.f32 %v198_v26 }
  0xf0   :  { %8449 = vrcp.f32 %v197_v28 }
  0xf9   :  { %v8448_v29 = vpop.eup %8447 }
  0xfa   :  { %v8450_v32 = vpop.eup %8449  ;;  %v206_v35 = vmul.f32 0.0, %v8448_v29 }
  0xfb   :  { %v205_v38 = vmul.f32 0.0, %v8450_v32 }
 0x15d   :  { %v212_v30 = vpop.permute.xlu0 %211 }
 0x15e   :  { %v216_v31 = vmul.f32 %v8448_v29, %v212_v30 }
 0x160   :  { %221 = vrot.lane.b32.xlu1 %v216_v31, %s9236_s26 }
 0x161   :  { %v210_v33 = vpop.permute.xlu0 %209 }
 0x162   :  { %v215_v34 = vmul.f32 %v8450_v32, %v210_v33 }
 0x164   :  { %219 = vrot.lane.b32.xlu1 %v215_v34, %s9236_s26 }
 0x1d2   :  { %v222_v36 = vpop.permute.xlu1 %221 }
 0x1d3   :  { %v226_v37 = vadd.f32 %v222_v36, %v206_v35 }
 0x1d5   :  { %8451 = vtanh.f32 %v226_v37  ;;  %v341_v7 = vrot.slane %v226_v37, 7 }
 0x1d6   :  { %v220_v39 = vpop.permute.xlu1 %219 }
 0x1d7   :  { %v225_v40 = vadd.f32 %v220_v39, %v205_v38 }
 0x1d9   :  { %8453 = vtanh.f32 %v225_v40  ;;  %v340_v11 = vrot.slane %v225_v40, 7 }
 0x1df   :  { %v8452_v41 = vpop.eup %8451 }
 0x1e0   :  { %233 = vrot.lane.b32.xlu0 %v8452_v41, %s9237_s27 }
 0x1e3   :  { %v8454_v42 = vpop.eup %8453 }
 0x1e4   :  { %231 = vrot.lane.b32.xlu1 %v8454_v42, %s9237_s27 }
 0x252   :  { %v234_v43 = vpop.permute.xlu0 %233 }
 0x253   :  { %v9331_v44 = vmul.f32 %v8448_v29, %v234_v43 }
 0x255   :  { %v241_v46 = vrot.slane %v9331_v44, 7 }
 0x256   :  { %v232_v45 = vpop.permute.xlu1 %231 }
 0x257   :  { %v9334_v47 = vmul.f32 %v8450_v32, %v232_v45 }
 0x259   :  { %v243_v48 = vsel %vm242_vm5, %v241_v46, %v9334_v47 }
 0x25a   :  { %244 = vrot.lane.b32.xlu0 %v243_v48, %s9238_s28 }
 0x2cc   :  { %v245_v49 = vpop.permute.xlu0 %244 }
 0x2cd   :  { %7790 = vmatmul.mubr.msk.f32.vlgmr.msra.gmra.mrb[2].mxu0 %vm107_vm6, %v245_v49 }
 0x2ce   :  { %8227 = vmatpush3.bf16.msk.msra.mxu0 %vm9282_vm2, %v9289_v8  ;;  %7803 = vmatprep.mubr.msk.f32.mxu0 %vm9233_vm4, %v9234_v9 }
 0x2cf   :  { %8232 = vmatprep.subr.bf16.mxu0 %v9231_v3 }
 0x3a0   :  { %v314_v50 = vpop.f32.mrb[2].mxu0 }
 0x3a1   :  { %v319_v51 = vrot.slane %v314_v50, 7  ;;  %v323_v52 = vadd.f32 %v314_v50, %v9319_v15  ;;  %v7791_v53 = vpop.f32.mrb[3].mxu0 }
 0x3a3   :  { %v322_v54 = vadd.f32 %v319_v51, %v9321_v18  ;;  %8455 = vtanh.f32 %v323_v52  ;;  %v7407_v57 = vmul.f32 -1.442695, %v323_v52 }
 0x3a5   :  { %8457 = vtanh.f32 %v322_v54  ;;  %v7406_v58 = vmul.f32 -1.442695, %v322_v54 }
 0x3a6   :  { %8459 = vpow2.f32 %v7407_v57 }
 0x3a7   :  { %8461 = vpow2.f32 %v7406_v58 }
 0x3ad   :  { %v8456_v55 = vpop.eup %8455 }
 0x3ae   :  { %350 = vrot.lane.b32.xlu0 %v8456_v55, %s9235_s25 }
 0x3af   :  { %v8458_v56 = vpop.eup %8457 }
 0x3b0   :  { %348 = vrot.lane.b32.xlu1 %v8458_v56, %s9235_s25  ;;  %v8460_v59 = vpop.eup %8459 }
 0x3b1   :  { %v8462_v60 = vpop.eup %8461  ;;  %v331_v61 = vadd.f32 1.0, %v8460_v59 }
 0x3b2   :  { %v330_v62 = vadd.f32 1.0, %v8462_v60 }
 0x3b3   :  { %8463 = vrcp.f32 %v331_v61 }
 0x3b4   :  { %8465 = vrcp.f32 %v330_v62 }
 0x3bd   :  { %v8464_v63 = vpop.eup %8463 }
 0x3be   :  { %v8466_v2 = vpop.eup %8465  ;;  %v345_v10 = vmul.f32 %v8464_v63, %v341_v7 }
 0x3bf   :  { %v344_v14 = vmul.f32 %v8466_v2, %v340_v11 }
 0x420   :  { %v351_v0 = vpop.permute.xlu0 %350 }
 0x421   :  { %v355_v1 = vmul.f32 %v8464_v63, %v351_v0 }
 0x422   :  { %v349_v4 = vpop.permute.xlu1 %348 }
 0x423   :  { %360 = vrot.lane.b32.xlu0 %v355_v1, %s9236_s26  ;;  %v354_v5 = vmul.f32 %v8466_v2, %v349_v4 }
 0x425   :  { %358 = vrot.lane.b32.xlu1 %v354_v5, %s9236_s26 }
 0x495   :  { %v361_v12 = vpop.permute.xlu0 %360 }
 0x496   :  { %v365_v13 = vadd.f32 %v361_v12, %v345_v10 }
 0x497   :  { %v359_v16 = vpop.permute.xlu1 %358 }
 0x498   :  { %8467 = vtanh.f32 %v365_v13  ;;  %v364_v17 = vadd.f32 %v359_v16, %v344_v14  ;;  %v480_v51 = vrot.slane %v365_v13, 7 }
 0x49a   :  { %8469 = vtanh.f32 %v364_v17  ;;  %v479_v50 = vrot.slane %v364_v17, 7 }
 0x4a2   :  { %v8468_v19 = vpop.eup %8467 }
 0x4a3   :  { %372 = vrot.lane.b32.xlu0 %v8468_v19, %s9237_s27 }
 0x4a4   :  { %v8470_v20 = vpop.eup %8469 }
 0x4a5   :  { %370 = vrot.lane.b32.xlu1 %v8470_v20, %s9237_s27 }
 0x515   :  { %v373_v21 = vpop.permute.xlu0 %372 }
 0x516   :  { %v377_v24 = vmul.f32 %v8464_v63, %v373_v21 }
 0x517   :  { %v371_v22 = vpop.permute.xlu1 %370 }
 0x518   :  { %v376_v23 = vmul.f32 %v8466_v2, %v371_v22  ;;  %v1219_v1 = vsel %vm1217_vm7, %v9331_v44, %v377_v24 }
 0x51a   :  { %v380_v25 = vrot.slane %v376_v23, 1  ;;  %v1218_v63 = vsel %vm1217_vm7, %v9334_v47, %v376_v23 }
 0x51c   :  { %v381_v26 = vsel %vm242_vm5, %v377_v24, %v380_v25 }
 0x51d   :  { %382 = vrot.lane.b32.xlu1 %v381_v26, %s9238_s28 }
 0x58f   :  { %v383_v27 = vpop.permute.xlu1 %382 }
 0x590   :  { %7797 = vmatmul.mubr.msk.f32.vlgmr.msra.gmra.mrb[2].mxu1 %vm107_vm6, %v383_v27 }
 0x591   :  { %8231 = vmatpush3.bf16.msk.msra.mxu1 %vm9282_vm2, %v9289_v8  ;;  %7810 = vmatprep.mubr.msk.f32.mxu1 %vm9233_vm4, %v9234_v9 }
 0x592   :  { %8236 = vmatprep.subr.bf16.mxu1 %v9231_v3 }
 0x663   :  { %v452_v28 = vpop.f32.mrb[2].mxu1 }
 0x664   :  { %v457_v29 = vrot.slane %v452_v28, 6  ;;  %v458_v30 = vrot.slane %v452_v28, 7  ;;  %v7798_v31 = vpop.f32.mrb[3].mxu1 }
 0x666   :  { %v461_v32 = vadd.f32 %v457_v29, %v9321_v18  ;;  %v462_v33 = vadd.f32 %v458_v30, %v9319_v15 }
 0x668   :  { %8471 = vtanh.f32 %v461_v32  ;;  %v7410_v36 = vmul.f32 -1.442695, %v461_v32  ;;  %v7411_v37 = vmul.f32 -1.442695, %v462_v33 }
 0x669   :  { %8473 = vtanh.f32 %v462_v33 }
 0x66a   :  { %8475 = vpow2.f32 %v7410_v36 }
 0x66b   :  { %8477 = vpow2.f32 %v7411_v37 }
 0x672   :  { %v8472_v34 = vpop.eup %8471 }
 0x673   :  { %v8474_v35 = vpop.eup %8473  ;;  %487 = vrot.lane.b32.xlu0 %v8472_v34, %s9235_s25 }
 0x674   :  { %489 = vrot.lane.b32.xlu1 %v8474_v35, %s9235_s25  ;;  %v8476_v38 = vpop.eup %8475 }
 0x675   :  { %v8478_v39 = vpop.eup %8477  ;;  %v469_v40 = vadd.f32 1.0, %v8476_v38 }
 0x676   :  { %v470_v41 = vadd.f32 1.0, %v8478_v39 }
 0x677   :  { %8479 = vrcp.f32 %v469_v40 }
 0x678   :  { %8481 = vrcp.f32 %v470_v41 }
 0x681   :  { %v8480_v42 = vpop.eup %8479 }
 0x682   :  { %v8482_v45 = vpop.eup %8481  ;;  %v483_v52 = vmul.f32 %v8480_v42, %v479_v50 }
 0x683   :  { %v484_v53 = vmul.f32 %v8482_v45, %v480_v51 }
 0x6e5   :  { %v488_v43 = vpop.permute.xlu0 %487 }
 0x6e6   :  { %v490_v46 = vpop.permute.xlu1 %489  ;;  %v493_v48 = vmul.f32 %v8480_v42, %v488_v43 }
 0x6e7   :  { %v494_v49 = vmul.f32 %v8482_v45, %v490_v46 }
 0x6e8   :  { %497 = vrot.lane.b32.xlu0 %v493_v48, %s9236_s26 }
 0x6e9   :  { %499 = vrot.lane.b32.xlu1 %v494_v49, %s9236_s26 }
 0x75a   :  { %v498_v54 = vpop.permute.xlu0 %497 }
 0x75b   :  { %v500_v55 = vpop.permute.xlu1 %499  ;;  %v503_v56 = vadd.f32 %v498_v54, %v483_v52 }
 0x75c   :  { %v504_v57 = vadd.f32 %v500_v55, %v484_v53 }
 0x75d   :  { %8483 = vtanh.f32 %v503_v56  ;;  %v619_v32 = vrot.slane %v503_v56, 7 }
 0x75e   :  { %8485 = vtanh.f32 %v504_v57  ;;  %v620_v33 = vrot.slane %v504_v57, 7 }
 0x767   :  { %v8484_v58 = vpop.eup %8483 }
 0x768   :  { %v8486_v59 = vpop.eup %8485  ;;  %509 = vrot.lane.b32.xlu0 %v8484_v58, %s9237_s27 }
 0x769   :  { %511 = vrot.lane.b32.xlu1 %v8486_v59, %s9237_s27 }
 0x7da   :  { %v510_v60 = vpop.permute.xlu0 %509 }
 0x7db   :  { %v512_v61 = vpop.permute.xlu1 %511  ;;  %v515_v62 = vmul.f32 %v8480_v42, %v510_v60 }
 0x7dc   :  { %v516_v0 = vmul.f32 %v8482_v45, %v512_v61 }
 0x7dd   :  { %v519_v2 = vrot.slane %v515_v62, 2  ;;  %v1221_v4 = vsel %vm1220_vm8, %v1218_v63, %v515_v62 }
 0x7de   :  { %v520_v5 = vrot.slane %v516_v0, 1  ;;  %v1222_v7 = vsel %vm1220_vm8, %v1219_v1, %v516_v0 }
 0x7e0   :  { %v521_v10 = vsel %vm242_vm5, %v520_v5, %v519_v2 }
 0x7e1   :  { %522 = vrot.lane.b32.xlu0 %v521_v10, %s9238_s28 }
 0x853   :  { %v523_v11 = vpop.permute.xlu0 %522 }
 0x854   :  { %7804 = vmatmul.mubr.msk.f32.vlgmr.msra.gmra.mrb[4].mxu0 %vm107_vm6, %v523_v11 }
 0x855   :  { %8235 = vmatpush3.bf16.msk.msra.mxu0 %vm9282_vm2, %v9289_v8  ;;  %7817 = vmatprep.mubr.msk.f32.mxu0 %vm9233_vm4, %v9234_v9 }
 0x856   :  { %8240 = vmatprep.subr.bf16.mxu0 %v9231_v3 }
 0x927   :  { %v592_v44 = vpop.f32.mrb[4].mxu0 }
 0x928   :  { %v597_v47 = vrot.slane %v592_v44, 5  ;;  %v598_v12 = vrot.slane %v592_v44, 6  ;;  %v7805_v13 = vpop.f32.mrb[5].mxu0 }
 0x92a   :  { %v601_v14 = vadd.f32 %v597_v47, %v9321_v18  ;;  %v602_v16 = vadd.f32 %v598_v12, %v9319_v15 }
 0x92c   :  { %8487 = vtanh.f32 %v601_v14  ;;  %v7414_v20 = vmul.f32 -1.442695, %v601_v14  ;;  %v7415_v21 = vmul.f32 -1.442695, %v602_v16 }
 0x92d   :  { %8489 = vtanh.f32 %v602_v16 }
 0x92e   :  { %8491 = vpow2.f32 %v7414_v20 }
 0x92f   :  { %8493 = vpow2.f32 %v7415_v21 }
 0x936   :  { %v8488_v17 = vpop.eup %8487 }
 0x937   :  { %v8490_v19 = vpop.eup %8489  ;;  %627 = vrot.lane.b32.xlu1 %v8488_v17, %s9235_s25 }
 0x938   :  { %629 = vrot.lane.b32.xlu0 %v8490_v19, %s9235_s25  ;;  %v8492_v22 = vpop.eup %8491 }
 0x939   :  { %v8494_v23 = vpop.eup %8493  ;;  %v609_v24 = vadd.f32 1.0, %v8492_v22 }
 0x93a   :  { %v610_v25 = vadd.f32 1.0, %v8494_v23 }
 0x93b   :  { %8495 = vrcp.f32 %v609_v24 }
 0x93c   :  { %8497 = vrcp.f32 %v610_v25 }
 0x945   :  { %v8496_v26 = vpop.eup %8495 }
 0x946   :  { %v8498_v28 = vpop.eup %8497  ;;  %v623_v34 = vmul.f32 %v8496_v26, %v619_v32 }
 0x947   :  { %v624_v35 = vmul.f32 %v8498_v28, %v620_v33 }
 0x9a9   :  { %v628_v27 = vpop.permute.xlu1 %627 }
 0x9aa   :  { %v630_v29 = vpop.permute.xlu0 %629  ;;  %v633_v30 = vmul.f32 %v8496_v26, %v628_v27 }
 0x9ab   :  { %v634_v31 = vmul.f32 %v8498_v28, %v630_v29 }
 0x9ac   :  { %637 = vrot.lane.b32.xlu1 %v633_v30, %s9236_s26 }
 0x9ad   :  { %639 = vrot.lane.b32.xlu0 %v634_v31, %s9236_s26 }
 0xa1e   :  { %v638_v36 = vpop.permute.xlu1 %637 }
 0xa1f   :  { %v640_v37 = vpop.permute.xlu0 %639  ;;  %v643_v38 = vadd.f32 %v638_v36, %v623_v34 }
 0xa20   :  { %v644_v39 = vadd.f32 %v640_v37, %v624_v35 }
 0xa21   :  { %8499 = vtanh.f32 %v643_v38  ;;  %v759_v12 = vrot.slane %v643_v38, 7 }
 0xa22   :  { %8501 = vtanh.f32 %v644_v39  ;;  %v760_v13 = vrot.slane %v644_v39, 7 }
 0xa2b   :  { %v8500_v40 = vpop.eup %8499 }
 0xa2c   :  { %v8502_v41 = vpop.eup %8501  ;;  %649 = vrot.lane.b32.xlu1 %v8500_v40, %s9237_s27 }
 0xa2d   :  { %651 = vrot.lane.b32.xlu0 %v8502_v41, %s9237_s27 }
 0xa9e   :  { %v650_v42 = vpop.permute.xlu1 %649 }
 0xa9f   :  { %v652_v43 = vpop.permute.xlu0 %651  ;;  %v655_v45 = vmul.f32 %v8496_v26, %v650_v42 }
 0xaa0   :  { %v656_v46 = vmul.f32 %v8498_v28, %v652_v43 }
 0xaa1   :  { %v659_v48 = vrot.slane %v655_v45, 3  ;;  %v1224_v49 = vsel %vm1223_vm9, %v1221_v4, %v655_v45 }
 0xaa2   :  { %v660_v50 = vrot.slane %v656_v46, 2  ;;  %v1225_v51 = vsel %vm1223_vm9, %v1222_v7, %v656_v46 }
 0xaa4   :  { %v661_v52 = vsel %vm242_vm5, %v660_v50, %v659_v48 }
 0xaa5   :  { %662 = vrot.lane.b32.xlu1 %v661_v52, %s9238_s28 }
 0xb17   :  { %v663_v53 = vpop.permute.xlu1 %662 }
 0xb18   :  { %7811 = vmatmul.mubr.msk.f32.vlgmr.msra.gmra.mrb[4].mxu1 %vm107_vm6, %v663_v53 }
 0xb19   :  { %8239 = vmatpush3.bf16.msk.msra.mxu1 %vm9282_vm2, %v9289_v8  ;;  %7824 = vmatprep.mubr.msk.f32.mxu1 %vm9233_vm4, %v9234_v9 }
 0xbeb   :  { %v732_v54 = vpop.f32.mrb[4].mxu1 }
 0xbec   :  { %v737_v55 = vrot.slane %v732_v54, 4  ;;  %v738_v56 = vrot.slane %v732_v54, 5  ;;  %v7812_v57 = vpop.f32.mrb[5].mxu1 }
 0xbee   :  { %v741_v58 = vadd.f32 %v737_v55, %v9321_v18  ;;  %v742_v59 = vadd.f32 %v738_v56, %v9319_v15 }
 0xbf0   :  { %8503 = vtanh.f32 %v741_v58  ;;  %v7418_v62 = vmul.f32 -1.442695, %v741_v58  ;;  %v7419_v63 = vmul.f32 -1.442695, %v742_v59 }
 0xbf1   :  { %8505 = vtanh.f32 %v742_v59 }
 0xbf2   :  { %8507 = vpow2.f32 %v7418_v62 }
 0xbf3   :  { %8509 = vpow2.f32 %v7419_v63 }
 0xbfa   :  { %v8504_v60 = vpop.eup %8503 }
 0xbfb   :  { %v8506_v61 = vpop.eup %8505  ;;  %767 = vrot.lane.b32.xlu0 %v8504_v60, %s9235_s25 }
 0xbfc   :  { %769 = vrot.lane.b32.xlu1 %v8506_v61, %s9235_s25  ;;  %v8508_v0 = vpop.eup %8507 }
 0xbfd   :  { %v8510_v1 = vpop.eup %8509  ;;  %v749_v2 = vadd.f32 1.0, %v8508_v0 }
 0xbfe   :  { %v750_v4 = vadd.f32 1.0, %v8510_v1 }
 0xbff   :  { %8511 = vrcp.f32 %v749_v2 }
 0xc00   :  { %8513 = vrcp.f32 %v750_v4 }
 0xc09   :  { %v8512_v5 = vpop.eup %8511 }
 0xc0a   :  { %v8514_v10 = vpop.eup %8513  ;;  %v763_v14 = vmul.f32 %v8512_v5, %v759_v12 }
 0xc0b   :  { %v764_v16 = vmul.f32 %v8514_v10, %v760_v13 }
 0xc6d   :  { %v768_v7 = vpop.permute.xlu0 %767 }
 0xc6e   :  { %v770_v11 = vpop.permute.xlu1 %769  ;;  %v773_v44 = vmul.f32 %v8512_v5, %v768_v7 }
 0xc6f   :  { %v774_v47 = vmul.f32 %v8514_v10, %v770_v11 }
 0xc70   :  { %777 = vrot.lane.b32.xlu0 %v773_v44, %s9236_s26 }
 0xc71   :  { %779 = vrot.lane.b32.xlu1 %v774_v47, %s9236_s26 }
 0xce2   :  { %v778_v17 = vpop.permute.xlu0 %777 }
 0xce3   :  { %v780_v19 = vpop.permute.xlu1 %779  ;;  %v783_v20 = vadd.f32 %v778_v17, %v763_v14 }
 0xce4   :  { %v784_v21 = vadd.f32 %v780_v19, %v764_v16 }
 0xce5   :  { %8515 = vtanh.f32 %v783_v20  ;;  %v899_v55 = vrot.slane %v783_v20, 7 }
 0xce6   :  { %8517 = vtanh.f32 %v784_v21  ;;  %v900_v56 = vrot.slane %v784_v21, 7 }
 0xcef   :  { %v8516_v22 = vpop.eup %8515 }
 0xcf0   :  { %v8518_v23 = vpop.eup %8517  ;;  %789 = vrot.lane.b32.xlu0 %v8516_v22, %s9237_s27 }
 0xcf1   :  { %791 = vrot.lane.b32.xlu1 %v8518_v23, %s9237_s27 }
 0xd62   :  { %v790_v24 = vpop.permute.xlu0 %789 }
 0xd63   :  { %v792_v25 = vpop.permute.xlu1 %791  ;;  %v795_v26 = vmul.f32 %v8512_v5, %v790_v24 }
 0xd64   :  { %v796_v27 = vmul.f32 %v8514_v10, %v792_v25 }
 0xd65   :  { %v799_v28 = vrot.slane %v795_v26, 4  ;;  %v1226_v29 = vsel %vm111_vm0, %v1224_v49, %v795_v26 }
 0xd66   :  { %v800_v30 = vrot.slane %v796_v27, 3  ;;  %v1227_v31 = vsel %vm111_vm0, %v1225_v51, %v796_v27 }
 0xd68   :  { %v801_v32 = vsel %vm242_vm5, %v800_v30, %v799_v28 }
 0xd69   :  { %802 = vrot.lane.b32.xlu0 %v801_v32, %s9238_s28 }
 0xddb   :  { %v803_v33 = vpop.permute.xlu0 %802 }
 0xddc   :  { %7818 = vmatmul.mubr.msk.f32.vlgmr.msra.gmra.mrb[6].mxu0 %vm107_vm6, %v803_v33 }
 0xddd   :  { %8243 = vmatpush3.bf16.msk.msra.mxu0 %vm9282_vm2, %v9289_v8  ;;  %7831 = vmatprep.mubr.msk.f32.mxu0 %vm9233_vm4, %v9234_v9 }
 0xdde   :  { %7841 = vmatprep.subr.mxu0 %v9234_v9 }
 0xeaf   :  { %v872_v34 = vpop.f32.mrb[6].mxu0 }
 0xeb0   :  { %v877_v35 = vrot.slane %v872_v34, 3  ;;  %v878_v36 = vrot.slane %v872_v34, 4  ;;  %v7819_v37 = vpop.f32.mrb[7].mxu0 }
 0xeb2   :  { %v881_v38 = vadd.f32 %v877_v35, %v9321_v18  ;;  %v882_v39 = vadd.f32 %v878_v36, %v9319_v15 }
 0xeb4   :  { %8519 = vtanh.f32 %v881_v38  ;;  %v7422_v8 = vmul.f32 -1.442695, %v881_v38  ;;  %v7423_v42 = vmul.f32 -1.442695, %v882_v39 }
 0xeb5   :  { %8521 = vtanh.f32 %v882_v39 }
 0xeb6   :  { %8523 = vpow2.f32 %v7422_v8 }
 0xeb7   :  { %8525 = vpow2.f32 %v7423_v42 }
 0xebe   :  { %v8520_v40 = vpop.eup %8519 }
 0xebf   :  { %v8522_v41 = vpop.eup %8521  ;;  %907 = vrot.lane.b32.xlu1 %v8520_v40, %s9235_s25 }
 0xec0   :  { %909 = vrot.lane.b32.xlu0 %v8522_v41, %s9235_s25  ;;  %v8524_v43 = vpop.eup %8523 }
 0xec1   :  { %v8526_v45 = vpop.eup %8525  ;;  %v889_v46 = vadd.f32 1.0, %v8524_v43 }
 0xec2   :  { %v890_v48 = vadd.f32 1.0, %v8526_v45 }
 0xec3   :  { %8527 = vrcp.f32 %v889_v46 }
 0xec4   :  { %8529 = vrcp.f32 %v890_v48 }
 0xecd   :  { %v8528_v49 = vpop.eup %8527 }
 0xece   :  { %v8530_v51 = vpop.eup %8529  ;;  %v903_v57 = vmul.f32 %v8528_v49, %v899_v55 }
 0xecf   :  { %v904_v58 = vmul.f32 %v8530_v51, %v900_v56 }
 0xf31   :  { %v908_v50 = vpop.permute.xlu1 %907 }
 0xf32   :  { %v910_v52 = vpop.permute.xlu0 %909  ;;  %v913_v53 = vmul.f32 %v8528_v49, %v908_v50 }
 0xf33   :  { %v914_v54 = vmul.f32 %v8530_v51, %v910_v52 }
 0xf34   :  { %917 = vrot.lane.b32.xlu1 %v913_v53, %s9236_s26 }
 0xf35   :  { %919 = vrot.lane.b32.xlu0 %v914_v54, %s9236_s26 }
 0xfa6   :  { %v918_v59 = vpop.permute.xlu1 %917 }
 0xfa7   :  { %v920_v60 = vpop.permute.xlu0 %919  ;;  %v923_v61 = vadd.f32 %v918_v59, %v903_v57 }
 0xfa8   :  { %v924_v62 = vadd.f32 %v920_v60, %v904_v58 }
 0xfa9   :  { %8531 = vtanh.f32 %v923_v61  ;;  %v1039_v35 = vrot.slane %v923_v61, 7 }
 0xfaa   :  { %8533 = vtanh.f32 %v924_v62  ;;  %v1040_v36 = vrot.slane %v924_v62, 7 }
 0xfb3   :  { %v8532_v63 = vpop.eup %8531 }
 0xfb4   :  { %v8534_v0 = vpop.eup %8533  ;;  %929 = vrot.lane.b32.xlu1 %v8532_v63, %s9237_s27 }
 0xfb5   :  { %931 = vrot.lane.b32.xlu0 %v8534_v0, %s9237_s27 }
0x1026   :  { %v930_v1 = vpop.permute.xlu1 %929 }
0x1027   :  { %v932_v2 = vpop.permute.xlu0 %931  ;;  %v935_v4 = vmul.f32 %v8528_v49, %v930_v1 }
0x1028   :  { %v936_v5 = vmul.f32 %v8530_v51, %v932_v2 }
0x1029   :  { %v939_v7 = vrot.slane %v935_v4, 5  ;;  %v1229_v10 = vsel %vm1228_vm10, %v1226_v29, %v935_v4 }
0x102a   :  { %v940_v11 = vrot.slane %v936_v5, 4  ;;  %v1230_v44 = vsel %vm1228_vm10, %v1227_v31, %v936_v5 }
0x102c   :  { %v941_v47 = vsel %vm242_vm5, %v940_v11, %v939_v7 }
0x102d   :  { %942 = vrot.lane.b32.xlu1 %v941_v47, %s9238_s28 }
0x109f   :  { %v943_v12 = vpop.permute.xlu1 %942 }
0x10a0   :  { %7825 = vmatmul.mubr.msk.f32.vlgmr.msra.gmra.mrb[6].mxu1 %vm107_vm6, %v943_v12 }
0x1173   :  { %v1012_v13 = vpop.f32.mrb[6].mxu1 }
0x1174   :  { %v1017_v14 = vrot.slane %v1012_v13, 2  ;;  %v1018_v16 = vrot.slane %v1012_v13, 3  ;;  %v7826_v17 = vpop.f32.mrb[7].mxu1 }
0x1176   :  { %v1021_v19 = vadd.f32 %v1017_v14, %v9321_v18  ;;  %v1022_v20 = vadd.f32 %v1018_v16, %v9319_v15 }
0x1178   :  { %8535 = vtanh.f32 %v1021_v19  ;;  %v7426_v23 = vmul.f32 -1.442695, %v1021_v19  ;;  %v7427_v24 = vmul.f32 -1.442695, %v1022_v20 }
0x1179   :  { %8537 = vtanh.f32 %v1022_v20 }
0x117a   :  { %8539 = vpow2.f32 %v7426_v23  ;;  %v1238_v23 = vld [vmem:[%s10433_s1 + $0x30] sm:$0xf] }
0x117b   :  { %8541 = vpow2.f32 %v7427_v24  ;;  %v9470_v24 = vld [vmem:[%s10433_s1 + $0x38] sm:$0xff] }
0x1182   :  { %v8536_v21 = vpop.eup %8535 }
0x1183   :  { %v8538_v22 = vpop.eup %8537  ;;  %1047 = vrot.lane.b32.xlu0 %v8536_v21, %s9235_s25 }
0x1184   :  { %1049 = vrot.lane.b32.xlu1 %v8538_v22, %s9235_s25  ;;  %v8540_v25 = vpop.eup %8539  ;;  %v1237_v22 = vld [vmem:[%s10433_s1 + $0x28] sm:$0xff] }
0x1185   :  { %v8542_v26 = vpop.eup %8541  ;;  %v1029_v27 = vadd.f32 1.0, %v8540_v25  ;;  %v8244_v25 = vpack.c.bf16 %v1238_v23, %v1237_v22 }
0x1186   :  { %v1030_v28 = vadd.f32 1.0, %v8542_v26 }
0x1187   :  { %8543 = vrcp.f32 %v1029_v27  ;;  %8246 = vmatprep.subr.msk.bf16.mxu1 %vm9282_vm2, %v8244_v25 }
0x1188   :  { %8545 = vrcp.f32 %v1030_v28  ;;  %8249 = vmatpush3.bf16.msk.msra.mxu1 %vm9282_vm2, %v8244_v25 }
0x1189   :  { %7846 = vmatprep.subr.mxu1 %v9234_v9 }
0x1191   :  { %v8544_v29 = vpop.eup %8543 }
0x1192   :  { %v8546_v31 = vpop.eup %8545  ;;  %v1043_v37 = vmul.f32 %v8544_v29, %v1039_v35 }
0x1193   :  { %v1044_v38 = vmul.f32 %v8546_v31, %v1040_v36 }
0x11f5   :  { %v1048_v30 = vpop.permute.xlu0 %1047 }
0x11f6   :  { %v1050_v32 = vpop.permute.xlu1 %1049  ;;  %v1053_v33 = vmul.f32 %v8544_v29, %v1048_v30 }
0x11f7   :  { %v1054_v34 = vmul.f32 %v8546_v31, %v1050_v32 }
0x11f8   :  { %1057 = vrot.lane.b32.xlu0 %v1053_v33, %s9236_s26 }
0x11f9   :  { %1059 = vrot.lane.b32.xlu1 %v1054_v34, %s9236_s26 }
0x126a   :  { %v1058_v39 = vpop.permute.xlu0 %1057 }
0x126b   :  { %v1060_v40 = vpop.permute.xlu1 %1059  ;;  %v1063_v41 = vadd.f32 %v1058_v39, %v1043_v37 }
0x126c   :  { %v1064_v8 = vadd.f32 %v1060_v40, %v1044_v38  ;;  %v7432_v38 = vld [vmem:[%s10433_s1 + $0x40] ss:$0 sm:$0xff] }
0x126d   :  { %8547 = vtanh.f32 %v1063_v41  ;;  %v1179_v12 = vrot.slane %v1063_v41, 7 }
0x126e   :  { %8549 = vtanh.f32 %v1064_v8  ;;  %v1180_v13 = vrot.slane %v1064_v8, 7 }
0x1277   :  { %v8548_v42 = vpop.eup %8547 }
0x1278   :  { %v8550_v43 = vpop.eup %8549  ;;  %1069 = vrot.lane.b32.xlu0 %v8548_v42, %s9237_s27 }
0x1279   :  { %1071 = vrot.lane.b32.xlu1 %v8550_v43, %s9237_s27 }
0x12ea   :  { %v1070_v45 = vpop.permute.xlu0 %1069 }
0x12eb   :  { %v1072_v46 = vpop.permute.xlu1 %1071  ;;  %v1075_v48 = vmul.f32 %v8544_v29, %v1070_v45 }
0x12ec   :  { %v1076_v49 = vmul.f32 %v8546_v31, %v1072_v46 }
0x12ed   :  { %v1079_v50 = vrot.slane %v1075_v48, 6  ;;  %v9445_v51 = vsel %vm1231_vm11, %v1229_v10, %v1075_v48 }
0x12ee   :  { %v1080_v52 = vrot.slane %v1076_v49, 5  ;;  %v9448_v53 = vsel %vm1231_vm11, %v1230_v44, %v1076_v49 }
0x12f0   :  { %v1081_v54 = vsel %vm242_vm5, %v1080_v52, %v1079_v50 }
0x12f1   :  { %1082 = vrot.lane.b32.xlu0 %v1081_v54, %s9238_s28 }
0x1363   :  { %v1083_v55 = vpop.permute.xlu0 %1082 }
0x1364   :  { %7832 = vmatmul.mubr.msk.f32.vlgmr.msra.gmra.mrb[8].mxu0 %vm107_vm6, %v1083_v55 }
0x1365   :  { %7843 = vmatprep.mubr.msk.f32.mxu0 %vm9233_vm4, %v9234_v9  ;;  %7842 = vmatpush3.msra.mxu0 %v9470_v24 }
0x1366   :  { %7851 = vmatprep.subr.mxu0 %v9234_v9 }
0x1368   :  { %7844 = vmatmul.mubr.f32.vlgmr.msra.gmra.mrb[10].mxu0 %v9234_v9 }
0x1369   :  { %7852 = vmatpush3.msra.mxu0 %v9470_v24  ;;  %7853 = vmatprep.mubr.msk.f32.mxu0 %vm9233_vm4, %v9234_v9 }
0x136a   :  { %7861 = vmatprep.subr.mxu0 %v9234_v9 }
0x1437   :  { %v1152_v56 = vpop.f32.mrb[8].mxu0 }
0x1438   :  { %v1157_v57 = vrot.slane %v1152_v56, 1  ;;  %v1158_v58 = vrot.slane %v1152_v56, 2  ;;  %v7833_v59 = vpop.f32.mrb[9].mxu0 }
0x143a   :  { %v1161_v60 = vadd.f32 %v1157_v57, %v9321_v18  ;;  %v1162_v61 = vadd.f32 %v1158_v58, %v9319_v15 }
0x143b   :  { %v1402_v34 = vpop.f32.mrb[10].mxu0 }
0x143c   :  { %8551 = vtanh.f32 %v1161_v60  ;;  %v7430_v0 = vmul.f32 -1.442695, %v1161_v60  ;;  %v7431_v1 = vmul.f32 -1.442695, %v1162_v61  ;;  %v7845_v35 = vpop.f32.mrb[11].mxu0  ;;  %v1407_v39 = vrot.slane %v1402_v34, 1 }
0x143d   :  { %8553 = vtanh.f32 %v1162_v61 }
0x143e   :  { %8555 = vpow2.f32 %v7430_v0 }
0x143f   :  { %8557 = vpow2.f32 %v7431_v1 }
0x1446   :  { %v8552_v62 = vpop.eup %8551 }
0x1447   :  { %v8554_v63 = vpop.eup %8553  ;;  %1187 = vrot.lane.b32.xlu1 %v8552_v62, %s9235_s25 }
0x1448   :  { %1189 = vrot.lane.b32.xlu0 %v8554_v63, %s9235_s25  ;;  %v8556_v2 = vpop.eup %8555 }
0x1449   :  { %v8558_v4 = vpop.eup %8557  ;;  %v1169_v5 = vadd.f32 1.0, %v8556_v2 }
0x144a   :  { %v1170_v7 = vadd.f32 1.0, %v8558_v4 }
0x144b   :  { %8559 = vrcp.f32 %v1169_v5 }
0x144c   :  { %8561 = vrcp.f32 %v1170_v7 }
0x1455   :  { %v8560_v18 = vpop.eup %8559 }
0x1456   :  { %v8562_v10 = vpop.eup %8561  ;;  %v1183_v14 = vmul.f32 %v8560_v18, %v1179_v12 }
0x1457   :  { %v1184_v16 = vmul.f32 %v8562_v10, %v1180_v13 }
0x14b9   :  { %v1188_v15 = vpop.permute.xlu1 %1187 }
0x14ba   :  { %v1190_v11 = vpop.permute.xlu0 %1189  ;;  %v1193_v44 = vmul.f32 %v8560_v18, %v1188_v15 }
0x14bb   :  { %v1194_v47 = vmul.f32 %v8562_v10, %v1190_v11 }
0x14bc   :  { %1197 = vrot.lane.b32.xlu1 %v1193_v44, %s9236_s26 }
0x14bd   :  { %1199 = vrot.lane.b32.xlu0 %v1194_v47, %s9236_s26 }
0x152e   :  { %v1198_v17 = vpop.permute.xlu1 %1197 }
0x152f   :  { %v1200_v19 = vpop.permute.xlu0 %1199  ;;  %v1203_v20 = vadd.f32 %v1198_v17, %v1183_v14 }
0x1530   :  { %v1204_v21 = vadd.f32 %v1200_v19, %v1184_v16 }
0x1531   :  { %8563 = vtanh.f32 %v1203_v20 }
0x1532   :  { %8565 = vtanh.f32 %v1204_v21 }
0x153b   :  { %v8564_v26 = vpop.eup %8563 }
0x153c   :  { %v8566_v27 = vpop.eup %8565  ;;  %1209 = vrot.lane.b32.xlu1 %v8564_v26, %s9237_s27 }
0x153d   :  { %1211 = vrot.lane.b32.xlu0 %v8566_v27, %s9237_s27 }
0x15ae   :  { %v1210_v28 = vpop.permute.xlu1 %1209 }
0x15af   :  { %v1212_v29 = vpop.permute.xlu0 %1211  ;;  %v1215_v30 = vmul.f32 %v8560_v18, %v1210_v28 }
0x15b0   :  { %v1216_v31 = vmul.f32 %v8562_v10, %v1212_v29 }
0x15b1   :  { %v1235_v32 = vsel %vm1234_vm12, %v9445_v51, %v1215_v30 }
0x15b2   :  { %v1236_v33 = vsel %vm1234_vm12, %v9448_v53, %v1216_v31  ;;  %1247 = vrot.lane.b32.xlu1 %v1235_v32, %s9238_s28 }
0x15b3   :  { %1249 = vrot.lane.b32.xlu0 %v1236_v33, %s9238_s28 }
0x1624   :  { %v1248_v36 = vpop.permute.xlu1 %1247 }
0x1625   :  { %v1250_v37 = vpop.permute.xlu0 %1249  ;;  %7838 = vmatprep.mubr.msk.f32.mxu1 %vm107_vm6, %v1248_v36 }
0x1626   :  { %7839 = vmatmul.mubr.msk.f32.vlgmr.msra.gmra.mrb[8].mxu1 %vm107_vm6, %v1250_v37 }
0x1627   :  { %7847 = vmatpush3.msra.mxu1 %v9470_v24  ;;  %7848 = vmatprep.mubr.msk.f32.mxu1 %vm9233_vm4, %v9234_v9 }
0x1628   :  { %7856 = vmatprep.subr.mxu1 %v9234_v9 }
0x16f9   :  { %v7840_v40 = vpop.f32.mrb[8].mxu1 }
0x16fa   :  { %v9501_v41 = vadd.f32 %v7840_v40, %v7432_v38  ;;  %v1324_v8 = vpop.f32.mrb[9].mxu1 }
0x16fb   :  { %v9503_v42 = vadd.f32 %v7432_v38, %v1324_v8 }
0x16fc   :  { %v1411_v43 = vadd.f32 %v1407_v39, %v9501_v41 }
0x16fd   :  { %v1410_v45 = vadd.f32 %v1402_v34, %v9503_v42 }
0x16fe   :  { %8567 = vtanh.f32 %v1411_v43  ;;  %v7437_v49 = vmul.f32 -1.442695, %v1411_v43 }
0x16ff   :  { %8569 = vtanh.f32 %v1410_v45  ;;  %v7436_v50 = vmul.f32 -1.442695, %v1410_v45 }
0x1700   :  { %8571 = vpow2.f32 %v7437_v49 }
0x1701   :  { %8573 = vpow2.f32 %v7436_v50 }
0x1708   :  { %v8568_v46 = vpop.eup %8567 }
0x1709   :  { %v8570_v48 = vpop.eup %8569  ;;  %1432 = vrot.lane.b32.xlu1 %v8568_v46, %s9239_s10 }
0x170a   :  { %1430 = vrot.lane.b32.xlu0 %v8570_v48, %s9239_s10  ;;  %v8572_v51 = vpop.eup %8571 }
0x170b   :  { %v8574_v52 = vpop.eup %8573  ;;  %v1419_v53 = vadd.f32 1.0, %v8572_v51 }
0x170c   :  { %v1418_v54 = vadd.f32 1.0, %v8574_v52 }
0x170d   :  { %8575 = vrcp.f32 %v1419_v53 }
0x170e   :  { %8577 = vrcp.f32 %v1418_v54 }
0x1717   :  { %v8576_v55 = vpop.eup %8575 }
0x1718   :  { %v8578_v57 = vpop.eup %8577  ;;  %v1427_v61 = vmul.f32 0.0, %v8576_v55 }
0x1719   :  { %v1426_v63 = vmul.f32 0.0, %v8578_v57 }
0x177b   :  { %v1433_v56 = vpop.permute.xlu1 %1432 }
0x177c   :  { %v1437_v58 = vmul.f32 %v8576_v55, %v1433_v56  ;;  %v1431_v59 = vpop.permute.xlu0 %1430 }
0x177d   :  { %v1436_v60 = vmul.f32 %v8578_v57, %v1431_v59 }
0x177e   :  { %1442 = vrot.lane.b32.xlu1 %v1437_v58, %s9240_s11 }
0x177f   :  { %1440 = vrot.lane.b32.xlu0 %v1436_v60, %s9240_s11 }
0x17f0   :  { %v1443_v62 = vpop.permute.xlu1 %1442 }
0x17f1   :  { %v1447_v0 = vadd.f32 %v1443_v62, %v1427_v61  ;;  %v1441_v1 = vpop.permute.xlu0 %1440 }
0x17f2   :  { %v1446_v2 = vadd.f32 %v1441_v1, %v1426_v63 }
0x17f3   :  { %8579 = vtanh.f32 %v1447_v0  ;;  %v1561_v34 = vrot.slane %v1447_v0, 7 }
0x17f4   :  { %8581 = vtanh.f32 %v1446_v2  ;;  %v1560_v36 = vrot.slane %v1446_v2, 7 }
0x17fd   :  { %v8580_v4 = vpop.eup %8579 }
0x17fe   :  { %v8582_v5 = vpop.eup %8581  ;;  %1454 = vrot.lane.b32.xlu1 %v8580_v4, %s9241_s12 }
0x17ff   :  { %1452 = vrot.lane.b32.xlu0 %v8582_v5, %s9241_s12 }
0x1870   :  { %v1455_v7 = vpop.permute.xlu1 %1454 }
0x1871   :  { %v9513_v18 = vmul.f32 %v8576_v55, %v1455_v7  ;;  %v1453_v15 = vpop.permute.xlu0 %1452 }
0x1872   :  { %v9515_v10 = vmul.f32 %v8578_v57, %v1453_v15 }
0x1873   :  { %v1462_v11 = vrot.slane %v9513_v18, 7 }
0x1875   :  { %v1463_v44 = vsel %vm242_vm5, %v1462_v11, %v9515_v10 }
0x1876   :  { %1464 = vrot.lane.b32.xlu1 %v1463_v44, %s9235_s25 }
0x18e8   :  { %v1465_v47 = vpop.permute.xlu1 %1464 }
0x18e9   :  { %7849 = vmatmul.mubr.msk.f32.vlgmr.msra.gmra.mrb[10].mxu1 %vm1333_vm13, %v1465_v47 }
0x18ea   :  { %7857 = vmatpush3.msra.mxu1 %v9470_v24  ;;  %7858 = vmatprep.mubr.msk.f32.mxu1 %vm9233_vm4, %v9234_v9 }
0x18eb   :  { %7866 = vmatprep.subr.mxu1 %v9234_v9 }
0x19bc   :  { %v1534_v12 = vpop.f32.mrb[10].mxu1 }
0x19bd   :  { %v1539_v13 = vrot.slane %v1534_v12, 7  ;;  %v1543_v14 = vadd.f32 %v1534_v12, %v9501_v41  ;;  %v7850_v16 = vpop.f32.mrb[11].mxu1 }
0x19bf   :  { %v1542_v17 = vadd.f32 %v1539_v13, %v9503_v42  ;;  %8583 = vtanh.f32 %v1543_v14  ;;  %v7440_v21 = vmul.f32 -1.442695, %v1543_v14 }
0x19c1   :  { %8585 = vtanh.f32 %v1542_v17  ;;  %v7439_v22 = vmul.f32 -1.442695, %v1542_v17 }
0x19c2   :  { %8587 = vpow2.f32 %v7440_v21 }
0x19c3   :  { %8589 = vpow2.f32 %v7439_v22 }
0x19c9   :  { %v8584_v19 = vpop.eup %8583 }
0x19ca   :  { %1570 = vrot.lane.b32.xlu1 %v8584_v19, %s9239_s10 }
0x19cb   :  { %v8586_v20 = vpop.eup %8585 }
0x19cc   :  { %1568 = vrot.lane.b32.xlu0 %v8586_v20, %s9239_s10  ;;  %v8588_v23 = vpop.eup %8587 }
0x19cd   :  { %v8590_v25 = vpop.eup %8589  ;;  %v1551_v26 = vadd.f32 1.0, %v8588_v23 }
0x19ce   :  { %v1550_v27 = vadd.f32 1.0, %v8590_v25 }
0x19cf   :  { %8591 = vrcp.f32 %v1551_v26 }
0x19d0   :  { %8593 = vrcp.f32 %v1550_v27 }
0x19d9   :  { %v8592_v28 = vpop.eup %8591 }
0x19da   :  { %v8594_v31 = vpop.eup %8593  ;;  %v1565_v35 = vmul.f32 %v8592_v28, %v1561_v34 }
0x19db   :  { %v1564_v39 = vmul.f32 %v8594_v31, %v1560_v36 }
0x1a3c   :  { %v1571_v29 = vpop.permute.xlu1 %1570 }
0x1a3d   :  { %v1575_v30 = vmul.f32 %v8592_v28, %v1571_v29 }
0x1a3e   :  { %v1569_v32 = vpop.permute.xlu0 %1568 }
0x1a3f   :  { %1580 = vrot.lane.b32.xlu1 %v1575_v30, %s9240_s11  ;;  %v1574_v33 = vmul.f32 %v8594_v31, %v1569_v32 }
0x1a41   :  { %1578 = vrot.lane.b32.xlu0 %v1574_v33, %s9240_s11 }
0x1ab1   :  { %v1581_v37 = vpop.permute.xlu1 %1580 }
0x1ab2   :  { %v1585_v38 = vadd.f32 %v1581_v37, %v1565_v35 }
0x1ab3   :  { %v1579_v40 = vpop.permute.xlu0 %1578 }
0x1ab4   :  { %8595 = vtanh.f32 %v1585_v38  ;;  %v1584_v8 = vadd.f32 %v1579_v40, %v1564_v39  ;;  %v1700_v13 = vrot.slane %v1585_v38, 7 }
0x1ab6   :  { %8597 = vtanh.f32 %v1584_v8  ;;  %v1699_v12 = vrot.slane %v1584_v8, 7 }
0x1abe   :  { %v8596_v43 = vpop.eup %8595 }
0x1abf   :  { %1592 = vrot.lane.b32.xlu1 %v8596_v43, %s9241_s12 }
0x1ac0   :  { %v8598_v45 = vpop.eup %8597 }
0x1ac1   :  { %1590 = vrot.lane.b32.xlu0 %v8598_v45, %s9241_s12 }
0x1b31   :  { %v1593_v46 = vpop.permute.xlu1 %1592 }
0x1b32   :  { %v1597_v50 = vmul.f32 %v8592_v28, %v1593_v46 }
0x1b33   :  { %v1591_v48 = vpop.permute.xlu0 %1590 }
0x1b34   :  { %v1596_v49 = vmul.f32 %v8594_v31, %v1591_v48  ;;  %v2438_v30 = vsel %vm1217_vm7, %v9513_v18, %v1597_v50 }
0x1b36   :  { %v1600_v51 = vrot.slane %v1596_v49, 1  ;;  %v2437_v28 = vsel %vm1217_vm7, %v9515_v10, %v1596_v49 }
0x1b38   :  { %v1601_v52 = vsel %vm242_vm5, %v1597_v50, %v1600_v51 }
0x1b39   :  { %1602 = vrot.lane.b32.xlu0 %v1601_v52, %s9235_s25 }
0x1bab   :  { %v1603_v53 = vpop.permute.xlu0 %1602 }
0x1bac   :  { %7854 = vmatmul.mubr.msk.f32.vlgmr.msra.gmra.mrb[12].mxu0 %vm1333_vm13, %v1603_v53 }
0x1bad   :  { %7862 = vmatpush3.msra.mxu0 %v9470_v24  ;;  %7863 = vmatprep.mubr.msk.f32.mxu0 %vm9233_vm4, %v9234_v9 }
0x1bae   :  { %7871 = vmatprep.subr.mxu0 %v9234_v9 }
0x1c7f   :  { %v1672_v54 = vpop.f32.mrb[12].mxu0 }
0x1c80   :  { %v1677_v55 = vrot.slane %v1672_v54, 6  ;;  %v1678_v56 = vrot.slane %v1672_v54, 7  ;;  %v7855_v57 = vpop.f32.mrb[13].mxu0 }
0x1c82   :  { %v1681_v58 = vadd.f32 %v1677_v55, %v9503_v42  ;;  %v1682_v59 = vadd.f32 %v1678_v56, %v9501_v41 }
0x1c84   :  { %8599 = vtanh.f32 %v1681_v58  ;;  %v7442_v62 = vmul.f32 -1.442695, %v1681_v58  ;;  %v7443_v63 = vmul.f32 -1.442695, %v1682_v59 }
0x1c85   :  { %8601 = vtanh.f32 %v1682_v59 }
0x1c86   :  { %8603 = vpow2.f32 %v7442_v62 }
0x1c87   :  { %8605 = vpow2.f32 %v7443_v63 }
0x1c8e   :  { %v8600_v60 = vpop.eup %8599 }
0x1c8f   :  { %v8602_v61 = vpop.eup %8601  ;;  %1707 = vrot.lane.b32.xlu1 %v8600_v60, %s9239_s10 }
0x1c90   :  { %1709 = vrot.lane.b32.xlu0 %v8602_v61, %s9239_s10  ;;  %v8604_v0 = vpop.eup %8603 }
0x1c91   :  { %v8606_v1 = vpop.eup %8605  ;;  %v1689_v2 = vadd.f32 1.0, %v8604_v0 }
0x1c92   :  { %v1690_v4 = vadd.f32 1.0, %v8606_v1 }
0x1c93   :  { %8607 = vrcp.f32 %v1689_v2 }
0x1c94   :  { %8609 = vrcp.f32 %v1690_v4 }
0x1c9d   :  { %v8608_v5 = vpop.eup %8607 }
0x1c9e   :  { %v8610_v15 = vpop.eup %8609  ;;  %v1703_v14 = vmul.f32 %v8608_v5, %v1699_v12 }
0x1c9f   :  { %v1704_v16 = vmul.f32 %v8610_v15, %v1700_v13 }
0x1d01   :  { %v1708_v7 = vpop.permute.xlu1 %1707 }
0x1d02   :  { %v1710_v11 = vpop.permute.xlu0 %1709  ;;  %v1713_v44 = vmul.f32 %v8608_v5, %v1708_v7 }
0x1d03   :  { %v1714_v47 = vmul.f32 %v8610_v15, %v1710_v11 }
0x1d04   :  { %1717 = vrot.lane.b32.xlu1 %v1713_v44, %s9240_s11 }
0x1d05   :  { %1719 = vrot.lane.b32.xlu0 %v1714_v47, %s9240_s11 }
0x1d76   :  { %v1718_v17 = vpop.permute.xlu1 %1717 }
0x1d77   :  { %v1720_v19 = vpop.permute.xlu0 %1719  ;;  %v1723_v20 = vadd.f32 %v1718_v17, %v1703_v14 }
0x1d78   :  { %v1724_v21 = vadd.f32 %v1720_v19, %v1704_v16 }
0x1d79   :  { %8611 = vtanh.f32 %v1723_v20  ;;  %v1839_v58 = vrot.slane %v1723_v20, 7 }
0x1d7a   :  { %8613 = vtanh.f32 %v1724_v21  ;;  %v1840_v59 = vrot.slane %v1724_v21, 7 }
0x1d83   :  { %v8612_v22 = vpop.eup %8611 }
0x1d84   :  { %v8614_v23 = vpop.eup %8613  ;;  %1729 = vrot.lane.b32.xlu1 %v8612_v22, %s9241_s12 }
0x1d85   :  { %1731 = vrot.lane.b32.xlu0 %v8614_v23, %s9241_s12 }
0x1df6   :  { %v1730_v25 = vpop.permute.xlu1 %1729 }
0x1df7   :  { %v1732_v26 = vpop.permute.xlu0 %1731  ;;  %v1735_v27 = vmul.f32 %v8608_v5, %v1730_v25 }
0x1df8   :  { %v1736_v29 = vmul.f32 %v8610_v15, %v1732_v26 }
0x1df9   :  { %v1739_v31 = vrot.slane %v1735_v27, 2  ;;  %v2439_v32 = vsel %vm1220_vm8, %v2437_v28, %v1735_v27 }
0x1dfa   :  { %v1740_v33 = vrot.slane %v1736_v29, 1  ;;  %v2440_v34 = vsel %vm1220_vm8, %v2438_v30, %v1736_v29 }
0x1dfc   :  { %v1741_v35 = vsel %vm242_vm5, %v1740_v33, %v1739_v31 }
0x1dfd   :  { %1742 = vrot.lane.b32.xlu1 %v1741_v35, %s9235_s25 }
0x1e6f   :  { %v1743_v36 = vpop.permute.xlu1 %1742 }
0x1e70   :  { %7859 = vmatmul.mubr.msk.f32.vlgmr.msra.gmra.mrb[12].mxu1 %vm1333_vm13, %v1743_v36 }
0x1e71   :  { %7867 = vmatpush3.msra.mxu1 %v9470_v24  ;;  %7868 = vmatprep.mubr.msk.f32.mxu1 %vm9233_vm4, %v9234_v9 }
0x1e72   :  { %7876 = vmatprep.subr.mxu1 %v9234_v9 }
0x1f43   :  { %v1812_v18 = vpop.f32.mrb[12].mxu1 }
0x1f44   :  { %v1817_v10 = vrot.slane %v1812_v18, 5  ;;  %v1818_v37 = vrot.slane %v1812_v18, 6  ;;  %v7860_v38 = vpop.f32.mrb[13].mxu1 }
0x1f46   :  { %v1821_v39 = vadd.f32 %v1817_v10, %v9503_v42  ;;  %v1822_v40 = vadd.f32 %v1818_v37, %v9501_v41 }
0x1f48   :  { %8615 = vtanh.f32 %v1821_v39  ;;  %v7445_v45 = vmul.f32 -1.442695, %v1821_v39  ;;  %v7446_v46 = vmul.f32 -1.442695, %v1822_v40 }
0x1f49   :  { %8617 = vtanh.f32 %v1822_v40 }
0x1f4a   :  { %8619 = vpow2.f32 %v7445_v45 }
0x1f4b   :  { %8621 = vpow2.f32 %v7446_v46 }
0x1f52   :  { %v8616_v8 = vpop.eup %8615 }
0x1f53   :  { %v8618_v43 = vpop.eup %8617  ;;  %1847 = vrot.lane.b32.xlu0 %v8616_v8, %s9239_s10 }
0x1f54   :  { %1849 = vrot.lane.b32.xlu1 %v8618_v43, %s9239_s10  ;;  %v8620_v48 = vpop.eup %8619 }
0x1f55   :  { %v8622_v49 = vpop.eup %8621  ;;  %v1829_v50 = vadd.f32 1.0, %v8620_v48 }
0x1f56   :  { %v1830_v51 = vadd.f32 1.0, %v8622_v49 }
0x1f57   :  { %8623 = vrcp.f32 %v1829_v50 }
0x1f58   :  { %8625 = vrcp.f32 %v1830_v51 }
0x1f61   :  { %v8624_v52 = vpop.eup %8623 }
0x1f62   :  { %v8626_v54 = vpop.eup %8625  ;;  %v1843_v60 = vmul.f32 %v8624_v52, %v1839_v58 }
0x1f63   :  { %v1844_v61 = vmul.f32 %v8626_v54, %v1840_v59 }
0x1fc5   :  { %v1848_v53 = vpop.permute.xlu0 %1847 }
0x1fc6   :  { %v1850_v55 = vpop.permute.xlu1 %1849  ;;  %v1853_v56 = vmul.f32 %v8624_v52, %v1848_v53 }
0x1fc7   :  { %v1854_v57 = vmul.f32 %v8626_v54, %v1850_v55 }
0x1fc8   :  { %1857 = vrot.lane.b32.xlu0 %v1853_v56, %s9240_s11 }
0x1fc9   :  { %1859 = vrot.lane.b32.xlu1 %v1854_v57, %s9240_s11 }
0x203a   :  { %v1858_v62 = vpop.permute.xlu0 %1857 }
0x203b   :  { %v1860_v63 = vpop.permute.xlu1 %1859  ;;  %v1863_v0 = vadd.f32 %v1858_v62, %v1843_v60 }
0x203c   :  { %v1864_v1 = vadd.f32 %v1860_v63, %v1844_v61 }
0x203d   :  { %8627 = vtanh.f32 %v1863_v0  ;;  %v1979_v37 = vrot.slane %v1863_v0, 7 }
0x203e   :  { %8629 = vtanh.f32 %v1864_v1  ;;  %v1980_v38 = vrot.slane %v1864_v1, 7 }
0x2047   :  { %v8628_v2 = vpop.eup %8627 }
0x2048   :  { %v8630_v4 = vpop.eup %8629  ;;  %1869 = vrot.lane.b32.xlu0 %v8628_v2, %s9241_s12 }
0x2049   :  { %1871 = vrot.lane.b32.xlu1 %v8630_v4, %s9241_s12 }
0x20ba   :  { %v1870_v5 = vpop.permute.xlu0 %1869 }
0x20bb   :  { %v1872_v7 = vpop.permute.xlu1 %1871  ;;  %v1875_v15 = vmul.f32 %v8624_v52, %v1870_v5 }
0x20bc   :  { %v1876_v11 = vmul.f32 %v8626_v54, %v1872_v7 }
0x20bd   :  { %v1879_v44 = vrot.slane %v1875_v15, 3  ;;  %v2441_v47 = vsel %vm1223_vm9, %v2439_v32, %v1875_v15 }
0x20be   :  { %v1880_v12 = vrot.slane %v1876_v11, 2  ;;  %v2442_v13 = vsel %vm1223_vm9, %v2440_v34, %v1876_v11 }
0x20c0   :  { %v1881_v14 = vsel %vm242_vm5, %v1880_v12, %v1879_v44 }
0x20c1   :  { %1882 = vrot.lane.b32.xlu0 %v1881_v14, %s9235_s25 }
0x2133   :  { %v1883_v16 = vpop.permute.xlu0 %1882 }
0x2134   :  { %7864 = vmatmul.mubr.msk.f32.vlgmr.msra.gmra.mrb[14].mxu0 %vm1333_vm13, %v1883_v16 }
0x2135   :  { %7872 = vmatpush3.msra.mxu0 %v9470_v24  ;;  %7873 = vmatprep.mubr.msk.f32.mxu0 %vm9233_vm4, %v9234_v9 }
0x2207   :  { %v1952_v17 = vpop.f32.mrb[14].mxu0 }
0x2208   :  { %v1957_v19 = vrot.slane %v1952_v17, 4  ;;  %v1958_v20 = vrot.slane %v1952_v17, 5  ;;  %v7865_v21 = vpop.f32.mrb[15].mxu0 }
0x220a   :  { %v1961_v22 = vadd.f32 %v1957_v19, %v9503_v42  ;;  %v1962_v23 = vadd.f32 %v1958_v20, %v9501_v41 }
0x220c   :  { %8631 = vtanh.f32 %v1961_v22  ;;  %v7448_v27 = vmul.f32 -1.442695, %v1961_v22  ;;  %v7449_v28 = vmul.f32 -1.442695, %v1962_v23 }
0x220d   :  { %8633 = vtanh.f32 %v1962_v23 }
0x220e   :  { %8635 = vpow2.f32 %v7448_v27 }
0x220f   :  { %8637 = vpow2.f32 %v7449_v28 }
0x2216   :  { %v8632_v25 = vpop.eup %8631 }
0x2217   :  { %v8634_v26 = vpop.eup %8633  ;;  %1987 = vrot.lane.b32.xlu1 %v8632_v25, %s9239_s10 }
0x2218   :  { %1989 = vrot.lane.b32.xlu0 %v8634_v26, %s9239_s10  ;;  %v8636_v29 = vpop.eup %8635 }
0x2219   :  { %v8638_v30 = vpop.eup %8637  ;;  %v1969_v31 = vadd.f32 1.0, %v8636_v29 }
0x221a   :  { %v1970_v32 = vadd.f32 1.0, %v8638_v30 }
0x221b   :  { %8639 = vrcp.f32 %v1969_v31 }
0x221c   :  { %8641 = vrcp.f32 %v1970_v32 }
0x2225   :  { %v8640_v33 = vpop.eup %8639 }
0x2226   :  { %v8642_v35 = vpop.eup %8641  ;;  %v1983_v39 = vmul.f32 %v8640_v33, %v1979_v37 }
0x2227   :  { %v1984_v40 = vmul.f32 %v8642_v35, %v1980_v38 }
0x2289   :  { %v1988_v34 = vpop.permute.xlu1 %1987 }
0x228a   :  { %v1990_v36 = vpop.permute.xlu0 %1989  ;;  %v1993_v18 = vmul.f32 %v8640_v33, %v1988_v34 }
0x228b   :  { %v1994_v10 = vmul.f32 %v8642_v35, %v1990_v36 }
0x228c   :  { %1997 = vrot.lane.b32.xlu1 %v1993_v18, %s9240_s11 }
0x228d   :  { %1999 = vrot.lane.b32.xlu0 %v1994_v10, %s9240_s11 }
0x22fe   :  { %v1998_v8 = vpop.permute.xlu1 %1997 }
0x22ff   :  { %v2000_v43 = vpop.permute.xlu0 %1999  ;;  %v2003_v45 = vadd.f32 %v1998_v8, %v1983_v39 }
0x2300   :  { %v2004_v46 = vadd.f32 %v2000_v43, %v1984_v40 }
0x2301   :  { %8643 = vtanh.f32 %v2003_v45  ;;  %v2119_v19 = vrot.slane %v2003_v45, 7 }
0x2302   :  { %8645 = vtanh.f32 %v2004_v46  ;;  %v2120_v20 = vrot.slane %v2004_v46, 7 }
0x230b   :  { %v8644_v48 = vpop.eup %8643 }
0x230c   :  { %v8646_v49 = vpop.eup %8645  ;;  %2009 = vrot.lane.b32.xlu1 %v8644_v48, %s9241_s12 }
0x230d   :  { %2011 = vrot.lane.b32.xlu0 %v8646_v49, %s9241_s12 }
0x237e   :  { %v2010_v50 = vpop.permute.xlu1 %2009 }
0x237f   :  { %v2012_v51 = vpop.permute.xlu0 %2011  ;;  %v2015_v52 = vmul.f32 %v8640_v33, %v2010_v50 }
0x2380   :  { %v2016_v53 = vmul.f32 %v8642_v35, %v2012_v51 }
0x2381   :  { %v2019_v54 = vrot.slane %v2015_v52, 4  ;;  %v2443_v55 = vsel %vm111_vm0, %v2441_v47, %v2015_v52 }
0x2382   :  { %v2020_v56 = vrot.slane %v2016_v53, 3  ;;  %v2444_v57 = vsel %vm111_vm0, %v2442_v13, %v2016_v53 }
0x2384   :  { %v2021_v58 = vsel %vm242_vm5, %v2020_v56, %v2019_v54 }
0x2385   :  { %2022 = vrot.lane.b32.xlu1 %v2021_v58, %s9235_s25 }
0x23f7   :  { %v2023_v59 = vpop.permute.xlu1 %2022 }
0x23f8   :  { %7869 = vmatmul.mubr.msk.f32.vlgmr.msra.gmra.mrb[14].mxu1 %vm1333_vm13, %v2023_v59 }
0x23f9   :  { %7877 = vmatpush3.msra.mxu1 %v9470_v24  ;;  %7878 = vmatprep.mubr.msk.f32.mxu1 %vm9233_vm4, %v9234_v9 }
0x23fa   :  { %8250 = vmatprep.subr.bf16.mxu1 %v9231_v3 }
0x24cb   :  { %v2092_v60 = vpop.f32.mrb[14].mxu1 }
0x24cc   :  { %v2097_v61 = vrot.slane %v2092_v60, 3  ;;  %v2098_v62 = vrot.slane %v2092_v60, 4  ;;  %v7870_v63 = vpop.f32.mrb[15].mxu1 }
0x24ce   :  { %v2101_v0 = vadd.f32 %v2097_v61, %v9503_v42  ;;  %v2102_v1 = vadd.f32 %v2098_v62, %v9501_v41 }
0x24d0   :  { %8647 = vtanh.f32 %v2101_v0  ;;  %v7451_v24 = vmul.f32 -1.442695, %v2101_v0  ;;  %v7452_v5 = vmul.f32 -1.442695, %v2102_v1 }
0x24d1   :  { %8649 = vtanh.f32 %v2102_v1 }
0x24d2   :  { %8651 = vpow2.f32 %v7451_v24 }
0x24d3   :  { %8653 = vpow2.f32 %v7452_v5 }
0x24da   :  { %v8648_v2 = vpop.eup %8647 }
0x24db   :  { %v8650_v4 = vpop.eup %8649  ;;  %2127 = vrot.lane.b32.xlu0 %v8648_v2, %s9239_s10 }
0x24dc   :  { %2129 = vrot.lane.b32.xlu1 %v8650_v4, %s9239_s10  ;;  %v8652_v7 = vpop.eup %8651 }
0x24dd   :  { %v8654_v15 = vpop.eup %8653  ;;  %v2109_v11 = vadd.f32 1.0, %v8652_v7 }
0x24de   :  { %v2110_v44 = vadd.f32 1.0, %v8654_v15 }
0x24df   :  { %8655 = vrcp.f32 %v2109_v11 }
0x24e0   :  { %8657 = vrcp.f32 %v2110_v44 }
0x24e9   :  { %v8656_v47 = vpop.eup %8655 }
0x24ea   :  { %v8658_v13 = vpop.eup %8657  ;;  %v2123_v21 = vmul.f32 %v8656_v47, %v2119_v19 }
0x24eb   :  { %v2124_v22 = vmul.f32 %v8658_v13, %v2120_v20 }
0x254d   :  { %v2128_v12 = vpop.permute.xlu0 %2127 }
0x254e   :  { %v2130_v14 = vpop.permute.xlu1 %2129  ;;  %v2133_v16 = vmul.f32 %v8656_v47, %v2128_v12 }
0x254f   :  { %v2134_v17 = vmul.f32 %v8658_v13, %v2130_v14 }
0x2550   :  { %2137 = vrot.lane.b32.xlu0 %v2133_v16, %s9240_s11 }
0x2551   :  { %2139 = vrot.lane.b32.xlu1 %v2134_v17, %s9240_s11 }
0x25c2   :  { %v2138_v23 = vpop.permute.xlu0 %2137 }
0x25c3   :  { %v2140_v25 = vpop.permute.xlu1 %2139  ;;  %v2143_v26 = vadd.f32 %v2138_v23, %v2123_v21 }
0x25c4   :  { %v2144_v27 = vadd.f32 %v2140_v25, %v2124_v22 }
0x25c5   :  { %8659 = vtanh.f32 %v2143_v26  ;;  %v2259_v61 = vrot.slane %v2143_v26, 7 }
0x25c6   :  { %8661 = vtanh.f32 %v2144_v27  ;;  %v2260_v62 = vrot.slane %v2144_v27, 7 }
0x25cf   :  { %v8660_v28 = vpop.eup %8659 }
0x25d0   :  { %v8662_v29 = vpop.eup %8661  ;;  %2149 = vrot.lane.b32.xlu0 %v8660_v28, %s9241_s12 }
0x25d1   :  { %2151 = vrot.lane.b32.xlu1 %v8662_v29, %s9241_s12 }
0x2642   :  { %v2150_v30 = vpop.permute.xlu0 %2149 }
0x2643   :  { %v2152_v31 = vpop.permute.xlu1 %2151  ;;  %v2155_v32 = vmul.f32 %v8656_v47, %v2150_v30 }
0x2644   :  { %v2156_v33 = vmul.f32 %v8658_v13, %v2152_v31 }
0x2645   :  { %v2159_v34 = vrot.slane %v2155_v32, 5  ;;  %v2445_v35 = vsel %vm1228_vm10, %v2443_v55, %v2155_v32 }
0x2646   :  { %v2160_v36 = vrot.slane %v2156_v33, 4  ;;  %v2446_v18 = vsel %vm1228_vm10, %v2444_v57, %v2156_v33 }
0x2648   :  { %v2161_v10 = vsel %vm242_vm5, %v2160_v36, %v2159_v34 }
0x2649   :  { %2162 = vrot.lane.b32.xlu0 %v2161_v10, %s9235_s25 }
0x26bb   :  { %v2163_v37 = vpop.permute.xlu0 %2162 }
0x26bc   :  { %7874 = vmatmul.mubr.msk.f32.vlgmr.msra.gmra.mrb[16].mxu0 %vm1333_vm13, %v2163_v37 }
0x278f   :  { %v2232_v38 = vpop.f32.mrb[16].mxu0 }
0x2790   :  { %v2237_v39 = vrot.slane %v2232_v38, 2  ;;  %v2238_v40 = vrot.slane %v2232_v38, 3  ;;  %v7875_v8 = vpop.f32.mrb[17].mxu0 }
0x2792   :  { %v2241_v43 = vadd.f32 %v2237_v39, %v9503_v42  ;;  %v2242_v45 = vadd.f32 %v2238_v40, %v9501_v41 }
0x2794   :  { %8663 = vtanh.f32 %v2241_v43  ;;  %v7454_v49 = vmul.f32 -1.442695, %v2241_v43  ;;  %v7455_v50 = vmul.f32 -1.442695, %v2242_v45 }
0x2795   :  { %8665 = vtanh.f32 %v2242_v45 }
0x2796   :  { %8667 = vpow2.f32 %v7454_v49  ;;  %v2452_v49 = vld [vmem:[%s10433_s1 + $0x50] sm:$0xff] }
0x2797   :  { %8669 = vpow2.f32 %v7455_v50  ;;  %v2453_v50 = vld [vmem:[%s10433_s1 + $0x58] sm:$0xf] }
0x279e   :  { %v8664_v46 = vpop.eup %8663 }
0x279f   :  { %v8666_v48 = vpop.eup %8665  ;;  %2267 = vrot.lane.b32.xlu1 %v8664_v46, %s9239_s10 }
0x27a0   :  { %2269 = vrot.lane.b32.xlu0 %v8666_v48, %s9239_s10  ;;  %v8668_v51 = vpop.eup %8667  ;;  %v2451_v48 = vld [vmem:[%s10433_s1 + $0x48] sm:$0xff] }
0x27a1   :  { %v8670_v52 = vpop.eup %8669  ;;  %v2249_v53 = vadd.f32 1.0, %v8668_v51  ;;  %7881 = vmatprep.subr.mxu0 %v2451_v48  ;;  %v9642_v51 = vpack.c.bf16 %v2453_v50, %v2452_v49 }
0x27a2   :  { %v2250_v54 = vadd.f32 1.0, %v8670_v52  ;;  %7882 = vmatpush3.msra.mxu0 %v2451_v48 }
0x27a3   :  { %8671 = vrcp.f32 %v2249_v53  ;;  %8254 = vmatprep.subr.bf16.mxu0 %v9231_v3 }
0x27a4   :  { %8673 = vrcp.f32 %v2250_v54 }
0x27ad   :  { %v8672_v55 = vpop.eup %8671 }
0x27ae   :  { %v8674_v57 = vpop.eup %8673  ;;  %v2263_v63 = vmul.f32 %v8672_v55, %v2259_v61 }
0x27af   :  { %v2264_v0 = vmul.f32 %v8674_v57, %v2260_v62 }
0x2811   :  { %v2268_v56 = vpop.permute.xlu1 %2267 }
0x2812   :  { %v2270_v58 = vpop.permute.xlu0 %2269  ;;  %v2273_v59 = vmul.f32 %v8672_v55, %v2268_v56 }
0x2813   :  { %v2274_v60 = vmul.f32 %v8674_v57, %v2270_v58 }
0x2814   :  { %2277 = vrot.lane.b32.xlu1 %v2273_v59, %s9240_s11 }
0x2815   :  { %2279 = vrot.lane.b32.xlu0 %v2274_v60, %s9240_s11 }
0x2886   :  { %v2278_v1 = vpop.permute.xlu1 %2277 }
0x2887   :  { %v2280_v2 = vpop.permute.xlu0 %2279  ;;  %v2283_v4 = vadd.f32 %v2278_v1, %v2263_v63 }
0x2888   :  { %v2284_v24 = vadd.f32 %v2280_v2, %v2264_v0  ;;  %v7459_v0 = vld [vmem:[%s10433_s1 + $0x60] ss:$0 sm:$0xff] }
0x2889   :  { %8675 = vtanh.f32 %v2283_v4  ;;  %v2399_v37 = vrot.slane %v2283_v4, 7 }
0x288a   :  { %8677 = vtanh.f32 %v2284_v24  ;;  %v2400_v38 = vrot.slane %v2284_v24, 7 }
0x2893   :  { %v8676_v5 = vpop.eup %8675 }
0x2894   :  { %v8678_v7 = vpop.eup %8677  ;;  %2289 = vrot.lane.b32.xlu1 %v8676_v5, %s9241_s12 }
0x2895   :  { %2291 = vrot.lane.b32.xlu0 %v8678_v7, %s9241_s12 }
0x2906   :  { %v2290_v15 = vpop.permute.xlu1 %2289 }
0x2907   :  { %v2292_v11 = vpop.permute.xlu0 %2291  ;;  %v2295_v44 = vmul.f32 %v8672_v55, %v2290_v15 }
0x2908   :  { %v2296_v47 = vmul.f32 %v8674_v57, %v2292_v11 }
0x2909   :  { %v2299_v12 = vrot.slane %v2295_v44, 6  ;;  %v9617_v13 = vsel %vm1231_vm11, %v2445_v35, %v2295_v44 }
0x290a   :  { %v2300_v14 = vrot.slane %v2296_v47, 5  ;;  %v9620_v16 = vsel %vm1231_vm11, %v2446_v18, %v2296_v47 }
0x290c   :  { %v2301_v17 = vsel %vm242_vm5, %v2300_v14, %v2299_v12 }
0x290d   :  { %2302 = vrot.lane.b32.xlu1 %v2301_v17, %s9235_s25 }
0x297f   :  { %v2303_v19 = vpop.permute.xlu1 %2302 }
0x2980   :  { %7879 = vmatmul.mubr.msk.f32.vlgmr.msra.gmra.mrb[16].mxu1 %vm1333_vm13, %v2303_v19 }
0x2981   :  { %7890 = vmatprep.mubr.msk.f32.mxu1 %vm9233_vm4, %v9234_v9  ;;  %8253 = vmatpush3.bf16.msk.msra.mxu1 %vm9282_vm2, %v9642_v51 }
0x2982   :  { %8258 = vmatprep.subr.bf16.mxu1 %v9231_v3 }
0x2984   :  { %7891 = vmatmul.mubr.f32.vlgmr.msra.gmra.mrb[18].mxu1 %v9234_v9 }
0x2985   :  { %8261 = vmatpush3.bf16.msk.msra.mxu1 %vm9282_vm2, %v9642_v51  ;;  %7904 = vmatprep.mubr.msk.f32.mxu1 %vm9233_vm4, %v9234_v9 }
0x2986   :  { %8266 = vmatprep.subr.bf16.mxu1 %v9231_v3 }
0x2a53   :  { %v2372_v20 = vpop.f32.mrb[16].mxu1 }
0x2a54   :  { %v2377_v21 = vrot.slane %v2372_v20, 1  ;;  %v2378_v22 = vrot.slane %v2372_v20, 2  ;;  %v7880_v23 = vpop.f32.mrb[17].mxu1 }
0x2a56   :  { %v2381_v25 = vadd.f32 %v2377_v21, %v9503_v42  ;;  %v2382_v26 = vadd.f32 %v2378_v22, %v9501_v41 }
0x2a57   :  { %v2613_v60 = vpop.f32.mrb[18].mxu1 }
0x2a58   :  { %8679 = vtanh.f32 %v2381_v25  ;;  %v7457_v29 = vmul.f32 -1.442695, %v2381_v25  ;;  %v7458_v30 = vmul.f32 -1.442695, %v2382_v26  ;;  %v7892_v61 = vpop.f32.mrb[19].mxu1  ;;  %v2618_v1 = vrot.slane %v2613_v60, 1 }
0x2a59   :  { %8681 = vtanh.f32 %v2382_v26 }
0x2a5a   :  { %8683 = vpow2.f32 %v7457_v29 }
0x2a5b   :  { %8685 = vpow2.f32 %v7458_v30 }
0x2a62   :  { %v8680_v27 = vpop.eup %8679 }
0x2a63   :  { %v8682_v28 = vpop.eup %8681  ;;  %2407 = vrot.lane.b32.xlu0 %v8680_v27, %s9239_s10 }
0x2a64   :  { %2409 = vrot.lane.b32.xlu1 %v8682_v28, %s9239_s10  ;;  %v8684_v31 = vpop.eup %8683 }
0x2a65   :  { %v8686_v32 = vpop.eup %8685  ;;  %v2389_v33 = vadd.f32 1.0, %v8684_v31 }
0x2a66   :  { %v2390_v34 = vadd.f32 1.0, %v8686_v32 }
0x2a67   :  { %8687 = vrcp.f32 %v2389_v33 }
0x2a68   :  { %8689 = vrcp.f32 %v2390_v34 }
0x2a71   :  { %v8688_v42 = vpop.eup %8687 }
0x2a72   :  { %v8690_v35 = vpop.eup %8689  ;;  %v2403_v39 = vmul.f32 %v8688_v42, %v2399_v37 }
0x2a73   :  { %v2404_v40 = vmul.f32 %v8690_v35, %v2400_v38 }
0x2ad5   :  { %v2408_v41 = vpop.permute.xlu0 %2407 }
0x2ad6   :  { %v2410_v36 = vpop.permute.xlu1 %2409  ;;  %v2413_v18 = vmul.f32 %v8688_v42, %v2408_v41 }
0x2ad7   :  { %v2414_v10 = vmul.f32 %v8690_v35, %v2410_v36 }
0x2ad8   :  { %2417 = vrot.lane.b32.xlu0 %v2413_v18, %s9240_s11 }
0x2ad9   :  { %2419 = vrot.lane.b32.xlu1 %v2414_v10, %s9240_s11 }
0x2b4a   :  { %v2418_v8 = vpop.permute.xlu0 %2417 }
0x2b4b   :  { %v2420_v43 = vpop.permute.xlu1 %2419  ;;  %v2423_v45 = vadd.f32 %v2418_v8, %v2403_v39 }
0x2b4c   :  { %v2424_v46 = vadd.f32 %v2420_v43, %v2404_v40 }
0x2b4d   :  { %8691 = vtanh.f32 %v2423_v45 }
0x2b4e   :  { %8693 = vtanh.f32 %v2424_v46 }
0x2b57   :  { %v8692_v52 = vpop.eup %8691 }
0x2b58   :  { %v8694_v53 = vpop.eup %8693  ;;  %2429 = vrot.lane.b32.xlu0 %v8692_v52, %s9241_s12 }
0x2b59   :  { %2431 = vrot.lane.b32.xlu1 %v8694_v53, %s9241_s12 }
0x2bca   :  { %v2430_v54 = vpop.permute.xlu0 %2429 }
0x2bcb   :  { %v2432_v55 = vpop.permute.xlu1 %2431  ;;  %v2435_v56 = vmul.f32 %v8688_v42, %v2430_v54 }
0x2bcc   :  { %v2436_v57 = vmul.f32 %v8690_v35, %v2432_v55 }
0x2bcd   :  { %v2449_v58 = vsel %vm1234_vm12, %v9617_v13, %v2435_v56 }
0x2bce   :  { %v2450_v59 = vsel %vm1234_vm12, %v9620_v16, %v2436_v57  ;;  %2461 = vrot.lane.b32.xlu0 %v2449_v58, %s9235_s25 }
0x2bcf   :  { %2463 = vrot.lane.b32.xlu1 %v2450_v59, %s9235_s25 }
0x2c40   :  { %v9664_v62 = vpop.permute.xlu0 %2461 }
0x2c41   :  { %v9666_v63 = vpop.permute.xlu1 %2463  ;;  %7883 = vmatprep.mubr.msk.f32.mxu0 %vm1333_vm13, %v9664_v62 }
0x2c42   :  { %7884 = vmatmul.mubr.msk.f32.vlgmr.msra.gmra.mrb[18].mxu0 %vm1333_vm13, %v9666_v63 }
0x2c43   :  { %8257 = vmatpush3.bf16.msk.msra.mxu0 %vm9282_vm2, %v9642_v51  ;;  %7897 = vmatprep.mubr.msk.f32.mxu0 %vm9233_vm4, %v9234_v9 }
0x2c44   :  { %8262 = vmatprep.subr.bf16.mxu0 %v9231_v3 }
0x2d15   :  { %v7885_v2 = vpop.f32.mrb[18].mxu0 }
0x2d16   :  { %v9681_v4 = vadd.f32 %v7885_v2, %v7459_v0  ;;  %v2535_v24 = vpop.f32.mrb[19].mxu0 }
0x2d17   :  { %v9683_v5 = vadd.f32 %v7459_v0, %v2535_v24 }
0x2d18   :  { %v2622_v7 = vadd.f32 %v2618_v1, %v9681_v4 }
0x2d19   :  { %v2621_v15 = vadd.f32 %v2613_v60, %v9683_v5 }
0x2d1a   :  { %8695 = vtanh.f32 %v2622_v7  ;;  %v7464_v47 = vmul.f32 -1.442695, %v2622_v7 }
0x2d1b   :  { %8697 = vtanh.f32 %v2621_v15  ;;  %v7463_v12 = vmul.f32 -1.442695, %v2621_v15 }
0x2d1c   :  { %8699 = vpow2.f32 %v7464_v47 }
0x2d1d   :  { %8701 = vpow2.f32 %v7463_v12 }
0x2d24   :  { %v8696_v11 = vpop.eup %8695 }
0x2d25   :  { %v8698_v44 = vpop.eup %8697  ;;  %2643 = vrot.lane.b32.xlu0 %v8696_v11, %s9235_s25 }
0x2d26   :  { %2641 = vrot.lane.b32.xlu1 %v8698_v44, %s9235_s25  ;;  %v8700_v13 = vpop.eup %8699 }
0x2d27   :  { %v8702_v14 = vpop.eup %8701  ;;  %v2630_v16 = vadd.f32 1.0, %v8700_v13 }
0x2d28   :  { %v2629_v17 = vadd.f32 1.0, %v8702_v14 }
0x2d29   :  { %8703 = vrcp.f32 %v2630_v16 }
0x2d2a   :  { %8705 = vrcp.f32 %v2629_v17 }
0x2d33   :  { %v8704_v19 = vpop.eup %8703 }
0x2d34   :  { %v8706_v21 = vpop.eup %8705  ;;  %v2638_v26 = vmul.f32 0.0, %v8704_v19 }
0x2d35   :  { %v2637_v28 = vmul.f32 0.0, %v8706_v21 }
0x2d97   :  { %v2644_v20 = vpop.permute.xlu0 %2643 }
0x2d98   :  { %v2648_v22 = vmul.f32 %v8704_v19, %v2644_v20  ;;  %v2642_v23 = vpop.permute.xlu1 %2641 }
0x2d99   :  { %v2647_v25 = vmul.f32 %v8706_v21, %v2642_v23 }
0x2d9a   :  { %2653 = vrot.lane.b32.xlu0 %v2648_v22, %s9236_s26 }
0x2d9b   :  { %2651 = vrot.lane.b32.xlu1 %v2647_v25, %s9236_s26 }
0x2e0c   :  { %v2654_v27 = vpop.permute.xlu0 %2653 }
0x2e0d   :  { %v2658_v29 = vadd.f32 %v2654_v27, %v2638_v26  ;;  %v2652_v30 = vpop.permute.xlu1 %2651 }
0x2e0e   :  { %v2657_v31 = vadd.f32 %v2652_v30, %v2637_v28 }
0x2e0f   :  { %8707 = vtanh.f32 %v2658_v29  ;;  %v2772_v60 = vrot.slane %v2658_v29, 7 }
0x2e10   :  { %8709 = vtanh.f32 %v2657_v31  ;;  %v2771_v0 = vrot.slane %v2657_v31, 7 }
0x2e19   :  { %v8708_v32 = vpop.eup %8707 }
0x2e1a   :  { %v8710_v33 = vpop.eup %8709  ;;  %2665 = vrot.lane.b32.xlu0 %v8708_v32, %s9237_s27 }
0x2e1b   :  { %2663 = vrot.lane.b32.xlu1 %v8710_v33, %s9237_s27 }
0x2e8c   :  { %v2666_v34 = vpop.permute.xlu0 %2665 }
0x2e8d   :  { %v9693_v42 = vmul.f32 %v8704_v19, %v2666_v34  ;;  %v2664_v41 = vpop.permute.xlu1 %2663 }
0x2e8e   :  { %v9695_v35 = vmul.f32 %v8706_v21, %v2664_v41 }
0x2e8f   :  { %v2673_v36 = vrot.slane %v9693_v42, 7 }
0x2e91   :  { %v2674_v18 = vsel %vm242_vm5, %v2673_v36, %v9695_v35 }
0x2e92   :  { %2675 = vrot.lane.b32.xlu0 %v2674_v18, %s9238_s28 }
0x2f04   :  { %v2676_v10 = vpop.permute.xlu0 %2675 }
0x2f05   :  { %7898 = vmatmul.mubr.msk.f32.vlgmr.msra.gmra.mrb[20].mxu0 %vm107_vm6, %v2676_v10 }
0x2f06   :  { %8265 = vmatpush3.bf16.msk.msra.mxu0 %vm9282_vm2, %v9642_v51  ;;  %7911 = vmatprep.mubr.msk.f32.mxu0 %vm9233_vm4, %v9234_v9 }
0x2f07   :  { %8270 = vmatprep.subr.bf16.mxu0 %v9231_v3 }
0x2fd8   :  { %v2745_v37 = vpop.f32.mrb[20].mxu0 }
0x2fd9   :  { %v2750_v38 = vrot.slane %v2745_v37, 7  ;;  %v2754_v39 = vadd.f32 %v2745_v37, %v9681_v4  ;;  %v7899_v40 = vpop.f32.mrb[21].mxu0 }
0x2fdb   :  { %v2753_v8 = vadd.f32 %v2750_v38, %v9683_v5  ;;  %8711 = vtanh.f32 %v2754_v39  ;;  %v7468_v46 = vmul.f32 -1.442695, %v2754_v39 }
0x2fdd   :  { %8713 = vtanh.f32 %v2753_v8  ;;  %v7467_v48 = vmul.f32 -1.442695, %v2753_v8 }
0x2fde   :  { %8715 = vpow2.f32 %v7468_v46 }
0x2fdf   :  { %8717 = vpow2.f32 %v7467_v48 }
0x2fe5   :  { %v8712_v43 = vpop.eup %8711 }
0x2fe6   :  { %2781 = vrot.lane.b32.xlu0 %v8712_v43, %s9235_s25 }
0x2fe7   :  { %v8714_v45 = vpop.eup %8713 }
0x2fe8   :  { %2779 = vrot.lane.b32.xlu1 %v8714_v45, %s9235_s25  ;;  %v8716_v49 = vpop.eup %8715 }
0x2fe9   :  { %v8718_v50 = vpop.eup %8717  ;;  %v2762_v52 = vadd.f32 1.0, %v8716_v49 }
0x2fea   :  { %v2761_v53 = vadd.f32 1.0, %v8718_v50 }
0x2feb   :  { %8719 = vrcp.f32 %v2762_v52 }
0x2fec   :  { %8721 = vrcp.f32 %v2761_v53 }
0x2ff5   :  { %v8720_v54 = vpop.eup %8719 }
0x2ff6   :  { %v8722_v57 = vpop.eup %8721  ;;  %v2776_v61 = vmul.f32 %v8720_v54, %v2772_v60 }
0x2ff7   :  { %v2775_v24 = vmul.f32 %v8722_v57, %v2771_v0 }
0x3058   :  { %v2782_v55 = vpop.permute.xlu0 %2781 }
0x3059   :  { %v2786_v56 = vmul.f32 %v8720_v54, %v2782_v55 }
0x305a   :  { %v2780_v58 = vpop.permute.xlu1 %2779 }
0x305b   :  { %2791 = vrot.lane.b32.xlu0 %v2786_v56, %s9236_s26  ;;  %v2785_v59 = vmul.f32 %v8722_v57, %v2780_v58 }
0x305d   :  { %2789 = vrot.lane.b32.xlu1 %v2785_v59, %s9236_s26 }
0x30cd   :  { %v2792_v1 = vpop.permute.xlu0 %2791 }
0x30ce   :  { %v2796_v2 = vadd.f32 %v2792_v1, %v2776_v61 }
0x30cf   :  { %v2790_v7 = vpop.permute.xlu1 %2789 }
0x30d0   :  { %8723 = vtanh.f32 %v2796_v2  ;;  %v2795_v15 = vadd.f32 %v2790_v7, %v2775_v24  ;;  %v2911_v40 = vrot.slane %v2796_v2, 7 }
0x30d2   :  { %8725 = vtanh.f32 %v2795_v15  ;;  %v2910_v39 = vrot.slane %v2795_v15, 7 }
0x30da   :  { %v8724_v11 = vpop.eup %8723 }
0x30db   :  { %2803 = vrot.lane.b32.xlu0 %v8724_v11, %s9237_s27 }
0x30dc   :  { %v8726_v44 = vpop.eup %8725 }
0x30dd   :  { %2801 = vrot.lane.b32.xlu1 %v8726_v44, %s9237_s27 }
0x314d   :  { %v2804_v47 = vpop.permute.xlu0 %2803 }
0x314e   :  { %v2808_v14 = vmul.f32 %v8720_v54, %v2804_v47 }
0x314f   :  { %v2802_v12 = vpop.permute.xlu1 %2801 }
0x3150   :  { %v2807_v13 = vmul.f32 %v8722_v57, %v2802_v12  ;;  %v3649_v58 = vsel %vm1217_vm7, %v9693_v42, %v2808_v14 }
0x3152   :  { %v2811_v16 = vrot.slane %v2807_v13, 1  ;;  %v3648_v56 = vsel %vm1217_vm7, %v9695_v35, %v2807_v13 }
0x3154   :  { %v2812_v17 = vsel %vm242_vm5, %v2808_v14, %v2811_v16 }
0x3155   :  { %2813 = vrot.lane.b32.xlu1 %v2812_v17, %s9238_s28 }
0x31c7   :  { %v2814_v19 = vpop.permute.xlu1 %2813 }
0x31c8   :  { %7905 = vmatmul.mubr.msk.f32.vlgmr.msra.gmra.mrb[20].mxu1 %vm107_vm6, %v2814_v19 }
0x31c9   :  { %8269 = vmatpush3.bf16.msk.msra.mxu1 %vm9282_vm2, %v9642_v51  ;;  %7918 = vmatprep.mubr.msk.f32.mxu1 %vm9233_vm4, %v9234_v9 }
0x31ca   :  { %8274 = vmatprep.subr.bf16.mxu1 %v9231_v3 }
0x329b   :  { %v2883_v20 = vpop.f32.mrb[20].mxu1 }
0x329c   :  { %v2888_v21 = vrot.slane %v2883_v20, 6  ;;  %v2889_v22 = vrot.slane %v2883_v20, 7  ;;  %v7906_v23 = vpop.f32.mrb[21].mxu1 }
0x329e   :  { %v2892_v25 = vadd.f32 %v2888_v21, %v9683_v5  ;;  %v2893_v26 = vadd.f32 %v2889_v22, %v9681_v4 }
0x32a0   :  { %8727 = vtanh.f32 %v2892_v25  ;;  %v7471_v29 = vmul.f32 -1.442695, %v2892_v25  ;;  %v7472_v30 = vmul.f32 -1.442695, %v2893_v26 }
0x32a1   :  { %8729 = vtanh.f32 %v2893_v26 }
0x32a2   :  { %8731 = vpow2.f32 %v7471_v29 }
0x32a3   :  { %8733 = vpow2.f32 %v7472_v30 }
0x32aa   :  { %v8728_v27 = vpop.eup %8727 }
0x32ab   :  { %v8730_v28 = vpop.eup %8729  ;;  %2918 = vrot.lane.b32.xlu0 %v8728_v27, %s9235_s25 }
0x32ac   :  { %2920 = vrot.lane.b32.xlu1 %v8730_v28, %s9235_s25  ;;  %v8732_v31 = vpop.eup %8731 }
0x32ad   :  { %v8734_v32 = vpop.eup %8733  ;;  %v2900_v33 = vadd.f32 1.0, %v8732_v31 }
0x32ae   :  { %v2901_v34 = vadd.f32 1.0, %v8734_v32 }
0x32af   :  { %8735 = vrcp.f32 %v2900_v33 }
0x32b0   :  { %8737 = vrcp.f32 %v2901_v34 }
0x32b9   :  { %v8736_v41 = vpop.eup %8735 }
0x32ba   :  { %v8738_v18 = vpop.eup %8737  ;;  %v2914_v8 = vmul.f32 %v8736_v41, %v2910_v39 }
0x32bb   :  { %v2915_v43 = vmul.f32 %v8738_v18, %v2911_v40 }
0x331d   :  { %v2919_v36 = vpop.permute.xlu0 %2918 }
0x331e   :  { %v2921_v10 = vpop.permute.xlu1 %2920  ;;  %v2924_v37 = vmul.f32 %v8736_v41, %v2919_v36 }
0x331f   :  { %v2925_v38 = vmul.f32 %v8738_v18, %v2921_v10 }
0x3320   :  { %2928 = vrot.lane.b32.xlu0 %v2924_v37, %s9236_s26 }
0x3321   :  { %2930 = vrot.lane.b32.xlu1 %v2925_v38, %s9236_s26 }
0x3392   :  { %v2929_v45 = vpop.permute.xlu0 %2928 }
0x3393   :  { %v2931_v46 = vpop.permute.xlu1 %2930  ;;  %v2934_v48 = vadd.f32 %v2929_v45, %v2914_v8 }
0x3394   :  { %v2935_v49 = vadd.f32 %v2931_v46, %v2915_v43 }
0x3395   :  { %8739 = vtanh.f32 %v2934_v48  ;;  %v3050_v27 = vrot.slane %v2934_v48, 7 }
0x3396   :  { %8741 = vtanh.f32 %v2935_v49  ;;  %v3051_v28 = vrot.slane %v2935_v49, 7 }
0x339f   :  { %v8740_v50 = vpop.eup %8739 }
0x33a0   :  { %v8742_v52 = vpop.eup %8741  ;;  %2940 = vrot.lane.b32.xlu0 %v8740_v50, %s9237_s27 }
0x33a1   :  { %2942 = vrot.lane.b32.xlu1 %v8742_v52, %s9237_s27 }
0x3412   :  { %v2941_v53 = vpop.permute.xlu0 %2940 }
0x3413   :  { %v2943_v54 = vpop.permute.xlu1 %2942  ;;  %v2946_v55 = vmul.f32 %v8736_v41, %v2941_v53 }
0x3414   :  { %v2947_v57 = vmul.f32 %v8738_v18, %v2943_v54 }
0x3415   :  { %v2950_v59 = vrot.slane %v2946_v55, 2  ;;  %v3650_v60 = vsel %vm1220_vm8, %v3648_v56, %v2946_v55 }
0x3416   :  { %v2951_v61 = vrot.slane %v2947_v57, 1  ;;  %v3651_v0 = vsel %vm1220_vm8, %v3649_v58, %v2947_v57 }
0x3418   :  { %v2952_v1 = vsel %vm242_vm5, %v2951_v61, %v2950_v59 }
0x3419   :  { %2953 = vrot.lane.b32.xlu0 %v2952_v1, %s9238_s28 }
0x348b   :  { %v2954_v2 = vpop.permute.xlu0 %2953 }
0x348c   :  { %7912 = vmatmul.mubr.msk.f32.vlgmr.msra.gmra.mrb[22].mxu0 %vm107_vm6, %v2954_v2 }
0x348d   :  { %8273 = vmatpush3.bf16.msk.msra.mxu0 %vm9282_vm2, %v9642_v51  ;;  %7925 = vmatprep.mubr.msk.f32.mxu0 %vm9233_vm4, %v9234_v9 }
0x348e   :  { %8278 = vmatprep.subr.bf16.mxu0 %v9231_v3 }
0x355f   :  { %v3023_v42 = vpop.f32.mrb[22].mxu0 }
0x3560   :  { %v3028_v35 = vrot.slane %v3023_v42, 5  ;;  %v3029_v24 = vrot.slane %v3023_v42, 6  ;;  %v7913_v7 = vpop.f32.mrb[23].mxu0 }
0x3562   :  { %v3032_v15 = vadd.f32 %v3028_v35, %v9683_v5  ;;  %v3033_v11 = vadd.f32 %v3029_v24, %v9681_v4 }
0x3564   :  { %8743 = vtanh.f32 %v3032_v15  ;;  %v7475_v12 = vmul.f32 -1.442695, %v3032_v15  ;;  %v7476_v13 = vmul.f32 -1.442695, %v3033_v11 }
0x3565   :  { %8745 = vtanh.f32 %v3033_v11 }
0x3566   :  { %8747 = vpow2.f32 %v7475_v12 }
0x3567   :  { %8749 = vpow2.f32 %v7476_v13 }
0x356e   :  { %v8744_v44 = vpop.eup %8743 }
0x356f   :  { %v8746_v47 = vpop.eup %8745  ;;  %3058 = vrot.lane.b32.xlu1 %v8744_v44, %s9235_s25 }
0x3570   :  { %3060 = vrot.lane.b32.xlu0 %v8746_v47, %s9235_s25  ;;  %v8748_v14 = vpop.eup %8747 }
0x3571   :  { %v8750_v16 = vpop.eup %8749  ;;  %v3040_v17 = vadd.f32 1.0, %v8748_v14 }
0x3572   :  { %v3041_v19 = vadd.f32 1.0, %v8750_v16 }
0x3573   :  { %8751 = vrcp.f32 %v3040_v17 }
0x3574   :  { %8753 = vrcp.f32 %v3041_v19 }
0x357d   :  { %v8752_v20 = vpop.eup %8751 }
0x357e   :  { %v8754_v22 = vpop.eup %8753  ;;  %v3054_v29 = vmul.f32 %v8752_v20, %v3050_v27 }
0x357f   :  { %v3055_v30 = vmul.f32 %v8754_v22, %v3051_v28 }
0x35e1   :  { %v3059_v21 = vpop.permute.xlu1 %3058 }
0x35e2   :  { %v3061_v23 = vpop.permute.xlu0 %3060  ;;  %v3064_v25 = vmul.f32 %v8752_v20, %v3059_v21 }
0x35e3   :  { %v3065_v26 = vmul.f32 %v8754_v22, %v3061_v23 }
0x35e4   :  { %3068 = vrot.lane.b32.xlu1 %v3064_v25, %s9236_s26 }
0x35e5   :  { %3070 = vrot.lane.b32.xlu0 %v3065_v26, %s9236_s26 }
0x3656   :  { %v3069_v31 = vpop.permute.xlu1 %3068 }
0x3657   :  { %v3071_v32 = vpop.permute.xlu0 %3070  ;;  %v3074_v33 = vadd.f32 %v3069_v31, %v3054_v29 }
0x3658   :  { %v3075_v34 = vadd.f32 %v3071_v32, %v3055_v30 }
0x3659   :  { %8755 = vtanh.f32 %v3074_v33  ;;  %v3190_v15 = vrot.slane %v3074_v33, 7 }
0x365a   :  { %8757 = vtanh.f32 %v3075_v34  ;;  %v3191_v11 = vrot.slane %v3075_v34, 7 }
0x3663   :  { %v8756_v41 = vpop.eup %8755 }
0x3664   :  { %v8758_v36 = vpop.eup %8757  ;;  %3080 = vrot.lane.b32.xlu1 %v8756_v41, %s9237_s27 }
0x3665   :  { %3082 = vrot.lane.b32.xlu0 %v8758_v36, %s9237_s27 }
0x36d6   :  { %v3081_v18 = vpop.permute.xlu1 %3080 }
0x36d7   :  { %v3083_v10 = vpop.permute.xlu0 %3082  ;;  %v3086_v37 = vmul.f32 %v8752_v20, %v3081_v18 }
0x36d8   :  { %v3087_v38 = vmul.f32 %v8754_v22, %v3083_v10 }
0x36d9   :  { %v3090_v39 = vrot.slane %v3086_v37, 3  ;;  %v3652_v40 = vsel %vm1223_vm9, %v3650_v60, %v3086_v37 }
0x36da   :  { %v3091_v8 = vrot.slane %v3087_v38, 2  ;;  %v3653_v43 = vsel %vm1223_vm9, %v3651_v0, %v3087_v38 }
0x36dc   :  { %v3092_v45 = vsel %vm242_vm5, %v3091_v8, %v3090_v39 }
0x36dd   :  { %3093 = vrot.lane.b32.xlu1 %v3092_v45, %s9238_s28 }
0x374f   :  { %v3094_v46 = vpop.permute.xlu1 %3093 }
0x3750   :  { %7919 = vmatmul.mubr.msk.f32.vlgmr.msra.gmra.mrb[22].mxu1 %vm107_vm6, %v3094_v46 }
0x3751   :  { %8277 = vmatpush3.bf16.msk.msra.mxu1 %vm9282_vm2, %v9642_v51  ;;  %7932 = vmatprep.mubr.msk.f32.mxu1 %vm9233_vm4, %v9234_v9 }
0x3823   :  { %v3163_v48 = vpop.f32.mrb[22].mxu1 }
0x3824   :  { %v3168_v49 = vrot.slane %v3163_v48, 4  ;;  %v3169_v50 = vrot.slane %v3163_v48, 5  ;;  %v7920_v52 = vpop.f32.mrb[23].mxu1 }
0x3826   :  { %v3172_v53 = vadd.f32 %v3168_v49, %v9683_v5  ;;  %v3173_v54 = vadd.f32 %v3169_v50, %v9681_v4 }
0x3828   :  { %8759 = vtanh.f32 %v3172_v53  ;;  %v7479_v57 = vmul.f32 -1.442695, %v3172_v53  ;;  %v7480_v58 = vmul.f32 -1.442695, %v3173_v54 }
0x3829   :  { %8761 = vtanh.f32 %v3173_v54 }
0x382a   :  { %8763 = vpow2.f32 %v7479_v57 }
0x382b   :  { %8765 = vpow2.f32 %v7480_v58 }
0x3832   :  { %v8760_v55 = vpop.eup %8759 }
0x3833   :  { %v8762_v56 = vpop.eup %8761  ;;  %3198 = vrot.lane.b32.xlu0 %v8760_v55, %s9235_s25 }
0x3834   :  { %3200 = vrot.lane.b32.xlu1 %v8762_v56, %s9235_s25  ;;  %v8764_v59 = vpop.eup %8763 }
0x3835   :  { %v8766_v60 = vpop.eup %8765  ;;  %v3180_v61 = vadd.f32 1.0, %v8764_v59 }
0x3836   :  { %v3181_v0 = vadd.f32 1.0, %v8766_v60 }
0x3837   :  { %8767 = vrcp.f32 %v3180_v61 }
0x3838   :  { %8769 = vrcp.f32 %v3181_v0 }
0x3841   :  { %v8768_v1 = vpop.eup %8767 }
0x3842   :  { %v8770_v42 = vpop.eup %8769  ;;  %v3194_v44 = vmul.f32 %v8768_v1, %v3190_v15 }
0x3843   :  { %v3195_v47 = vmul.f32 %v8770_v42, %v3191_v11 }
0x38a5   :  { %v3199_v2 = vpop.permute.xlu0 %3198 }
0x38a6   :  { %v3201_v35 = vpop.permute.xlu1 %3200  ;;  %v3204_v24 = vmul.f32 %v8768_v1, %v3199_v2 }
0x38a7   :  { %v3205_v7 = vmul.f32 %v8770_v42, %v3201_v35 }
0x38a8   :  { %3208 = vrot.lane.b32.xlu0 %v3204_v24, %s9236_s26 }
0x38a9   :  { %3210 = vrot.lane.b32.xlu1 %v3205_v7, %s9236_s26 }
0x391a   :  { %v3209_v12 = vpop.permute.xlu0 %3208 }
0x391b   :  { %v3211_v13 = vpop.permute.xlu1 %3210  ;;  %v3214_v14 = vadd.f32 %v3209_v12, %v3194_v44 }
0x391c   :  { %v3215_v16 = vadd.f32 %v3211_v13, %v3195_v47 }
0x391d   :  { %8771 = vtanh.f32 %v3214_v14  ;;  %v3330_v52 = vrot.slane %v3214_v14, 7 }
0x391e   :  { %8773 = vtanh.f32 %v3215_v16  ;;  %v3331_v53 = vrot.slane %v3215_v16, 7 }
0x3927   :  { %v8772_v17 = vpop.eup %8771 }
0x3928   :  { %v8774_v19 = vpop.eup %8773  ;;  %3220 = vrot.lane.b32.xlu0 %v8772_v17, %s9237_s27 }
0x3929   :  { %3222 = vrot.lane.b32.xlu1 %v8774_v19, %s9237_s27 }
0x399a   :  { %v3221_v20 = vpop.permute.xlu0 %3220 }
0x399b   :  { %v3223_v21 = vpop.permute.xlu1 %3222  ;;  %v3226_v22 = vmul.f32 %v8768_v1, %v3221_v20 }
0x399c   :  { %v3227_v23 = vmul.f32 %v8770_v42, %v3223_v21 }
0x399d   :  { %v3230_v25 = vrot.slane %v3226_v22, 4  ;;  %v3654_v26 = vsel %vm111_vm0, %v3652_v40, %v3226_v22 }
0x399e   :  { %v3231_v27 = vrot.slane %v3227_v23, 3  ;;  %v3655_v28 = vsel %vm111_vm0, %v3653_v43, %v3227_v23 }
0x39a0   :  { %v3232_v29 = vsel %vm242_vm5, %v3231_v27, %v3230_v25 }
0x39a1   :  { %3233 = vrot.lane.b32.xlu0 %v3232_v29, %s9238_s28 }
0x3a13   :  { %v3234_v30 = vpop.permute.xlu0 %3233 }
0x3a14   :  { %7926 = vmatmul.mubr.msk.f32.vlgmr.msra.gmra.mrb[24].mxu0 %vm107_vm6, %v3234_v30 }
0x3a15   :  { %8281 = vmatpush3.bf16.msk.msra.mxu0 %vm9282_vm2, %v9642_v51  ;;  %7939 = vmatprep.mubr.msk.f32.mxu0 %vm9233_vm4, %v9234_v9 }
0x3a16   :  { %8288 = vmatprep.subr.bf16.mxu0 %v9231_v3 }
0x3ae7   :  { %v3303_v31 = vpop.f32.mrb[24].mxu0 }
0x3ae8   :  { %v3308_v32 = vrot.slane %v3303_v31, 3  ;;  %v3309_v33 = vrot.slane %v3303_v31, 4  ;;  %v7927_v34 = vpop.f32.mrb[25].mxu0 }
0x3aea   :  { %v3312_v41 = vadd.f32 %v3308_v32, %v9683_v5  ;;  %v3313_v36 = vadd.f32 %v3309_v33, %v9681_v4 }
0x3aec   :  { %8775 = vtanh.f32 %v3312_v41  ;;  %v7483_v51 = vmul.f32 -1.442695, %v3312_v41  ;;  %v7484_v37 = vmul.f32 -1.442695, %v3313_v36 }
0x3aed   :  { %8777 = vtanh.f32 %v3313_v36 }
0x3aee   :  { %8779 = vpow2.f32 %v7483_v51 }
0x3aef   :  { %8781 = vpow2.f32 %v7484_v37 }
0x3af6   :  { %v8776_v18 = vpop.eup %8775 }
0x3af7   :  { %v8778_v10 = vpop.eup %8777  ;;  %3338 = vrot.lane.b32.xlu1 %v8776_v18, %s9235_s25 }
0x3af8   :  { %3340 = vrot.lane.b32.xlu0 %v8778_v10, %s9235_s25  ;;  %v8780_v38 = vpop.eup %8779 }
0x3af9   :  { %v8782_v39 = vpop.eup %8781  ;;  %v3320_v40 = vadd.f32 1.0, %v8780_v38 }
0x3afa   :  { %v3321_v8 = vadd.f32 1.0, %v8782_v39 }
0x3afb   :  { %8783 = vrcp.f32 %v3320_v40 }
0x3afc   :  { %8785 = vrcp.f32 %v3321_v8 }
0x3b05   :  { %v8784_v43 = vpop.eup %8783 }
0x3b06   :  { %v8786_v46 = vpop.eup %8785  ;;  %v3334_v54 = vmul.f32 %v8784_v43, %v3330_v52 }
0x3b07   :  { %v3335_v55 = vmul.f32 %v8786_v46, %v3331_v53 }
0x3b69   :  { %v3339_v45 = vpop.permute.xlu1 %3338 }
0x3b6a   :  { %v3341_v48 = vpop.permute.xlu0 %3340  ;;  %v3344_v49 = vmul.f32 %v8784_v43, %v3339_v45 }
0x3b6b   :  { %v3345_v50 = vmul.f32 %v8786_v46, %v3341_v48 }
0x3b6c   :  { %3348 = vrot.lane.b32.xlu1 %v3344_v49, %s9236_s26 }
0x3b6d   :  { %3350 = vrot.lane.b32.xlu0 %v3345_v50, %s9236_s26 }
0x3bde   :  { %v3349_v56 = vpop.permute.xlu1 %3348 }
0x3bdf   :  { %v3351_v57 = vpop.permute.xlu0 %3350  ;;  %v3354_v58 = vadd.f32 %v3349_v56, %v3334_v54 }
0x3be0   :  { %v3355_v59 = vadd.f32 %v3351_v57, %v3335_v55 }
0x3be1   :  { %8787 = vtanh.f32 %v3354_v58  ;;  %v3470_v34 = vrot.slane %v3354_v58, 7 }
0x3be2   :  { %8789 = vtanh.f32 %v3355_v59  ;;  %v3471_v41 = vrot.slane %v3355_v59, 7 }
0x3beb   :  { %v8788_v60 = vpop.eup %8787 }
0x3bec   :  { %v8790_v61 = vpop.eup %8789  ;;  %3360 = vrot.lane.b32.xlu1 %v8788_v60, %s9237_s27 }
0x3bed   :  { %3362 = vrot.lane.b32.xlu0 %v8790_v61, %s9237_s27 }
0x3c5e   :  { %v3361_v0 = vpop.permute.xlu1 %3360 }
0x3c5f   :  { %v3363_v1 = vpop.permute.xlu0 %3362  ;;  %v3366_v2 = vmul.f32 %v8784_v43, %v3361_v0 }
0x3c60   :  { %v3367_v42 = vmul.f32 %v8786_v46, %v3363_v1 }
0x3c61   :  { %v3370_v35 = vrot.slane %v3366_v2, 5  ;;  %v3656_v24 = vsel %vm1228_vm10, %v3654_v26, %v3366_v2 }
0x3c62   :  { %v3371_v7 = vrot.slane %v3367_v42, 4  ;;  %v3657_v15 = vsel %vm1228_vm10, %v3655_v28, %v3367_v42 }
0x3c64   :  { %v3372_v11 = vsel %vm242_vm5, %v3371_v7, %v3370_v35 }
0x3c65   :  { %3373 = vrot.lane.b32.xlu1 %v3372_v11, %s9238_s28 }
0x3cd7   :  { %v3374_v44 = vpop.permute.xlu1 %3373 }
0x3cd8   :  { %7933 = vmatmul.mubr.msk.f32.vlgmr.msra.gmra.mrb[24].mxu1 %vm107_vm6, %v3374_v44 }
0x3dab   :  { %v3443_v47 = vpop.f32.mrb[24].mxu1 }
0x3dac   :  { %v3448_v12 = vrot.slane %v3443_v47, 2  ;;  %v3449_v13 = vrot.slane %v3443_v47, 3  ;;  %v7934_v14 = vpop.f32.mrb[25].mxu1 }
0x3dae   :  { %v3452_v16 = vadd.f32 %v3448_v12, %v9683_v5  ;;  %v3453_v17 = vadd.f32 %v3449_v13, %v9681_v4 }
0x3db0   :  { %8791 = vtanh.f32 %v3452_v16  ;;  %v7487_v21 = vmul.f32 -1.442695, %v3452_v16  ;;  %v7488_v22 = vmul.f32 -1.442695, %v3453_v17 }
0x3db1   :  { %8793 = vtanh.f32 %v3453_v17 }
0x3db2   :  { %8795 = vpow2.f32 %v7487_v21 }
0x3db3   :  { %8797 = vpow2.f32 %v7488_v22  ;;  %v3662_v22 = vld [vmem:[%s10433_s1 + $0x68] sm:$0xff] }
0x3dba   :  { %v8792_v19 = vpop.eup %8791 }
0x3dbb   :  { %v8794_v20 = vpop.eup %8793  ;;  %3478 = vrot.lane.b32.xlu0 %v8792_v19, %s9235_s25 }
0x3dbc   :  { %3480 = vrot.lane.b32.xlu1 %v8794_v20, %s9235_s25  ;;  %v8796_v23 = vpop.eup %8795 }
0x3dbd   :  { %v8798_v25 = vpop.eup %8797  ;;  %v3460_v26 = vadd.f32 1.0, %v8796_v23  ;;  %v3663_v23 = vld [vmem:[%s10433_s1 + $0x70] sm:$0xf] }
0x3dbe   :  { %v3461_v27 = vadd.f32 1.0, %v8798_v25  ;;  %v3664_v25 = vld [vmem:[%s10433_s1 + $0x78] sm:$0xff] }
0x3dbf   :  { %8799 = vrcp.f32 %v3460_v26  ;;  %v8282_v26 = vpack.c.bf16 %v3663_v23, %v3662_v22 }
0x3dc0   :  { %8801 = vrcp.f32 %v3461_v27  ;;  %v3665_v27 = vld [vmem:[%s10433_s1 + $0x80] sm:$0xff] }
0x3dc1   :  { %8284 = vmatprep.subr.msk.bf16.mxu1 %vm9282_vm2, %v8282_v26 }
0x3dc2   :  { %8287 = vmatpush3.bf16.msk.msra.mxu1 %vm9282_vm2, %v8282_v26 }
0x3dc3   :  { %8291 = vmatprep.subr.bf16.mxu1 %v9231_v3 }
0x3dc9   :  { %v8800_v28 = vpop.eup %8799 }
0x3dca   :  { %v8802_v30 = vpop.eup %8801  ;;  %v3474_v36 = vmul.f32 %v8800_v28, %v3470_v34 }
0x3dcb   :  { %v3475_v18 = vmul.f32 %v8802_v30, %v3471_v41 }
0x3e2d   :  { %v3479_v29 = vpop.permute.xlu0 %3478 }
0x3e2e   :  { %v3481_v31 = vpop.permute.xlu1 %3480  ;;  %v3484_v32 = vmul.f32 %v8800_v28, %v3479_v29 }
0x3e2f   :  { %v3485_v33 = vmul.f32 %v8802_v30, %v3481_v31 }
0x3e30   :  { %3488 = vrot.lane.b32.xlu0 %v3484_v32, %s9236_s26 }
0x3e31   :  { %3490 = vrot.lane.b32.xlu1 %v3485_v33, %s9236_s26 }
0x3ea2   :  { %v3489_v10 = vpop.permute.xlu0 %3488 }
0x3ea3   :  { %v3491_v51 = vpop.permute.xlu1 %3490  ;;  %v3494_v37 = vadd.f32 %v3489_v10, %v3474_v36 }
0x3ea4   :  { %v3495_v38 = vadd.f32 %v3491_v51, %v3475_v18 }
0x3ea5   :  { %8803 = vtanh.f32 %v3494_v37  ;;  %v3610_v12 = vrot.slane %v3494_v37, 7  ;;  %v7493_v37 = vld [vmem:[%s10433_s1 + $0x88] ss:$0 sm:$0xff] }
0x3ea6   :  { %8805 = vtanh.f32 %v3495_v38  ;;  %v3611_v13 = vrot.slane %v3495_v38, 7 }
0x3eaf   :  { %v8804_v39 = vpop.eup %8803 }
0x3eb0   :  { %v8806_v40 = vpop.eup %8805  ;;  %3500 = vrot.lane.b32.xlu0 %v8804_v39, %s9237_s27 }
0x3eb1   :  { %3502 = vrot.lane.b32.xlu1 %v8806_v40, %s9237_s27 }
0x3f22   :  { %v3501_v8 = vpop.permute.xlu0 %3500 }
0x3f23   :  { %v3503_v43 = vpop.permute.xlu1 %3502  ;;  %v3506_v45 = vmul.f32 %v8800_v28, %v3501_v8  ;;  %v9835_v28 = vpack.c.bf16 %v3665_v27, %v3664_v25 }
0x3f24   :  { %v3507_v46 = vmul.f32 %v8802_v30, %v3503_v43 }
0x3f25   :  { %v3510_v48 = vrot.slane %v3506_v45, 6  ;;  %v9807_v49 = vsel %vm1231_vm11, %v3656_v24, %v3506_v45 }
0x3f26   :  { %v3511_v50 = vrot.slane %v3507_v46, 5  ;;  %v9810_v52 = vsel %vm1231_vm11, %v3657_v15, %v3507_v46 }
0x3f28   :  { %v3512_v53 = vsel %vm242_vm5, %v3511_v50, %v3510_v48 }
0x3f29   :  { %3513 = vrot.lane.b32.xlu0 %v3512_v53, %s9238_s28 }
0x3f9b   :  { %v3514_v54 = vpop.permute.xlu0 %3513 }
0x3f9c   :  { %7940 = vmatmul.mubr.msk.f32.vlgmr.msra.gmra.mrb[26].mxu0 %vm107_vm6, %v3514_v54 }
0x3f9d   :  { %7953 = vmatprep.mubr.msk.f32.mxu0 %vm9233_vm4, %v9234_v9  ;;  %8290 = vmatpush3.bf16.msra.mxu0 %v9835_v28 }
0x3f9e   :  { %8294 = vmatprep.subr.bf16.mxu0 %v9231_v3 }
0x3fa0   :  { %7954 = vmatmul.mubr.f32.vlgmr.msra.gmra.mrb[28].mxu0 %v9234_v9 }
0x3fa1   :  { %8296 = vmatpush3.bf16.msra.mxu0 %v9835_v28  ;;  %7967 = vmatprep.mubr.msk.f32.mxu0 %vm9233_vm4, %v9234_v9 }
0x3fa2   :  { %8300 = vmatprep.subr.bf16.mxu0 %v9231_v3 }
0x406f   :  { %v3583_v55 = vpop.f32.mrb[26].mxu0 }
0x4070   :  { %v3588_v56 = vrot.slane %v3583_v55, 1  ;;  %v3589_v57 = vrot.slane %v3583_v55, 2  ;;  %v7941_v58 = vpop.f32.mrb[27].mxu0 }
0x4072   :  { %v3592_v59 = vadd.f32 %v3588_v56, %v9683_v5  ;;  %v3593_v60 = vadd.f32 %v3589_v57, %v9681_v4 }
0x4073   :  { %v3827_v36 = vpop.f32.mrb[28].mxu0 }
0x4074   :  { %8807 = vtanh.f32 %v3592_v59  ;;  %v7491_v1 = vmul.f32 -1.442695, %v3592_v59  ;;  %v7492_v2 = vmul.f32 -1.442695, %v3593_v60  ;;  %v7955_v18 = vpop.f32.mrb[29].mxu0  ;;  %v3832_v38 = vrot.slane %v3827_v36, 1 }
0x4075   :  { %8809 = vtanh.f32 %v3593_v60 }
0x4076   :  { %8811 = vpow2.f32 %v7491_v1 }
0x4077   :  { %8813 = vpow2.f32 %v7492_v2 }
0x407e   :  { %v8808_v61 = vpop.eup %8807 }
0x407f   :  { %v8810_v0 = vpop.eup %8809  ;;  %3618 = vrot.lane.b32.xlu1 %v8808_v61, %s9235_s25 }
0x4080   :  { %3620 = vrot.lane.b32.xlu0 %v8810_v0, %s9235_s25  ;;  %v8812_v42 = vpop.eup %8811 }
0x4081   :  { %v8814_v35 = vpop.eup %8813  ;;  %v3600_v24 = vadd.f32 1.0, %v8812_v42 }
0x4082   :  { %v3601_v7 = vadd.f32 1.0, %v8814_v35 }
0x4083   :  { %8815 = vrcp.f32 %v3600_v24 }
0x4084   :  { %8817 = vrcp.f32 %v3601_v7 }
0x408d   :  { %v8816_v5 = vpop.eup %8815 }
0x408e   :  { %v8818_v15 = vpop.eup %8817  ;;  %v3614_v14 = vmul.f32 %v8816_v5, %v3610_v12 }
0x408f   :  { %v3615_v16 = vmul.f32 %v8818_v15, %v3611_v13 }
0x40f1   :  { %v3619_v4 = vpop.permute.xlu1 %3618 }
0x40f2   :  { %v3621_v11 = vpop.permute.xlu0 %3620  ;;  %v3624_v44 = vmul.f32 %v8816_v5, %v3619_v4 }
0x40f3   :  { %v3625_v47 = vmul.f32 %v8818_v15, %v3621_v11 }
0x40f4   :  { %3628 = vrot.lane.b32.xlu1 %v3624_v44, %s9236_s26 }
0x40f5   :  { %3630 = vrot.lane.b32.xlu0 %v3625_v47, %s9236_s26 }
0x4166   :  { %v3629_v17 = vpop.permute.xlu1 %3628 }
0x4167   :  { %v3631_v19 = vpop.permute.xlu0 %3630  ;;  %v3634_v20 = vadd.f32 %v3629_v17, %v3614_v14 }
0x4168   :  { %v3635_v21 = vadd.f32 %v3631_v19, %v3615_v16 }
0x4169   :  { %8819 = vtanh.f32 %v3634_v20 }
0x416a   :  { %8821 = vtanh.f32 %v3635_v21 }
0x4173   :  { %v8820_v29 = vpop.eup %8819 }
0x4174   :  { %v8822_v30 = vpop.eup %8821  ;;  %3640 = vrot.lane.b32.xlu1 %v8820_v29, %s9237_s27 }
0x4175   :  { %3642 = vrot.lane.b32.xlu0 %v8822_v30, %s9237_s27 }
0x41e6   :  { %v3641_v6 = vpop.permute.xlu1 %3640 }
0x41e7   :  { %v3643_v31 = vpop.permute.xlu0 %3642  ;;  %v3646_v32 = vmul.f32 %v8816_v5, %v3641_v6 }
0x41e8   :  { %v3647_v33 = vmul.f32 %v8818_v15, %v3643_v31 }
0x41e9   :  { %v3660_v34 = vsel %vm1234_vm12, %v9807_v49, %v3646_v32 }
0x41ea   :  { %v3661_v41 = vsel %vm1234_vm12, %v9810_v52, %v3647_v33  ;;  %3673 = vrot.lane.b32.xlu1 %v3660_v34, %s9238_s28 }
0x41eb   :  { %3675 = vrot.lane.b32.xlu0 %v3661_v41, %s9238_s28  ;;  %s9242_s28 = smov 96  }
0x425c   :  { %v3674_v10 = vpop.permute.xlu1 %3673 }
0x425d   :  { %v3676_v51 = vpop.permute.xlu0 %3675  ;;  %7946 = vmatprep.mubr.msk.f32.mxu1 %vm107_vm6, %v3674_v10 }
0x425e   :  { %7947 = vmatmul.mubr.msk.f32.vlgmr.msra.gmra.mrb[26].mxu1 %vm107_vm6, %v3676_v51 }
0x425f   :  { %8293 = vmatpush3.bf16.msra.mxu1 %v9835_v28  ;;  %7960 = vmatprep.mubr.msk.f32.mxu1 %vm9233_vm4, %v9234_v9 }
0x4260   :  { %8297 = vmatprep.subr.bf16.mxu1 %v9231_v3 }
0x4331   :  { %v7948_v39 = vpop.f32.mrb[26].mxu1 }
0x4332   :  { %v9866_v40 = vadd.f32 %v7948_v39, %v7493_v37  ;;  %v3750_v8 = vpop.f32.mrb[27].mxu1 }
0x4333   :  { %v9868_v43 = vadd.f32 %v7493_v37, %v3750_v8 }
0x4334   :  { %v3836_v45 = vadd.f32 %v3832_v38, %v9866_v40 }
0x4335   :  { %v3835_v46 = vadd.f32 %v3827_v36, %v9868_v43 }
0x4336   :  { %8823 = vtanh.f32 %v3836_v45  ;;  %v7498_v50 = vmul.f32 -1.442695, %v3836_v45 }
0x4337   :  { %8825 = vtanh.f32 %v3835_v46  ;;  %v7497_v52 = vmul.f32 -1.442695, %v3835_v46 }
0x4338   :  { %8827 = vpow2.f32 %v7498_v50 }
0x4339   :  { %8829 = vpow2.f32 %v7497_v52 }
0x4340   :  { %v8824_v48 = vpop.eup %8823 }
0x4341   :  { %v8826_v49 = vpop.eup %8825  ;;  %3857 = vrot.lane.b32.xlu1 %v8824_v48, %s9242_s28 }
0x4342   :  { %3855 = vrot.lane.b32.xlu0 %v8826_v49, %s9242_s28  ;;  %v8828_v53 = vpop.eup %8827 }
0x4343   :  { %v8830_v54 = vpop.eup %8829  ;;  %v3844_v55 = vadd.f32 1.0, %v8828_v53 }
0x4344   :  { %v3843_v56 = vadd.f32 1.0, %v8830_v54 }
0x4345   :  { %8831 = vrcp.f32 %v3844_v55 }
0x4346   :  { %8833 = vrcp.f32 %v3843_v56 }
0x434f   :  { %v8832_v57 = vpop.eup %8831 }
0x4350   :  { %v8834_v59 = vpop.eup %8833  ;;  %v3852_v1 = vmul.f32 0.0, %v8832_v57 }
0x4351   :  { %v3851_v42 = vmul.f32 0.0, %v8834_v59 }
0x43b3   :  { %v3858_v58 = vpop.permute.xlu1 %3857 }
0x43b4   :  { %v3862_v60 = vmul.f32 %v8832_v57, %v3858_v58  ;;  %v3856_v61 = vpop.permute.xlu0 %3855 }
0x43b5   :  { %v3861_v0 = vmul.f32 %v8834_v59, %v3856_v61 }
0x43b6   :  { %3867 = vrot.lane.b32.xlu1 %v3862_v60, %s9241_s12 }
0x43b7   :  { %3865 = vrot.lane.b32.xlu0 %v3861_v0, %s9241_s12 }
0x4428   :  { %v3868_v2 = vpop.permute.xlu1 %3867 }
0x4429   :  { %v3872_v35 = vadd.f32 %v3868_v2, %v3852_v1  ;;  %v3866_v24 = vpop.permute.xlu0 %3865 }
0x442a   :  { %v3871_v7 = vadd.f32 %v3866_v24, %v3851_v42 }
0x442b   :  { %8835 = vtanh.f32 %v3872_v35  ;;  %v3986_v18 = vrot.slane %v3872_v35, 7 }
0x442c   :  { %8837 = vtanh.f32 %v3871_v7  ;;  %v3985_v51 = vrot.slane %v3871_v7, 7 }
0x4435   :  { %v8836_v5 = vpop.eup %8835 }
0x4436   :  { %v8838_v4 = vpop.eup %8837  ;;  %3879 = vrot.lane.b32.xlu1 %v8836_v5, %s9243_s4 }
0x4437   :  { %3877 = vrot.lane.b32.xlu0 %v8838_v4, %s9243_s4 }
0x44a8   :  { %v3880_v15 = vpop.permute.xlu1 %3879 }
0x44a9   :  { %v9878_v11 = vmul.f32 %v8832_v57, %v3880_v15  ;;  %v3878_v44 = vpop.permute.xlu0 %3877 }
0x44aa   :  { %v9880_v47 = vmul.f32 %v8834_v59, %v3878_v44 }
0x44ab   :  { %v3887_v12 = vrot.slane %v9878_v11, 7 }
0x44ad   :  { %v3888_v13 = vsel %vm242_vm5, %v3887_v12, %v9880_v47 }
0x44ae   :  { %3889 = vrot.lane.b32.xlu1 %v3888_v13, %s9244_s5 }
0x4520   :  { %v3890_v14 = vpop.permute.xlu1 %3889 }
0x4521   :  { %7961 = vmatmul.mubr.msk.f32.vlgmr.msra.gmra.mrb[28].mxu1 %vm25_vm3, %v3890_v14 }
0x4522   :  { %8299 = vmatpush3.bf16.msra.mxu1 %v9835_v28  ;;  %7974 = vmatprep.mubr.msk.f32.mxu1 %vm9233_vm4, %v9234_v9 }
0x4523   :  { %8303 = vmatprep.subr.bf16.mxu1 %v9231_v3 }
0x45f4   :  { %v3959_v16 = vpop.f32.mrb[28].mxu1 }
0x45f5   :  { %v3964_v17 = vrot.slane %v3959_v16, 7  ;;  %v3968_v19 = vadd.f32 %v3959_v16, %v9866_v40  ;;  %v7962_v20 = vpop.f32.mrb[29].mxu1 }
0x45f7   :  { %v3967_v21 = vadd.f32 %v3964_v17, %v9868_v43  ;;  %8839 = vtanh.f32 %v3968_v19  ;;  %v7501_v25 = vmul.f32 -1.442695, %v3968_v19 }
0x45f9   :  { %8841 = vtanh.f32 %v3967_v21  ;;  %v7500_v26 = vmul.f32 -1.442695, %v3967_v21 }
0x45fa   :  { %8843 = vpow2.f32 %v7501_v25 }
0x45fb   :  { %8845 = vpow2.f32 %v7500_v26 }
0x4601   :  { %v8840_v22 = vpop.eup %8839 }
0x4602   :  { %3995 = vrot.lane.b32.xlu1 %v8840_v22, %s9242_s28 }
0x4603   :  { %v8842_v23 = vpop.eup %8841 }
0x4604   :  { %3993 = vrot.lane.b32.xlu0 %v8842_v23, %s9242_s28  ;;  %v8844_v27 = vpop.eup %8843 }
0x4605   :  { %v8846_v29 = vpop.eup %8845  ;;  %v3976_v30 = vadd.f32 1.0, %v8844_v27 }
0x4606   :  { %v3975_v6 = vadd.f32 1.0, %v8846_v29 }
0x4607   :  { %8847 = vrcp.f32 %v3976_v30 }
0x4608   :  { %8849 = vrcp.f32 %v3975_v6 }
0x4611   :  { %v8848_v31 = vpop.eup %8847 }
0x4612   :  { %v8850_v34 = vpop.eup %8849  ;;  %v3990_v10 = vmul.f32 %v8848_v31, %v3986_v18 }
0x4613   :  { %v3989_v39 = vmul.f32 %v8850_v34, %v3985_v51 }
0x4674   :  { %v3996_v32 = vpop.permute.xlu1 %3995 }
0x4675   :  { %v4000_v33 = vmul.f32 %v8848_v31, %v3996_v32 }
0x4676   :  { %v3994_v41 = vpop.permute.xlu0 %3993 }
0x4677   :  { %4005 = vrot.lane.b32.xlu1 %v4000_v33, %s9241_s12  ;;  %v3999_v36 = vmul.f32 %v8850_v34, %v3994_v41 }
0x4679   :  { %4003 = vrot.lane.b32.xlu0 %v3999_v36, %s9241_s12 }
0x46e9   :  { %v4006_v37 = vpop.permute.xlu1 %4005 }
0x46ea   :  { %v4010_v38 = vadd.f32 %v4006_v37, %v3990_v10 }
0x46eb   :  { %v4004_v8 = vpop.permute.xlu0 %4003 }
0x46ec   :  { %8851 = vtanh.f32 %v4010_v38  ;;  %v4009_v45 = vadd.f32 %v4004_v8, %v3989_v39  ;;  %v4125_v19 = vrot.slane %v4010_v38, 7 }
0x46ee   :  { %8853 = vtanh.f32 %v4009_v45  ;;  %v4124_v17 = vrot.slane %v4009_v45, 7 }
0x46f6   :  { %v8852_v46 = vpop.eup %8851 }
0x46f7   :  { %4017 = vrot.lane.b32.xlu1 %v8852_v46, %s9243_s4 }
0x46f8   :  { %v8854_v48 = vpop.eup %8853 }
0x46f9   :  { %4015 = vrot.lane.b32.xlu0 %v8854_v48, %s9243_s4 }
0x4769   :  { %v4018_v49 = vpop.permute.xlu1 %4017 }
0x476a   :  { %v4022_v53 = vmul.f32 %v8848_v31, %v4018_v49 }
0x476b   :  { %v4016_v50 = vpop.permute.xlu0 %4015 }
0x476c   :  { %v4021_v52 = vmul.f32 %v8850_v34, %v4016_v50  ;;  %v4863_v34 = vsel %vm1217_vm7, %v9878_v11, %v4022_v53 }
0x476e   :  { %v4025_v54 = vrot.slane %v4021_v52, 1  ;;  %v4862_v32 = vsel %vm1217_vm7, %v9880_v47, %v4021_v52 }
0x4770   :  { %v4026_v55 = vsel %vm242_vm5, %v4022_v53, %v4025_v54 }
0x4771   :  { %4027 = vrot.lane.b32.xlu0 %v4026_v55, %s9244_s5 }
0x47e3   :  { %v4028_v56 = vpop.permute.xlu0 %4027 }
0x47e4   :  { %7968 = vmatmul.mubr.msk.f32.vlgmr.msra.gmra.mrb[30].mxu0 %vm25_vm3, %v4028_v56 }
0x47e5   :  { %8302 = vmatpush3.bf16.msra.mxu0 %v9835_v28  ;;  %7981 = vmatprep.mubr.msk.f32.mxu0 %vm9233_vm4, %v9234_v9 }
0x47e6   :  { %8306 = vmatprep.subr.bf16.mxu0 %v9231_v3 }
0x48b7   :  { %v4097_v57 = vpop.f32.mrb[30].mxu0 }
0x48b8   :  { %v4102_v58 = vrot.slane %v4097_v57, 6  ;;  %v4103_v59 = vrot.slane %v4097_v57, 7  ;;  %v7969_v60 = vpop.f32.mrb[31].mxu0 }
0x48ba   :  { %v4106_v61 = vadd.f32 %v4102_v58, %v9868_v43  ;;  %v4107_v0 = vadd.f32 %v4103_v59, %v9866_v40 }
0x48bc   :  { %8855 = vtanh.f32 %v4106_v61  ;;  %v7503_v42 = vmul.f32 -1.442695, %v4106_v61  ;;  %v7504_v35 = vmul.f32 -1.442695, %v4107_v0 }
0x48bd   :  { %8857 = vtanh.f32 %v4107_v0 }
0x48be   :  { %8859 = vpow2.f32 %v7503_v42 }
0x48bf   :  { %8861 = vpow2.f32 %v7504_v35 }
0x48c6   :  { %v8856_v1 = vpop.eup %8855 }
0x48c7   :  { %v8858_v2 = vpop.eup %8857  ;;  %4132 = vrot.lane.b32.xlu1 %v8856_v1, %s9242_s28 }
0x48c8   :  { %4134 = vrot.lane.b32.xlu0 %v8858_v2, %s9242_s28  ;;  %v8860_v24 = vpop.eup %8859 }
0x48c9   :  { %v8862_v7 = vpop.eup %8861  ;;  %v4114_v5 = vadd.f32 1.0, %v8860_v24 }
0x48ca   :  { %v4115_v4 = vadd.f32 1.0, %v8862_v7 }
0x48cb   :  { %8863 = vrcp.f32 %v4114_v5 }
0x48cc   :  { %8865 = vrcp.f32 %v4115_v4 }
0x48d5   :  { %v8864_v15 = vpop.eup %8863 }
0x48d6   :  { %v8866_v12 = vpop.eup %8865  ;;  %v4128_v20 = vmul.f32 %v8864_v15, %v4124_v17 }
0x48d7   :  { %v4129_v21 = vmul.f32 %v8866_v12, %v4125_v19 }
0x4939   :  { %v4133_v44 = vpop.permute.xlu1 %4132 }
0x493a   :  { %v4135_v13 = vpop.permute.xlu0 %4134  ;;  %v4138_v14 = vmul.f32 %v8864_v15, %v4133_v44 }
0x493b   :  { %v4139_v16 = vmul.f32 %v8866_v12, %v4135_v13 }
0x493c   :  { %4142 = vrot.lane.b32.xlu1 %v4138_v14, %s9241_s12 }
0x493d   :  { %4144 = vrot.lane.b32.xlu0 %v4139_v16, %s9241_s12 }
0x49ae   :  { %v4143_v22 = vpop.permute.xlu1 %4142 }
0x49af   :  { %v4145_v23 = vpop.permute.xlu0 %4144  ;;  %v4148_v25 = vadd.f32 %v4143_v22, %v4128_v20 }
0x49b0   :  { %v4149_v26 = vadd.f32 %v4145_v23, %v4129_v21 }
0x49b1   :  { %8867 = vtanh.f32 %v4148_v25  ;;  %v4264_v0 = vrot.slane %v4148_v25, 7 }
0x49b2   :  { %8869 = vtanh.f32 %v4149_v26  ;;  %v4265_v1 = vrot.slane %v4149_v26, 7 }
0x49bb   :  { %v8868_v27 = vpop.eup %8867 }
0x49bc   :  { %v8870_v29 = vpop.eup %8869  ;;  %4154 = vrot.lane.b32.xlu1 %v8868_v27, %s9243_s4 }
0x49bd   :  { %4156 = vrot.lane.b32.xlu0 %v8870_v29, %s9243_s4 }
0x4a2e   :  { %v4155_v30 = vpop.permute.xlu1 %4154 }
0x4a2f   :  { %v4157_v6 = vpop.permute.xlu0 %4156  ;;  %v4160_v31 = vmul.f32 %v8864_v15, %v4155_v30 }
0x4a30   :  { %v4161_v33 = vmul.f32 %v8866_v12, %v4157_v6 }
0x4a31   :  { %v4164_v41 = vrot.slane %v4160_v31, 2  ;;  %v4864_v36 = vsel %vm1220_vm8, %v4862_v32, %v4160_v31 }
0x4a32   :  { %v4165_v18 = vrot.slane %v4161_v33, 1  ;;  %v4865_v10 = vsel %vm1220_vm8, %v4863_v34, %v4161_v33 }
0x4a34   :  { %v4166_v51 = vsel %vm242_vm5, %v4165_v18, %v4164_v41 }
0x4a35   :  { %4167 = vrot.lane.b32.xlu1 %v4166_v51, %s9244_s5 }
0x4aa7   :  { %v4168_v37 = vpop.permute.xlu1 %4167 }
0x4aa8   :  { %7975 = vmatmul.mubr.msk.f32.vlgmr.msra.gmra.mrb[30].mxu1 %vm25_vm3, %v4168_v37 }
0x4aa9   :  { %8305 = vmatpush3.bf16.msra.mxu1 %v9835_v28  ;;  %7988 = vmatprep.mubr.msk.f32.mxu1 %vm9233_vm4, %v9234_v9 }
0x4aaa   :  { %8309 = vmatprep.subr.bf16.mxu1 %v9231_v3 }
0x4b7b   :  { %v4237_v11 = vpop.f32.mrb[30].mxu1 }
0x4b7c   :  { %v4242_v47 = vrot.slane %v4237_v11, 5  ;;  %v4243_v38 = vrot.slane %v4237_v11, 6  ;;  %v7976_v39 = vpop.f32.mrb[31].mxu1 }
0x4b7e   :  { %v4246_v8 = vadd.f32 %v4242_v47, %v9868_v43  ;;  %v4247_v45 = vadd.f32 %v4243_v38, %v9866_v40 }
0x4b80   :  { %8871 = vtanh.f32 %v4246_v8  ;;  %v7506_v49 = vmul.f32 -1.442695, %v4246_v8  ;;  %v7507_v50 = vmul.f32 -1.442695, %v4247_v45 }
0x4b81   :  { %8873 = vtanh.f32 %v4247_v45 }
0x4b82   :  { %8875 = vpow2.f32 %v7506_v49 }
0x4b83   :  { %8877 = vpow2.f32 %v7507_v50 }
0x4b8a   :  { %v8872_v46 = vpop.eup %8871 }
0x4b8b   :  { %v8874_v48 = vpop.eup %8873  ;;  %4272 = vrot.lane.b32.xlu0 %v8872_v46, %s9242_s28 }
0x4b8c   :  { %4274 = vrot.lane.b32.xlu1 %v8874_v48, %s9242_s28  ;;  %v8876_v52 = vpop.eup %8875 }
0x4b8d   :  { %v8878_v53 = vpop.eup %8877  ;;  %v4254_v54 = vadd.f32 1.0, %v8876_v52 }
0x4b8e   :  { %v4255_v55 = vadd.f32 1.0, %v8878_v53 }
0x4b8f   :  { %8879 = vrcp.f32 %v4254_v54 }
0x4b90   :  { %8881 = vrcp.f32 %v4255_v55 }
0x4b99   :  { %v8880_v56 = vpop.eup %8879 }
0x4b9a   :  { %v8882_v58 = vpop.eup %8881  ;;  %v4268_v2 = vmul.f32 %v8880_v56, %v4264_v0 }
0x4b9b   :  { %v4269_v42 = vmul.f32 %v8882_v58, %v4265_v1 }
0x4bfd   :  { %v4273_v57 = vpop.permute.xlu0 %4272 }
0x4bfe   :  { %v4275_v59 = vpop.permute.xlu1 %4274  ;;  %v4278_v60 = vmul.f32 %v8880_v56, %v4273_v57 }
0x4bff   :  { %v4279_v61 = vmul.f32 %v8882_v58, %v4275_v59 }
0x4c00   :  { %4282 = vrot.lane.b32.xlu0 %v4278_v60, %s9241_s12 }
0x4c01   :  { %4284 = vrot.lane.b32.xlu1 %v4279_v61, %s9241_s12 }
0x4c72   :  { %v4283_v35 = vpop.permute.xlu0 %4282 }
0x4c73   :  { %v4285_v24 = vpop.permute.xlu1 %4284  ;;  %v4288_v7 = vadd.f32 %v4283_v35, %v4268_v2 }
0x4c74   :  { %v4289_v5 = vadd.f32 %v4285_v24, %v4269_v42 }
0x4c75   :  { %8883 = vtanh.f32 %v4288_v7  ;;  %v4404_v39 = vrot.slane %v4288_v7, 7 }
0x4c76   :  { %8885 = vtanh.f32 %v4289_v5  ;;  %v4405_v8 = vrot.slane %v4289_v5, 7 }
0x4c7f   :  { %v8884_v4 = vpop.eup %8883 }
0x4c80   :  { %v8886_v15 = vpop.eup %8885  ;;  %4294 = vrot.lane.b32.xlu0 %v8884_v4, %s9243_s4 }
0x4c81   :  { %4296 = vrot.lane.b32.xlu1 %v8886_v15, %s9243_s4 }
0x4cf2   :  { %v4295_v44 = vpop.permute.xlu0 %4294 }
0x4cf3   :  { %v4297_v12 = vpop.permute.xlu1 %4296  ;;  %v4300_v13 = vmul.f32 %v8880_v56, %v4295_v44 }
0x4cf4   :  { %v4301_v14 = vmul.f32 %v8882_v58, %v4297_v12 }
0x4cf5   :  { %v4304_v16 = vrot.slane %v4300_v13, 3  ;;  %v4866_v17 = vsel %vm1223_vm9, %v4864_v36, %v4300_v13 }
0x4cf6   :  { %v4305_v19 = vrot.slane %v4301_v14, 2  ;;  %v4867_v20 = vsel %vm1223_vm9, %v4865_v10, %v4301_v14 }
0x4cf8   :  { %v4306_v21 = vsel %vm242_vm5, %v4305_v19, %v4304_v16 }
0x4cf9   :  { %4307 = vrot.lane.b32.xlu0 %v4306_v21, %s9244_s5 }
0x4d6b   :  { %v4308_v22 = vpop.permute.xlu0 %4307 }
0x4d6c   :  { %7982 = vmatmul.mubr.msk.f32.vlgmr.msra.gmra.mrb[32].mxu0 %vm25_vm3, %v4308_v22 }
0x4d6d   :  { %8308 = vmatpush3.bf16.msra.mxu0 %v9835_v28  ;;  %7995 = vmatprep.mubr.msk.f32.mxu0 %vm9233_vm4, %v9234_v9 }
0x4e3f   :  { %v4377_v23 = vpop.f32.mrb[32].mxu0 }
0x4e40   :  { %v4382_v25 = vrot.slane %v4377_v23, 4  ;;  %v4383_v26 = vrot.slane %v4377_v23, 5  ;;  %v7983_v27 = vpop.f32.mrb[33].mxu0 }
0x4e42   :  { %v4386_v29 = vadd.f32 %v4382_v25, %v9868_v43  ;;  %v4387_v30 = vadd.f32 %v4383_v26, %v9866_v40 }
0x4e44   :  { %8887 = vtanh.f32 %v4386_v29  ;;  %v7509_v32 = vmul.f32 -1.442695, %v4386_v29  ;;  %v7510_v33 = vmul.f32 -1.442695, %v4387_v30 }
0x4e45   :  { %8889 = vtanh.f32 %v4387_v30 }
0x4e46   :  { %8891 = vpow2.f32 %v7509_v32 }
0x4e47   :  { %8893 = vpow2.f32 %v7510_v33 }
0x4e4e   :  { %v8888_v6 = vpop.eup %8887 }
0x4e4f   :  { %v8890_v31 = vpop.eup %8889  ;;  %4412 = vrot.lane.b32.xlu1 %v8888_v6, %s9242_s28 }
0x4e50   :  { %4414 = vrot.lane.b32.xlu0 %v8890_v31, %s9242_s28  ;;  %v8892_v34 = vpop.eup %8891 }
0x4e51   :  { %v8894_v41 = vpop.eup %8893  ;;  %v4394_v36 = vadd.f32 1.0, %v8892_v34 }
0x4e52   :  { %v4395_v18 = vadd.f32 1.0, %v8894_v41 }
0x4e53   :  { %8895 = vrcp.f32 %v4394_v36  ;;  %v4886_v36 = vld [vmem:[%s10433_s1 + $0x90] sm:$0xff] }
0x4e54   :  { %8897 = vrcp.f32 %v4395_v18  ;;  %8005 = vmatprep.subr.mxu0 %v4886_v36 }
0x4e5d   :  { %v8896_v10 = vpop.eup %8895 }
0x4e5e   :  { %v8898_v37 = vpop.eup %8897  ;;  %v4408_v45 = vmul.f32 %v8896_v10, %v4404_v39 }
0x4e5f   :  { %v4409_v46 = vmul.f32 %v8898_v37, %v4405_v8 }
0x4ec1   :  { %v4413_v51 = vpop.permute.xlu1 %4412 }
0x4ec2   :  { %v4415_v11 = vpop.permute.xlu0 %4414  ;;  %v4418_v47 = vmul.f32 %v8896_v10, %v4413_v51 }
0x4ec3   :  { %v4419_v38 = vmul.f32 %v8898_v37, %v4415_v11 }
0x4ec4   :  { %4422 = vrot.lane.b32.xlu1 %v4418_v47, %s9241_s12 }
0x4ec5   :  { %4424 = vrot.lane.b32.xlu0 %v4419_v38, %s9241_s12 }
0x4f36   :  { %v4423_v48 = vpop.permute.xlu1 %4422 }
0x4f37   :  { %v4425_v49 = vpop.permute.xlu0 %4424  ;;  %v4428_v50 = vadd.f32 %v4423_v48, %v4408_v45 }
0x4f38   :  { %v4429_v52 = vadd.f32 %v4425_v49, %v4409_v46 }
0x4f39   :  { %8899 = vtanh.f32 %v4428_v50  ;;  %v4544_v26 = vrot.slane %v4428_v50, 7 }
0x4f3a   :  { %8901 = vtanh.f32 %v4429_v52  ;;  %v4545_v27 = vrot.slane %v4429_v52, 7 }
0x4f43   :  { %v8900_v53 = vpop.eup %8899 }
0x4f44   :  { %v8902_v54 = vpop.eup %8901  ;;  %4434 = vrot.lane.b32.xlu1 %v8900_v53, %s9243_s4 }
0x4f45   :  { %4436 = vrot.lane.b32.xlu0 %v8902_v54, %s9243_s4 }
0x4fb6   :  { %v4435_v55 = vpop.permute.xlu1 %4434 }
0x4fb7   :  { %v4437_v56 = vpop.permute.xlu0 %4436  ;;  %v4440_v57 = vmul.f32 %v8896_v10, %v4435_v55 }
0x4fb8   :  { %v4441_v58 = vmul.f32 %v8898_v37, %v4437_v56 }
0x4fb9   :  { %v4444_v59 = vrot.slane %v4440_v57, 4  ;;  %v4868_v60 = vsel %vm111_vm0, %v4866_v17, %v4440_v57 }
0x4fba   :  { %v4445_v61 = vrot.slane %v4441_v58, 3  ;;  %v4869_v0 = vsel %vm111_vm0, %v4867_v20, %v4441_v58 }
0x4fbc   :  { %v4446_v1 = vsel %vm242_vm5, %v4445_v61, %v4444_v59 }
0x4fbd   :  { %4447 = vrot.lane.b32.xlu1 %v4446_v1, %s9244_s5 }
0x502f   :  { %v4448_v2 = vpop.permute.xlu1 %4447 }
0x5030   :  { %7989 = vmatmul.mubr.msk.f32.vlgmr.msra.gmra.mrb[32].mxu1 %vm25_vm3, %v4448_v2 }
0x5031   :  { %8311 = vmatpush3.bf16.msra.mxu1 %v9835_v28  ;;  %8002 = vmatprep.mubr.msk.f32.mxu1 %vm9233_vm4, %v9234_v9 }
0x5032   :  { %8312 = vmatprep.subr.bf16.mxu1 %v9231_v3 }
0x5103   :  { %v4517_v42 = vpop.f32.mrb[32].mxu1 }
0x5104   :  { %v4522_v35 = vrot.slane %v4517_v42, 3  ;;  %v4523_v24 = vrot.slane %v4517_v42, 4  ;;  %v7990_v7 = vpop.f32.mrb[33].mxu1 }
0x5106   :  { %v4526_v5 = vadd.f32 %v4522_v35, %v9868_v43  ;;  %v4527_v4 = vadd.f32 %v4523_v24, %v9866_v40 }
0x5108   :  { %8903 = vtanh.f32 %v4526_v5  ;;  %v7512_v28 = vmul.f32 -1.442695, %v4526_v5  ;;  %v7513_v12 = vmul.f32 -1.442695, %v4527_v4 }
0x5109   :  { %8905 = vtanh.f32 %v4527_v4 }
0x510a   :  { %8907 = vpow2.f32 %v7512_v28 }
0x510b   :  { %8909 = vpow2.f32 %v7513_v12 }
0x5112   :  { %v8904_v15 = vpop.eup %8903 }
0x5113   :  { %v8906_v44 = vpop.eup %8905  ;;  %4552 = vrot.lane.b32.xlu0 %v8904_v15, %s9242_s28 }
0x5114   :  { %4554 = vrot.lane.b32.xlu1 %v8906_v44, %s9242_s28  ;;  %v8908_v13 = vpop.eup %8907 }
0x5115   :  { %v8910_v14 = vpop.eup %8909  ;;  %v4534_v16 = vadd.f32 1.0, %v8908_v13 }
0x5116   :  { %v4535_v17 = vadd.f32 1.0, %v8910_v14 }
0x5117   :  { %8911 = vrcp.f32 %v4534_v16 }
0x5118   :  { %8913 = vrcp.f32 %v4535_v17  ;;  %v4887_v17 = vld [vmem:[%s10433_s1 + $0x98] sm:$0xff] }
0x5121   :  { %v8912_v19 = vpop.eup %8911 }
0x5122   :  { %v8914_v21 = vpop.eup %8913  ;;  %v4548_v29 = vmul.f32 %v8912_v19, %v4544_v26 }
0x5123   :  { %v4549_v30 = vmul.f32 %v8914_v21, %v4545_v27 }
0x5185   :  { %v4553_v20 = vpop.permute.xlu0 %4552 }
0x5186   :  { %v4555_v22 = vpop.permute.xlu1 %4554  ;;  %v4558_v23 = vmul.f32 %v8912_v19, %v4553_v20 }
0x5187   :  { %v4559_v25 = vmul.f32 %v8914_v21, %v4555_v22  ;;  %v4890_v22 = vld [vmem:[%s10433_s1 + $0xb0] sm:$0xff] }
0x5188   :  { %4562 = vrot.lane.b32.xlu0 %v4558_v23, %s9241_s12 }
0x5189   :  { %4564 = vrot.lane.b32.xlu1 %v4559_v25, %s9241_s12 }
0x51fa   :  { %v4563_v6 = vpop.permute.xlu0 %4562 }
0x51fb   :  { %v4565_v31 = vpop.permute.xlu1 %4564  ;;  %v4568_v32 = vadd.f32 %v4563_v6, %v4548_v29 }
0x51fc   :  { %v4569_v33 = vadd.f32 %v4565_v31, %v4549_v30 }
0x51fd   :  { %8915 = vtanh.f32 %v4568_v32  ;;  %v4684_v7 = vrot.slane %v4568_v32, 7 }
0x51fe   :  { %8917 = vtanh.f32 %v4569_v33  ;;  %v4685_v5 = vrot.slane %v4569_v33, 7 }
0x5207   :  { %v8916_v34 = vpop.eup %8915 }
0x5208   :  { %v8918_v41 = vpop.eup %8917  ;;  %4574 = vrot.lane.b32.xlu0 %v8916_v34, %s9243_s4 }
0x5209   :  { %4576 = vrot.lane.b32.xlu1 %v8918_v41, %s9243_s4 }
0x527a   :  { %v4575_v18 = vpop.permute.xlu0 %4574 }
0x527b   :  { %v4577_v10 = vpop.permute.xlu1 %4576  ;;  %v4580_v51 = vmul.f32 %v8912_v19, %v4575_v18  ;;  %v4888_v19 = vld [vmem:[%s10433_s1 + $0xa0] sm:$0xff]  ;;  %v7520_v18 = vld [vmem:[%s10433_s1 + $0xb8] ss:$0 sm:$0xff] }
0x527c   :  { %v4581_v37 = vmul.f32 %v8914_v21, %v4577_v10  ;;  %v10011_v20 = vpack.c.bf16 %v4888_v19, %v4887_v17  ;;  %v4889_v21 = vld [vmem:[%s10433_s1 + $0xa8] sm:$0xff] }
0x527d   :  { %v4584_v11 = vrot.slane %v4580_v51, 5  ;;  %v9972_v47 = vsel %vm1228_vm10, %v4868_v60, %v4580_v51  ;;  %v10021_v23 = vpack.c.bf16 %v4890_v22, %v4889_v21 }
0x527e   :  { %v4585_v38 = vrot.slane %v4581_v37, 4  ;;  %v9975_v39 = vsel %vm1228_vm10, %v4869_v0, %v4581_v37 }
0x5280   :  { %v4586_v8 = vsel %vm242_vm5, %v4585_v38, %v4584_v11 }
0x5281   :  { %4587 = vrot.lane.b32.xlu0 %v4586_v8, %s9244_s5 }
0x52f3   :  { %v4588_v45 = vpop.permute.xlu0 %4587 }
0x52f4   :  { %7996 = vmatmul.mubr.msk.f32.vlgmr.msra.gmra.mrb[34].mxu0 %vm25_vm3, %v4588_v45 }
0x52f5   :  { %8007 = vmatprep.mubr.msk.f32.mxu0 %vm1333_vm13, %v9664_v62  ;;  %8006 = vmatpush3.msra.mxu0 %v4886_v36 }
0x52f6   :  { %8318 = vmatprep.subr.bf16.mxu0 %v9231_v3 }
0x52f8   :  { %8008 = vmatmul.mubr.msk.f32.vlgmr.msra.gmra.mrb[36].mxu0 %vm1333_vm13, %v9666_v63 }
0x52f9   :  { %8029 = vmatprep.mubr.msk.f32.mxu0 %vm9233_vm4, %v9234_v9  ;;  %8320 = vmatpush3.bf16.msra.mxu0 %v10011_v20 }
0x52fa   :  { %8321 = vmatprep.subr.bf16.mxu0 %v9231_v3 }
0x52fd   :  { %8323 = vmatpush3.bf16.msra.mxu0 %v10021_v23 }
0x52fe   :  { %8330 = vmatprep.subr.bf16.mxu0 %v9231_v3 }
0x53c7   :  { %v4657_v46 = vpop.f32.mrb[34].mxu0 }
0x53c8   :  { %v4662_v48 = vrot.slane %v4657_v46, 2  ;;  %v4663_v49 = vrot.slane %v4657_v46, 3  ;;  %v7997_v50 = vpop.f32.mrb[35].mxu0 }
0x53ca   :  { %v4666_v52 = vadd.f32 %v4662_v48, %v9868_v43  ;;  %v4667_v53 = vadd.f32 %v4663_v49, %v9866_v40 }
0x53cb   :  { %v9989_v54 = vpop.f32.mrb[36].mxu0 }
0x53cc   :  { %8919 = vtanh.f32 %v4666_v52  ;;  %v9991_v62 = vpop.f32.mrb[37].mxu0  ;;  %v7515_v63 = vmul.f32 -1.442695, %v4666_v52  ;;  %v7516_v57 = vmul.f32 -1.442695, %v4667_v53  ;;  %v10058_v37 = vadd.f32 %v9989_v54, %v7520_v18 }
0x53cd   :  { %8921 = vtanh.f32 %v4667_v53  ;;  %v10055_v10 = vadd.f32 %v7520_v18, %v9991_v62 }
0x53ce   :  { %8923 = vpow2.f32 %v7515_v63 }
0x53cf   :  { %8925 = vpow2.f32 %v7516_v57 }
0x53d6   :  { %v8920_v55 = vpop.eup %8919 }
0x53d7   :  { %v8922_v56 = vpop.eup %8921  ;;  %4692 = vrot.lane.b32.xlu1 %v8920_v55, %s9242_s28 }
0x53d8   :  { %4694 = vrot.lane.b32.xlu0 %v8922_v56, %s9242_s28  ;;  %v8924_v58 = vpop.eup %8923 }
0x53d9   :  { %v8926_v59 = vpop.eup %8925  ;;  %v4674_v60 = vadd.f32 1.0, %v8924_v58 }
0x53da   :  { %v4675_v61 = vadd.f32 1.0, %v8926_v59 }
0x53db   :  { %8927 = vrcp.f32 %v4674_v60 }
0x53dc   :  { %8929 = vrcp.f32 %v4675_v61 }
0x53e5   :  { %v8928_v0 = vpop.eup %8927 }
0x53e6   :  { %v8930_v2 = vpop.eup %8929  ;;  %v4688_v4 = vmul.f32 %v8928_v0, %v4684_v7 }
0x53e7   :  { %v4689_v15 = vmul.f32 %v8930_v2, %v4685_v5 }
0x5449   :  { %v4693_v1 = vpop.permute.xlu1 %4692 }
0x544a   :  { %v4695_v42 = vpop.permute.xlu0 %4694  ;;  %v4698_v35 = vmul.f32 %v8928_v0, %v4693_v1 }
0x544b   :  { %v4699_v24 = vmul.f32 %v8930_v2, %v4695_v42 }
0x544c   :  { %4702 = vrot.lane.b32.xlu1 %v4698_v35, %s9241_s12 }
0x544d   :  { %4704 = vrot.lane.b32.xlu0 %v4699_v24, %s9241_s12 }
0x54be   :  { %v4703_v44 = vpop.permute.xlu1 %4702 }
0x54bf   :  { %v4705_v28 = vpop.permute.xlu0 %4704  ;;  %v9997_v12 = vadd.f32 %v4703_v44, %v4688_v4 }
0x54c0   :  { %v9999_v13 = vadd.f32 %v4705_v28, %v4689_v15 }
0x54c1   :  { %8931 = vtanh.f32 %v9997_v12 }
0x54c2   :  { %8933 = vtanh.f32 %v9999_v13 }
0x54cb   :  { %v8932_v14 = vpop.eup %8931 }
0x54cc   :  { %v8934_v16 = vpop.eup %8933  ;;  %4714 = vrot.lane.b32.xlu1 %v8932_v14, %s9243_s4 }
0x54cd   :  { %4716 = vrot.lane.b32.xlu0 %v8934_v16, %s9243_s4 }
0x553e   :  { %v4715_v25 = vpop.permute.xlu1 %4714 }
0x553f   :  { %v4717_v26 = vpop.permute.xlu0 %4716  ;;  %v4720_v27 = vmul.f32 %v8928_v0, %v4715_v25 }
0x5540   :  { %v4721_v29 = vmul.f32 %v8930_v2, %v4717_v26 }
0x5541   :  { %v4724_v30 = vrot.slane %v4720_v27, 6  ;;  %v10027_v6 = vsel %vm1231_vm11, %v9972_v47, %v4720_v27 }
0x5542   :  { %v4725_v31 = vrot.slane %v4721_v29, 5  ;;  %v10031_v32 = vsel %vm1231_vm11, %v9975_v39, %v4721_v29 }
0x5544   :  { %v4726_v33 = vsel %vm242_vm5, %v4725_v31, %v4724_v30 }
0x5545   :  { %4727 = vrot.lane.b32.xlu1 %v4726_v33, %s9244_s5 }
0x55b7   :  { %v4728_v34 = vpop.permute.xlu1 %4727 }
0x55b8   :  { %8003 = vmatmul.mubr.msk.f32.vlgmr.msra.gmra.mrb[34].mxu1 %vm25_vm3, %v4728_v34 }
0x55b9   :  { %8314 = vmatpush3.bf16.msra.mxu1 %v10011_v20  ;;  %8018 = vmatprep.mubr.msk.f32.mxu1 %vm9233_vm4, %v9234_v9 }
0x55ba   :  { %8315 = vmatprep.subr.bf16.mxu1 %v9231_v3 }
0x55bd   :  { %8317 = vmatpush3.bf16.msra.mxu1 %v10021_v23 }
0x55be   :  { %8324 = vmatprep.subr.bf16.mxu1 %v9231_v3 }
0x55c0   :  { %8019 = vmatmul.mubr.f32.vlgmr.msra.gmra.mrb[36].mxu1 %v9234_v9 }
0x55c1   :  { %8326 = vmatpush3.bf16.msra.mxu1 %v10011_v20  ;;  %8040 = vmatprep.mubr.msk.f32.mxu1 %vm9233_vm4, %v9234_v9 }
0x55c2   :  { %8327 = vmatprep.subr.bf16.mxu1 %v9231_v3 }
0x55c5   :  { %8329 = vmatpush3.bf16.msra.mxu1 %v10021_v23 }
0x55c6   :  { %8336 = vmatprep.subr.bf16.mxu1 %v9231_v3 }
0x568b   :  { %v10049_v41 = vpop.f32.mrb[34].mxu1 }
0x568c   :  { %v8004_v36 = vpop.f32.mrb[35].mxu1 }
0x5693   :  { %v5040_v51 = vpop.f32.mrb[36].mxu1 }
0x5694   :  { %v5045_v11 = vrot.slane %v5040_v51, 1  ;;  %v5048_v47 = vadd.f32 %v5040_v51, %v10055_v10  ;;  %v8020_v38 = vpop.f32.mrb[37].mxu1 }
0x5696   :  { %v5049_v39 = vadd.f32 %v5045_v11, %v10058_v37  ;;  %8935 = vtanh.f32 %v5048_v47  ;;  %v7523_v46 = vmul.f32 -1.442695, %v5048_v47 }
0x5698   :  { %8937 = vtanh.f32 %v5049_v39  ;;  %v7524_v48 = vmul.f32 -1.442695, %v5049_v39 }
0x5699   :  { %8939 = vpow2.f32 %v7523_v46 }
0x569a   :  { %8941 = vpow2.f32 %v7524_v48 }
0x56a0   :  { %v8936_v8 = vpop.eup %8935 }
0x56a1   :  { %5068 = vrot.lane.b32.xlu1 %v8936_v8, %s9245_s20 }
0x56a2   :  { %v8938_v45 = vpop.eup %8937 }
0x56a3   :  { %5070 = vrot.lane.b32.xlu0 %v8938_v45, %s9245_s20  ;;  %v8940_v49 = vpop.eup %8939 }
0x56a4   :  { %v8942_v50 = vpop.eup %8941  ;;  %v5056_v52 = vadd.f32 1.0, %v8940_v49 }
0x56a5   :  { %v5057_v53 = vadd.f32 1.0, %v8942_v50 }
0x56a6   :  { %8943 = vrcp.f32 %v5056_v52 }
0x56a7   :  { %8945 = vrcp.f32 %v5057_v53 }
0x56b0   :  { %v8944_v54 = vpop.eup %8943 }
0x56b1   :  { %v8946_v56 = vpop.eup %8945  ;;  %v5064_v58 = vmul.f32 0.0, %v8944_v54 }
0x56b2   :  { %v5065_v61 = vmul.f32 0.0, %v8946_v56 }
0x5713   :  { %v5069_v62 = vpop.permute.xlu1 %5068 }
0x5714   :  { %v5074_v55 = vmul.f32 %v8944_v54, %v5069_v62 }
0x5715   :  { %v5071_v63 = vpop.permute.xlu0 %5070 }
0x5716   :  { %5078 = vrot.lane.b32.xlu1 %v5074_v55, %s9243_s4  ;;  %v5075_v57 = vmul.f32 %v8946_v56, %v5071_v63 }
0x5718   :  { %5080 = vrot.lane.b32.xlu0 %v5075_v57, %s9243_s4 }
0x5788   :  { %v5079_v59 = vpop.permute.xlu1 %5078 }
0x5789   :  { %v5084_v60 = vadd.f32 %v5079_v59, %v5064_v58 }
0x578a   :  { %v5081_v0 = vpop.permute.xlu0 %5080 }
0x578b   :  { %8947 = vtanh.f32 %v5084_v60  ;;  %v5085_v1 = vadd.f32 %v5081_v0, %v5065_v61  ;;  %v5198_v39 = vrot.slane %v5084_v60, 7 }
0x578d   :  { %8949 = vtanh.f32 %v5085_v1  ;;  %v5199_v47 = vrot.slane %v5085_v1, 7 }
0x5795   :  { %v8948_v2 = vpop.eup %8947 }
0x5796   :  { %5090 = vrot.lane.b32.xlu1 %v8948_v2, %s9245_s20 }
0x5797   :  { %v8950_v42 = vpop.eup %8949 }
0x5798   :  { %5092 = vrot.lane.b32.xlu0 %v8950_v42, %s9245_s20 }
0x5808   :  { %v5091_v35 = vpop.permute.xlu1 %5090 }
0x5809   :  { %v10070_v5 = vmul.f32 %v8944_v54, %v5091_v35 }
0x580a   :  { %v5093_v24 = vpop.permute.xlu0 %5092 }
0x580b   :  { %v10068_v7 = vmul.f32 %v8946_v56, %v5093_v24 }
0x580d   :  { %v5100_v4 = vrot.slane %v10068_v7, 7 }
0x580f   :  { %v5101_v15 = vsel %vm242_vm5, %v5100_v4, %v10070_v5 }
0x5810   :  { %5102 = vrot.lane.b32.xlu0 %v5101_v15, %s9243_s4 }
0x5882   :  { %v5103_v44 = vpop.permute.xlu0 %5102 }
0x5883   :  { %8030 = vmatmul.mubr.msk.f32.vlgmr.msra.gmra.mrb[38].mxu0 %vm4971_vm14, %v5103_v44 }
0x5884   :  { %8332 = vmatpush3.bf16.msra.mxu0 %v10011_v20  ;;  %8051 = vmatprep.mubr.msk.f32.mxu0 %vm9233_vm4, %v9234_v9 }
0x5885   :  { %8333 = vmatprep.subr.bf16.mxu0 %v9231_v3 }
0x5888   :  { %8335 = vmatpush3.bf16.msra.mxu0 %v10021_v23 }
0x5889   :  { %8342 = vmatprep.subr.bf16.mxu0 %v9231_v3 }
0x5956   :  { %v5172_v28 = vpop.f32.mrb[38].mxu0 }
0x5957   :  { %v5177_v14 = vrot.slane %v5172_v28, 7  ;;  %v5181_v16 = vadd.f32 %v5172_v28, %v10058_v37  ;;  %v8031_v17 = vpop.f32.mrb[39].mxu0 }
0x5959   :  { %v5180_v19 = vadd.f32 %v5177_v14, %v10055_v10  ;;  %8951 = vtanh.f32 %v5181_v16  ;;  %v7527_v25 = vmul.f32 -1.442695, %v5181_v16 }
0x595b   :  { %8953 = vtanh.f32 %v5180_v19  ;;  %v7526_v26 = vmul.f32 -1.442695, %v5180_v19 }
0x595c   :  { %8955 = vpow2.f32 %v7527_v25 }
0x595d   :  { %8957 = vpow2.f32 %v7526_v26 }
0x5963   :  { %v8952_v21 = vpop.eup %8951 }
0x5964   :  { %5208 = vrot.lane.b32.xlu0 %v8952_v21, %s9245_s20 }
0x5965   :  { %v8954_v22 = vpop.eup %8953 }
0x5966   :  { %5206 = vrot.lane.b32.xlu1 %v8954_v22, %s9245_s20  ;;  %v8956_v27 = vpop.eup %8955 }
0x5967   :  { %v8958_v29 = vpop.eup %8957  ;;  %v5189_v30 = vadd.f32 1.0, %v8956_v27 }
0x5968   :  { %v5188_v31 = vadd.f32 1.0, %v8958_v29 }
0x5969   :  { %8959 = vrcp.f32 %v5189_v30 }
0x596a   :  { %8961 = vrcp.f32 %v5188_v31 }
0x5973   :  { %v8960_v33 = vpop.eup %8959 }
0x5974   :  { %v8962_v18 = vpop.eup %8961  ;;  %v5203_v38 = vmul.f32 %v8960_v33, %v5199_v47 }
0x5975   :  { %v5202_v46 = vmul.f32 %v8962_v18, %v5198_v39 }
0x59d6   :  { %v5209_v34 = vpop.permute.xlu0 %5208 }
0x59d7   :  { %v5213_v36 = vmul.f32 %v8960_v33, %v5209_v34 }
0x59d8   :  { %v5207_v51 = vpop.permute.xlu1 %5206 }
0x59d9   :  { %5218 = vrot.lane.b32.xlu0 %v5213_v36, %s9243_s4  ;;  %v5212_v11 = vmul.f32 %v8962_v18, %v5207_v51 }
0x59db   :  { %5216 = vrot.lane.b32.xlu1 %v5212_v11, %s9243_s4 }
0x5a4b   :  { %v5219_v8 = vpop.permute.xlu0 %5218 }
0x5a4c   :  { %v5223_v45 = vadd.f32 %v5219_v8, %v5203_v38 }
0x5a4d   :  { %v5217_v48 = vpop.permute.xlu1 %5216 }
0x5a4e   :  { %8963 = vtanh.f32 %v5223_v45  ;;  %v5222_v49 = vadd.f32 %v5217_v48, %v5202_v46  ;;  %v5338_v26 = vrot.slane %v5223_v45, 7 }
0x5a50   :  { %8965 = vtanh.f32 %v5222_v49  ;;  %v5337_v25 = vrot.slane %v5222_v49, 7 }
0x5a58   :  { %v8964_v50 = vpop.eup %8963 }
0x5a59   :  { %5230 = vrot.lane.b32.xlu0 %v8964_v50, %s9245_s20 }
0x5a5a   :  { %v8966_v52 = vpop.eup %8965 }
0x5a5b   :  { %5228 = vrot.lane.b32.xlu1 %v8966_v52, %s9245_s20 }
0x5acb   :  { %v5231_v53 = vpop.permute.xlu0 %5230 }
0x5acc   :  { %v5235_v55 = vmul.f32 %v8960_v33, %v5231_v53 }
0x5acd   :  { %v5229_v54 = vpop.permute.xlu1 %5228 }
0x5ace   :  { %v5234_v62 = vmul.f32 %v8962_v18, %v5229_v54  ;;  %v6076_v8 = vsel %vm1217_vm7, %v10068_v7, %v5235_v55 }
0x5ad0   :  { %v5238_v56 = vrot.slane %v5234_v62, 1  ;;  %v6075_v38 = vsel %vm1217_vm7, %v10070_v5, %v5234_v62 }
0x5ad2   :  { %v5239_v63 = vsel %vm242_vm5, %v5235_v55, %v5238_v56 }
0x5ad3   :  { %5240 = vrot.lane.b32.xlu1 %v5239_v63, %s9243_s4 }
0x5b45   :  { %v5241_v57 = vpop.permute.xlu1 %5240 }
0x5b46   :  { %8041 = vmatmul.mubr.msk.f32.vlgmr.msra.gmra.mrb[38].mxu1 %vm4971_vm14, %v5241_v57 }
0x5b47   :  { %8338 = vmatpush3.bf16.msra.mxu1 %v10011_v20  ;;  %8062 = vmatprep.mubr.msk.f32.mxu1 %vm9233_vm4, %v9234_v9 }
0x5b48   :  { %8339 = vmatprep.subr.bf16.mxu1 %v9231_v3 }
0x5b4b   :  { %8341 = vmatpush3.bf16.msra.mxu1 %v10021_v23 }
0x5b4c   :  { %8348 = vmatprep.subr.bf16.mxu1 %v9231_v3 }
0x5c19   :  { %v5310_v58 = vpop.f32.mrb[38].mxu1 }
0x5c1a   :  { %v5315_v59 = vrot.slane %v5310_v58, 6  ;;  %v5316_v60 = vrot.slane %v5310_v58, 7  ;;  %v8042_v61 = vpop.f32.mrb[39].mxu1 }
0x5c1c   :  { %v5319_v0 = vadd.f32 %v5315_v59, %v10055_v10  ;;  %v5320_v1 = vadd.f32 %v5316_v60, %v10058_v37 }
0x5c1e   :  { %8967 = vtanh.f32 %v5319_v0  ;;  %v7529_v35 = vmul.f32 -1.442695, %v5319_v0  ;;  %v7530_v24 = vmul.f32 -1.442695, %v5320_v1 }
0x5c1f   :  { %8969 = vtanh.f32 %v5320_v1 }
0x5c20   :  { %8971 = vpow2.f32 %v7529_v35 }
0x5c21   :  { %8973 = vpow2.f32 %v7530_v24 }
0x5c28   :  { %v8968_v2 = vpop.eup %8967 }
0x5c29   :  { %v8970_v42 = vpop.eup %8969  ;;  %5345 = vrot.lane.b32.xlu0 %v8968_v2, %s9245_s20 }
0x5c2a   :  { %5347 = vrot.lane.b32.xlu1 %v8970_v42, %s9245_s20  ;;  %v8972_v4 = vpop.eup %8971 }
0x5c2b   :  { %v8974_v15 = vpop.eup %8973  ;;  %v5327_v44 = vadd.f32 1.0, %v8972_v4 }
0x5c2c   :  { %v5328_v28 = vadd.f32 1.0, %v8974_v15 }
0x5c2d   :  { %8975 = vrcp.f32 %v5327_v44 }
0x5c2e   :  { %8977 = vrcp.f32 %v5328_v28 }
0x5c37   :  { %v8976_v14 = vpop.eup %8975 }
0x5c38   :  { %v8978_v17 = vpop.eup %8977  ;;  %v5341_v27 = vmul.f32 %v8976_v14, %v5337_v25 }
0x5c39   :  { %v5342_v29 = vmul.f32 %v8978_v17, %v5338_v26 }
0x5c9b   :  { %v5346_v16 = vpop.permute.xlu0 %5345 }
0x5c9c   :  { %v5348_v19 = vpop.permute.xlu1 %5347  ;;  %v5351_v21 = vmul.f32 %v8976_v14, %v5346_v16 }
0x5c9d   :  { %v5352_v22 = vmul.f32 %v8978_v17, %v5348_v19 }
0x5c9e   :  { %5355 = vrot.lane.b32.xlu0 %v5351_v21, %s9243_s4 }
0x5c9f   :  { %5357 = vrot.lane.b32.xlu1 %v5352_v22, %s9243_s4 }
0x5d10   :  { %v5356_v30 = vpop.permute.xlu0 %5355 }
0x5d11   :  { %v5358_v31 = vpop.permute.xlu1 %5357  ;;  %v5361_v33 = vadd.f32 %v5356_v30, %v5341_v27 }
0x5d12   :  { %v5362_v34 = vadd.f32 %v5358_v31, %v5342_v29 }
0x5d13   :  { %8979 = vtanh.f32 %v5361_v33  ;;  %v5477_v15 = vrot.slane %v5361_v33, 7 }
0x5d14   :  { %8981 = vtanh.f32 %v5362_v34  ;;  %v5478_v44 = vrot.slane %v5362_v34, 7 }
0x5d1d   :  { %v8980_v36 = vpop.eup %8979 }
0x5d1e   :  { %v8982_v18 = vpop.eup %8981  ;;  %5367 = vrot.lane.b32.xlu0 %v8980_v36, %s9245_s20 }
0x5d1f   :  { %5369 = vrot.lane.b32.xlu1 %v8982_v18, %s9245_s20 }
0x5d90   :  { %v5368_v51 = vpop.permute.xlu0 %5367 }
0x5d91   :  { %v5370_v11 = vpop.permute.xlu1 %5369  ;;  %v5373_v47 = vmul.f32 %v8976_v14, %v5368_v51 }
0x5d92   :  { %v5374_v39 = vmul.f32 %v8978_v17, %v5370_v11 }
0x5d93   :  { %v5377_v45 = vrot.slane %v5373_v47, 2  ;;  %v6077_v46 = vsel %vm1220_vm8, %v6075_v38, %v5373_v47 }
0x5d94   :  { %v5378_v48 = vrot.slane %v5374_v39, 1  ;;  %v6078_v49 = vsel %vm1220_vm8, %v6076_v8, %v5374_v39 }
0x5d96   :  { %v5379_v50 = vsel %vm242_vm5, %v5378_v48, %v5377_v45 }
0x5d97   :  { %5380 = vrot.lane.b32.xlu0 %v5379_v50, %s9243_s4 }
0x5e09   :  { %v5381_v52 = vpop.permute.xlu0 %5380 }
0x5e0a   :  { %8052 = vmatmul.mubr.msk.f32.vlgmr.msra.gmra.mrb[40].mxu0 %vm4971_vm14, %v5381_v52 }
0x5e0b   :  { %8344 = vmatpush3.bf16.msra.mxu0 %v10011_v20  ;;  %8073 = vmatprep.mubr.msk.f32.mxu0 %vm9233_vm4, %v9234_v9 }
0x5e0c   :  { %8345 = vmatprep.subr.bf16.mxu0 %v9231_v3 }
0x5e0f   :  { %8347 = vmatpush3.bf16.msra.mxu0 %v10021_v23 }
0x5e10   :  { %8354 = vmatprep.subr.bf16.mxu0 %v9231_v3 }
0x5edd   :  { %v5450_v7 = vpop.f32.mrb[40].mxu0 }
0x5ede   :  { %v5455_v5 = vrot.slane %v5450_v7, 5  ;;  %v5456_v53 = vrot.slane %v5450_v7, 6  ;;  %v8053_v54 = vpop.f32.mrb[41].mxu0 }
0x5ee0   :  { %v5459_v62 = vadd.f32 %v5455_v5, %v10055_v10  ;;  %v5460_v55 = vadd.f32 %v5456_v53, %v10058_v37 }
0x5ee2   :  { %8983 = vtanh.f32 %v5459_v62  ;;  %v7532_v57 = vmul.f32 -1.442695, %v5459_v62  ;;  %v7533_v58 = vmul.f32 -1.442695, %v5460_v55 }
0x5ee3   :  { %8985 = vtanh.f32 %v5460_v55 }
0x5ee4   :  { %8987 = vpow2.f32 %v7532_v57 }
0x5ee5   :  { %8989 = vpow2.f32 %v7533_v58 }
0x5eec   :  { %v8984_v56 = vpop.eup %8983 }
0x5eed   :  { %v8986_v63 = vpop.eup %8985  ;;  %5485 = vrot.lane.b32.xlu1 %v8984_v56, %s9245_s20 }
0x5eee   :  { %5487 = vrot.lane.b32.xlu0 %v8986_v63, %s9245_s20  ;;  %v8988_v59 = vpop.eup %8987 }
0x5eef   :  { %v8990_v60 = vpop.eup %8989  ;;  %v5467_v61 = vadd.f32 1.0, %v8988_v59 }
0x5ef0   :  { %v5468_v0 = vadd.f32 1.0, %v8990_v60 }
0x5ef1   :  { %8991 = vrcp.f32 %v5467_v61 }
0x5ef2   :  { %8993 = vrcp.f32 %v5468_v0 }
0x5efb   :  { %v8992_v1 = vpop.eup %8991 }
0x5efc   :  { %v8994_v42 = vpop.eup %8993  ;;  %v5481_v28 = vmul.f32 %v8992_v1, %v5477_v15 }
0x5efd   :  { %v5482_v14 = vmul.f32 %v8994_v42, %v5478_v44 }
0x5f5f   :  { %v5486_v2 = vpop.permute.xlu1 %5485 }
0x5f60   :  { %v5488_v35 = vpop.permute.xlu0 %5487  ;;  %v5491_v24 = vmul.f32 %v8992_v1, %v5486_v2 }
0x5f61   :  { %v5492_v4 = vmul.f32 %v8994_v42, %v5488_v35 }
0x5f62   :  { %5495 = vrot.lane.b32.xlu1 %v5491_v24, %s9243_s4 }
0x5f63   :  { %5497 = vrot.lane.b32.xlu0 %v5492_v4, %s9243_s4 }
0x5fd4   :  { %v5496_v16 = vpop.permute.xlu1 %5495 }
0x5fd5   :  { %v5498_v17 = vpop.permute.xlu0 %5497  ;;  %v5501_v19 = vadd.f32 %v5496_v16, %v5481_v28 }
0x5fd6   :  { %v5502_v21 = vadd.f32 %v5498_v17, %v5482_v14 }
0x5fd7   :  { %8995 = vtanh.f32 %v5501_v19  ;;  %v5617_v58 = vrot.slane %v5501_v19, 7 }
0x5fd8   :  { %8997 = vtanh.f32 %v5502_v21  ;;  %v5618_v59 = vrot.slane %v5502_v21, 7 }
0x5fe1   :  { %v8996_v22 = vpop.eup %8995 }
0x5fe2   :  { %v8998_v25 = vpop.eup %8997  ;;  %5507 = vrot.lane.b32.xlu1 %v8996_v22, %s9245_s20 }
0x5fe3   :  { %5509 = vrot.lane.b32.xlu0 %v8998_v25, %s9245_s20 }
0x6054   :  { %v5508_v26 = vpop.permute.xlu1 %5507 }
0x6055   :  { %v5510_v27 = vpop.permute.xlu0 %5509  ;;  %v5513_v29 = vmul.f32 %v8992_v1, %v5508_v26 }
0x6056   :  { %v5514_v30 = vmul.f32 %v8994_v42, %v5510_v27 }
0x6057   :  { %v5517_v31 = vrot.slane %v5513_v29, 3  ;;  %v6079_v33 = vsel %vm1223_vm9, %v6077_v46, %v5513_v29 }
0x6058   :  { %v5518_v34 = vrot.slane %v5514_v30, 2  ;;  %v6080_v36 = vsel %vm1223_vm9, %v6078_v49, %v5514_v30 }
0x605a   :  { %v5519_v18 = vsel %vm242_vm5, %v5518_v34, %v5517_v31 }
0x605b   :  { %5520 = vrot.lane.b32.xlu1 %v5519_v18, %s9243_s4 }
0x60cd   :  { %v5521_v51 = vpop.permute.xlu1 %5520 }
0x60ce   :  { %8063 = vmatmul.mubr.msk.f32.vlgmr.msra.gmra.mrb[40].mxu1 %vm4971_vm14, %v5521_v51 }
0x60cf   :  { %8350 = vmatpush3.bf16.msra.mxu1 %v10011_v20  ;;  %8084 = vmatprep.mubr.msk.f32.mxu1 %vm9233_vm4, %v9234_v9 }
0x60d0   :  { %8351 = vmatprep.subr.bf16.mxu1 %v9231_v3 }
0x60d3   :  { %8353 = vmatpush3.bf16.msra.mxu1 %v10021_v23 }
0x61a1   :  { %v5590_v11 = vpop.f32.mrb[40].mxu1 }
0x61a2   :  { %v5595_v47 = vrot.slane %v5590_v11, 4  ;;  %v5596_v38 = vrot.slane %v5590_v11, 5  ;;  %v8064_v39 = vpop.f32.mrb[41].mxu1 }
0x61a4   :  { %v5599_v8 = vadd.f32 %v5595_v47, %v10055_v10  ;;  %v5600_v45 = vadd.f32 %v5596_v38, %v10058_v37 }
0x61a6   :  { %8999 = vtanh.f32 %v5599_v8  ;;  %v7535_v49 = vmul.f32 -1.442695, %v5599_v8  ;;  %v7536_v50 = vmul.f32 -1.442695, %v5600_v45 }
0x61a7   :  { %9001 = vtanh.f32 %v5600_v45 }
0x61a8   :  { %9003 = vpow2.f32 %v7535_v49 }
0x61a9   :  { %9005 = vpow2.f32 %v7536_v50 }
0x61b0   :  { %v9000_v46 = vpop.eup %8999 }
0x61b1   :  { %v9002_v48 = vpop.eup %9001  ;;  %5625 = vrot.lane.b32.xlu0 %v9000_v46, %s9245_s20 }
0x61b2   :  { %5627 = vrot.lane.b32.xlu1 %v9002_v48, %s9245_s20  ;;  %v9004_v52 = vpop.eup %9003 }
0x61b3   :  { %v9006_v7 = vpop.eup %9005  ;;  %v5607_v5 = vadd.f32 1.0, %v9004_v52 }
0x61b4   :  { %v5608_v53 = vadd.f32 1.0, %v9006_v7 }
0x61b5   :  { %9007 = vrcp.f32 %v5607_v5 }
0x61b6   :  { %9009 = vrcp.f32 %v5608_v53 }
0x61bf   :  { %v9008_v54 = vpop.eup %9007 }
0x61c0   :  { %v9010_v55 = vpop.eup %9009  ;;  %v5621_v60 = vmul.f32 %v9008_v54, %v5617_v58 }
0x61c1   :  { %v5622_v61 = vmul.f32 %v9010_v55, %v5618_v59 }
0x6223   :  { %v5626_v62 = vpop.permute.xlu0 %5625 }
0x6224   :  { %v5628_v56 = vpop.permute.xlu1 %5627  ;;  %v5631_v63 = vmul.f32 %v9008_v54, %v5626_v62 }
0x6225   :  { %v5632_v57 = vmul.f32 %v9010_v55, %v5628_v56 }
0x6226   :  { %5635 = vrot.lane.b32.xlu0 %v5631_v63, %s9243_s4 }
0x6227   :  { %5637 = vrot.lane.b32.xlu1 %v5632_v57, %s9243_s4 }
0x6298   :  { %v5636_v0 = vpop.permute.xlu0 %5635 }
0x6299   :  { %v5638_v1 = vpop.permute.xlu1 %5637  ;;  %v5641_v2 = vadd.f32 %v5636_v0, %v5621_v60 }
0x629a   :  { %v5642_v42 = vadd.f32 %v5638_v1, %v5622_v61 }
0x629b   :  { %9011 = vtanh.f32 %v5641_v2  ;;  %v5757_v48 = vrot.slane %v5641_v2, 7 }
0x629c   :  { %9013 = vtanh.f32 %v5642_v42  ;;  %v5758_v49 = vrot.slane %v5642_v42, 7 }
0x62a5   :  { %v9012_v35 = vpop.eup %9011 }
0x62a6   :  { %v9014_v24 = vpop.eup %9013  ;;  %5647 = vrot.lane.b32.xlu0 %v9012_v35, %s9245_s20 }
0x62a7   :  { %5649 = vrot.lane.b32.xlu1 %v9014_v24, %s9245_s20 }
0x6318   :  { %v5648_v4 = vpop.permute.xlu0 %5647 }
0x6319   :  { %v5650_v15 = vpop.permute.xlu1 %5649  ;;  %v5653_v44 = vmul.f32 %v9008_v54, %v5648_v4 }
0x631a   :  { %v5654_v28 = vmul.f32 %v9010_v55, %v5650_v15 }
0x631b   :  { %v5657_v14 = vrot.slane %v5653_v44, 4  ;;  %v6081_v16 = vsel %vm111_vm0, %v6079_v33, %v5653_v44 }
0x631c   :  { %v5658_v17 = vrot.slane %v5654_v28, 3  ;;  %v6082_v19 = vsel %vm111_vm0, %v6080_v36, %v5654_v28 }
0x631e   :  { %v5659_v21 = vsel %vm242_vm5, %v5658_v17, %v5657_v14 }
0x631f   :  { %5660 = vrot.lane.b32.xlu0 %v5659_v21, %s9243_s4 }
0x6391   :  { %v5661_v22 = vpop.permute.xlu0 %5660 }
0x6392   :  { %8074 = vmatmul.mubr.msk.f32.vlgmr.msra.gmra.mrb[42].mxu0 %vm4971_vm14, %v5661_v22 }
0x6393   :  { %8356 = vmatpush3.bf16.msra.mxu0 %v10011_v20  ;;  %8095 = vmatprep.mubr.msk.f32.mxu0 %vm9233_vm4, %v9234_v9 }
0x6394   :  { %8357 = vmatprep.subr.bf16.mxu0 %v9231_v3 }
0x6397   :  { %8359 = vmatpush3.bf16.msra.mxu0 %v10021_v23 }
0x6398   :  { %8368 = vmatprep.subr.bf16.mxu0 %v9231_v3 }
0x6465   :  { %v5730_v25 = vpop.f32.mrb[42].mxu0 }
0x6466   :  { %v5735_v26 = vrot.slane %v5730_v25, 3  ;;  %v5736_v27 = vrot.slane %v5730_v25, 4  ;;  %v8075_v29 = vpop.f32.mrb[43].mxu0 }
0x6468   :  { %v5739_v30 = vadd.f32 %v5735_v26, %v10055_v10  ;;  %v5740_v31 = vadd.f32 %v5736_v27, %v10058_v37 }
0x646a   :  { %9015 = vtanh.f32 %v5739_v30  ;;  %v7538_v34 = vmul.f32 -1.442695, %v5739_v30  ;;  %v7539_v23 = vmul.f32 -1.442695, %v5740_v31 }
0x646b   :  { %9017 = vtanh.f32 %v5740_v31 }
0x646c   :  { %9019 = vpow2.f32 %v7538_v34 }
0x646d   :  { %9021 = vpow2.f32 %v7539_v23 }
0x6474   :  { %v9016_v20 = vpop.eup %9015 }
0x6475   :  { %v9018_v33 = vpop.eup %9017  ;;  %5765 = vrot.lane.b32.xlu1 %v9016_v20, %s9245_s20 }
0x6476   :  { %5767 = vrot.lane.b32.xlu0 %v9018_v33, %s9245_s20  ;;  %v9020_v36 = vpop.eup %9019 }
0x6477   :  { %v9022_v18 = vpop.eup %9021  ;;  %v5747_v51 = vadd.f32 1.0, %v9020_v36 }
0x6478   :  { %v5748_v11 = vadd.f32 1.0, %v9022_v18 }
0x6479   :  { %9023 = vrcp.f32 %v5747_v51 }
0x647a   :  { %9025 = vrcp.f32 %v5748_v11 }
0x6483   :  { %v9024_v47 = vpop.eup %9023 }
0x6484   :  { %v9026_v39 = vpop.eup %9025  ;;  %v5761_v50 = vmul.f32 %v9024_v47, %v5757_v48 }
0x6485   :  { %v5762_v52 = vmul.f32 %v9026_v39, %v5758_v49 }
0x64e7   :  { %v5766_v38 = vpop.permute.xlu1 %5765 }
0x64e8   :  { %v5768_v8 = vpop.permute.xlu0 %5767  ;;  %v5771_v45 = vmul.f32 %v9024_v47, %v5766_v38 }
0x64e9   :  { %v5772_v46 = vmul.f32 %v9026_v39, %v5768_v8 }
0x64ea   :  { %5775 = vrot.lane.b32.xlu1 %v5771_v45, %s9243_s4 }
0x64eb   :  { %5777 = vrot.lane.b32.xlu0 %v5772_v46, %s9243_s4 }
0x655c   :  { %v5776_v7 = vpop.permute.xlu1 %5775 }
0x655d   :  { %v5778_v5 = vpop.permute.xlu0 %5777  ;;  %v5781_v53 = vadd.f32 %v5776_v7, %v5761_v50 }
0x655e   :  { %v5782_v54 = vadd.f32 %v5778_v5, %v5762_v52 }
0x655f   :  { %9027 = vtanh.f32 %v5781_v53  ;;  %v5897_v33 = vrot.slane %v5781_v53, 7 }
0x6560   :  { %9029 = vtanh.f32 %v5782_v54  ;;  %v5898_v34 = vrot.slane %v5782_v54, 7 }
0x6569   :  { %v9028_v62 = vpop.eup %9027 }
0x656a   :  { %v9030_v55 = vpop.eup %9029  ;;  %5787 = vrot.lane.b32.xlu1 %v9028_v62, %s9245_s20 }
0x656b   :  { %5789 = vrot.lane.b32.xlu0 %v9030_v55, %s9245_s20 }
0x65dc   :  { %v5788_v56 = vpop.permute.xlu1 %5787 }
0x65dd   :  { %v5790_v63 = vpop.permute.xlu0 %5789  ;;  %v5793_v57 = vmul.f32 %v9024_v47, %v5788_v56 }
0x65de   :  { %v5794_v58 = vmul.f32 %v9026_v39, %v5790_v63 }
0x65df   :  { %v5797_v59 = vrot.slane %v5793_v57, 5  ;;  %v6083_v60 = vsel %vm1228_vm10, %v6081_v16, %v5793_v57 }
0x65e0   :  { %v5798_v61 = vrot.slane %v5794_v58, 4  ;;  %v6084_v0 = vsel %vm1228_vm10, %v6082_v19, %v5794_v58 }
0x65e2   :  { %v5799_v1 = vsel %vm242_vm5, %v5798_v61, %v5797_v59 }
0x65e3   :  { %5800 = vrot.lane.b32.xlu1 %v5799_v1, %s9243_s4 }
0x6655   :  { %v5801_v2 = vpop.permute.xlu1 %5800 }
0x6656   :  { %8085 = vmatmul.mubr.msk.f32.vlgmr.msra.gmra.mrb[42].mxu1 %vm4971_vm14, %v5801_v2 }
0x6729   :  { %v5870_v42 = vpop.f32.mrb[42].mxu1 }
0x672a   :  { %v5875_v35 = vrot.slane %v5870_v42, 2  ;;  %v5876_v24 = vrot.slane %v5870_v42, 3  ;;  %v8086_v4 = vpop.f32.mrb[43].mxu1 }
0x672c   :  { %v5879_v15 = vadd.f32 %v5875_v35, %v10055_v10  ;;  %v5880_v44 = vadd.f32 %v5876_v24, %v10058_v37 }
0x672e   :  { %9031 = vtanh.f32 %v5879_v15  ;;  %v7541_v16 = vmul.f32 -1.442695, %v5879_v15  ;;  %v7542_v17 = vmul.f32 -1.442695, %v5880_v44 }
0x672f   :  { %9033 = vtanh.f32 %v5880_v44 }
0x6730   :  { %9035 = vpow2.f32 %v7541_v16 }
0x6731   :  { %9037 = vpow2.f32 %v7542_v17 }
0x6738   :  { %v9032_v28 = vpop.eup %9031 }
0x6739   :  { %v9034_v14 = vpop.eup %9033  ;;  %5905 = vrot.lane.b32.xlu0 %v9032_v28, %s9245_s20 }
0x673a   :  { %5907 = vrot.lane.b32.xlu1 %v9034_v14, %s9245_s20  ;;  %v9036_v19 = vpop.eup %9035 }
0x673b   :  { %v9038_v21 = vpop.eup %9037  ;;  %v5887_v22 = vadd.f32 1.0, %v9036_v19 }
0x673c   :  { %v5888_v25 = vadd.f32 1.0, %v9038_v21 }
0x673d   :  { %9039 = vrcp.f32 %v5887_v22 }
0x673e   :  { %9041 = vrcp.f32 %v5888_v25  ;;  %v6089_v25 = vld [vmem:[%s10433_s1 + $0xc0] sm:$0xff] }
0x6747   :  { %v9040_v26 = vpop.eup %9039 }
0x6748   :  { %v9042_v29 = vpop.eup %9041  ;;  %v5901_v23 = vmul.f32 %v9040_v26, %v5897_v33 }
0x6749   :  { %v5902_v36 = vmul.f32 %v9042_v29, %v5898_v34 }
0x67ab   :  { %v5906_v27 = vpop.permute.xlu0 %5905 }
0x67ac   :  { %v5908_v30 = vpop.permute.xlu1 %5907  ;;  %v5911_v31 = vmul.f32 %v9040_v26, %v5906_v27  ;;  %v6093_v27 = vld [vmem:[%s10433_s1 + $0xe0] sm:$0xff] }
0x67ad   :  { %v5912_v20 = vmul.f32 %v9042_v29, %v5908_v30  ;;  %v6094_v30 = vld [vmem:[%s10433_s1 + $0xe8] sm:$0xff] }
0x67ae   :  { %5915 = vrot.lane.b32.xlu0 %v5911_v31, %s9243_s4  ;;  %v6091_v31 = vld [vmem:[%s10433_s1 + $0xd0] sm:$0xff]  ;;  %v10216_v33 = vpack.c.bf16 %v6094_v30, %v6093_v27 }
0x67af   :  { %5917 = vrot.lane.b32.xlu1 %v5912_v20, %s9243_s4  ;;  %v6092_v20 = vld [vmem:[%s10433_s1 + $0xd8] sm:$0xff] }
0x67b0   :  { %v8364_v34 = vpack.c.bf16 %v6092_v20, %v6091_v31 }
0x6820   :  { %v5916_v18 = vpop.permute.xlu0 %5915 }
0x6821   :  { %v5918_v51 = vpop.permute.xlu1 %5917  ;;  %v5921_v11 = vadd.f32 %v5916_v18, %v5901_v23  ;;  %v6095_v23 = vld [vmem:[%s10433_s1 + $0xf0] sm:$0xff] }
0x6822   :  { %v5922_v47 = vadd.f32 %v5918_v51, %v5902_v36  ;;  %v6096_v36 = vld [vmem:[%s10433_s1 + $0xf8] sm:$0xff] }
0x6823   :  { %9043 = vtanh.f32 %v5921_v11  ;;  %v6037_v44 = vrot.slane %v5921_v11, 7  ;;  %v10225_v18 = vpack.c.bf16 %v6096_v36, %v6095_v23 }
0x6824   :  { %9045 = vtanh.f32 %v5922_v47  ;;  %v6038_v28 = vrot.slane %v5922_v47, 7 }
0x682d   :  { %v9044_v38 = vpop.eup %9043 }
0x682e   :  { %v9046_v39 = vpop.eup %9045  ;;  %5927 = vrot.lane.b32.xlu0 %v9044_v38, %s9245_s20 }
0x682f   :  { %5929 = vrot.lane.b32.xlu1 %v9046_v39, %s9245_s20 }
0x68a0   :  { %v5928_v8 = vpop.permute.xlu0 %5927 }
0x68a1   :  { %v5930_v45 = vpop.permute.xlu1 %5929  ;;  %v5933_v46 = vmul.f32 %v9040_v26, %v5928_v8  ;;  %v6090_v26 = vld [vmem:[%s10433_s1 + $0xc8] sm:$0xff] }
0x68a2   :  { %v5934_v48 = vmul.f32 %v9042_v29, %v5930_v45  ;;  %v8360_v29 = vpack.c.bf16 %v6090_v26, %v6089_v25 }
0x68a3   :  { %v5937_v49 = vrot.slane %v5933_v46, 6  ;;  %v10182_v50 = vsel %vm1231_vm11, %v6083_v60, %v5933_v46 }
0x68a4   :  { %v5938_v52 = vrot.slane %v5934_v48, 5  ;;  %v10185_v7 = vsel %vm1231_vm11, %v6084_v0, %v5934_v48  ;;  %8361 = vmatprep.subr.bf16.mxu1 %v8360_v29 }
0x68a5   :  { %8363 = vmatpush3.bf16.msra.mxu1 %v8360_v29 }
0x68a6   :  { %v5939_v5 = vsel %vm242_vm5, %v5938_v52, %v5937_v49  ;;  %8365 = vmatprep.subr.bf16.mxu1 %v8364_v34 }
0x68a7   :  { %5940 = vrot.lane.b32.xlu0 %v5939_v5, %s9243_s4 }
0x68a9   :  { %8367 = vmatpush3.bf16.msra.mxu1 %v8364_v34 }
0x68aa   :  { %8374 = vmatprep.subr.bf16.mxu1 %v9231_v3 }
0x6919   :  { %v5941_v53 = vpop.permute.xlu0 %5940 }
0x691a   :  { %8096 = vmatmul.mubr.msk.f32.vlgmr.msra.gmra.mrb[44].mxu0 %vm4971_vm14, %v5941_v53 }
0x691b   :  { %8117 = vmatprep.mubr.msk.f32.mxu0 %vm9233_vm4, %v9234_v9  ;;  %8370 = vmatpush3.bf16.msra.mxu0 %v10216_v33 }
0x691c   :  { %8371 = vmatprep.subr.bf16.mxu0 %v9231_v3 }
0x691f   :  { %8373 = vmatpush3.bf16.msra.mxu0 %v10225_v18 }
0x6920   :  { %8380 = vmatprep.subr.bf16.mxu0 %v9231_v3 }
0x6922   :  { %8118 = vmatmul.mubr.f32.vlgmr.msra.gmra.mrb[46].mxu0 %v9234_v9 }
0x6923   :  { %8382 = vmatpush3.bf16.msra.mxu0 %v10216_v33  ;;  %8139 = vmatprep.mubr.msk.f32.mxu0 %vm9233_vm4, %v9234_v9 }
0x6924   :  { %8383 = vmatprep.subr.bf16.mxu0 %v9231_v3 }
0x6927   :  { %8385 = vmatpush3.bf16.msra.mxu0 %v10225_v18 }
0x6928   :  { %8392 = vmatprep.subr.bf16.mxu0 %v9231_v3 }
0x69ed   :  { %v6010_v54 = vpop.f32.mrb[44].mxu0 }
0x69ee   :  { %v6015_v62 = vrot.slane %v6010_v54, 1  ;;  %v6016_v55 = vrot.slane %v6010_v54, 2  ;;  %v8097_v56 = vpop.f32.mrb[45].mxu0 }
0x69f0   :  { %v6019_v63 = vadd.f32 %v6015_v62, %v10055_v10  ;;  %v6020_v57 = vadd.f32 %v6016_v55, %v10058_v37 }
0x69f2   :  { %9047 = vtanh.f32 %v6019_v63  ;;  %v7544_v60 = vmul.f32 -1.442695, %v6019_v63  ;;  %v7545_v61 = vmul.f32 -1.442695, %v6020_v57 }
0x69f3   :  { %9049 = vtanh.f32 %v6020_v57 }
0x69f4   :  { %9051 = vpow2.f32 %v7544_v60 }
0x69f5   :  { %9053 = vpow2.f32 %v7545_v61  ;;  %v6253_v48 = vpop.f32.mrb[46].mxu0 }
0x69f6   :  { %v8119_v49 = vpop.f32.mrb[47].mxu0 }
0x69fc   :  { %v9048_v58 = vpop.eup %9047 }
0x69fd   :  { %v9050_v59 = vpop.eup %9049  ;;  %6045 = vrot.lane.b32.xlu1 %v9048_v58, %s9245_s20 }
0x69fe   :  { %6047 = vrot.lane.b32.xlu0 %v9050_v59, %s9245_s20  ;;  %v9052_v0 = vpop.eup %9051 }
0x69ff   :  { %v9054_v1 = vpop.eup %9053  ;;  %v6027_v2 = vadd.f32 1.0, %v9052_v0 }
0x6a00   :  { %v6028_v42 = vadd.f32 1.0, %v9054_v1 }
0x6a01   :  { %9055 = vrcp.f32 %v6027_v2 }
0x6a02   :  { %9057 = vrcp.f32 %v6028_v42 }
0x6a0b   :  { %v9056_v10 = vpop.eup %9055 }
0x6a0c   :  { %v9058_v35 = vpop.eup %9057  ;;  %v6041_v14 = vmul.f32 %v9056_v10, %v6037_v44 }
0x6a0d   :  { %v6042_v16 = vmul.f32 %v9058_v35, %v6038_v28 }
0x6a6f   :  { %v6046_v37 = vpop.permute.xlu1 %6045 }
0x6a70   :  { %v6048_v24 = vpop.permute.xlu0 %6047  ;;  %v6051_v4 = vmul.f32 %v9056_v10, %v6046_v37 }
0x6a71   :  { %v6052_v15 = vmul.f32 %v9058_v35, %v6048_v24 }
0x6a72   :  { %6055 = vrot.lane.b32.xlu1 %v6051_v4, %s9243_s4 }
0x6a73   :  { %6057 = vrot.lane.b32.xlu0 %v6052_v15, %s9243_s4 }
0x6ae4   :  { %v6056_v17 = vpop.permute.xlu1 %6055 }
0x6ae5   :  { %v6058_v19 = vpop.permute.xlu0 %6057  ;;  %v6061_v21 = vadd.f32 %v6056_v17, %v6041_v14 }
0x6ae6   :  { %v6062_v22 = vadd.f32 %v6058_v19, %v6042_v16 }
0x6ae7   :  { %9059 = vtanh.f32 %v6061_v21 }
0x6ae8   :  { %9061 = vtanh.f32 %v6062_v22 }
0x6af1   :  { %v9060_v51 = vpop.eup %9059 }
0x6af2   :  { %v9062_v11 = vpop.eup %9061  ;;  %6067 = vrot.lane.b32.xlu1 %v9060_v51, %s9245_s20 }
0x6af3   :  { %6069 = vrot.lane.b32.xlu0 %v9062_v11, %s9245_s20 }
0x6b64   :  { %v6068_v47 = vpop.permute.xlu1 %6067 }
0x6b65   :  { %v6070_v38 = vpop.permute.xlu0 %6069  ;;  %v6073_v39 = vmul.f32 %v9056_v10, %v6068_v47 }
0x6b66   :  { %v6074_v8 = vmul.f32 %v9058_v35, %v6070_v38 }
0x6b67   :  { %v6087_v45 = vsel %vm1234_vm12, %v10182_v50, %v6073_v39  ;;  %v7546_v50 = vld [vmem:[%s10433_s1 + $0x100] ss:$0 sm:$0xff] }
0x6b68   :  { %v6088_v46 = vsel %vm1234_vm12, %v10185_v7, %v6074_v8  ;;  %6104 = vrot.lane.b32.xlu1 %v6087_v45, %s9243_s4  ;;  %v6258_v7 = vrot.slane %v6253_v48, 1 }
0x6b69   :  { %6106 = vrot.lane.b32.xlu0 %v6088_v46, %s9243_s4 }
0x6bda   :  { %v6105_v52 = vpop.permute.xlu1 %6104 }
0x6bdb   :  { %v6107_v5 = vpop.permute.xlu0 %6106  ;;  %8106 = vmatprep.mubr.msk.f32.mxu1 %vm4971_vm14, %v6105_v52 }
0x6bdc   :  { %8107 = vmatmul.mubr.msk.f32.vlgmr.msra.gmra.mrb[44].mxu1 %vm4971_vm14, %v6107_v5 }
0x6bdd   :  { %8376 = vmatpush3.bf16.msra.mxu1 %v10216_v33  ;;  %8128 = vmatprep.mubr.msk.f32.mxu1 %vm9233_vm4, %v9234_v9 }
0x6bde   :  { %8377 = vmatprep.subr.bf16.mxu1 %v9231_v3 }
0x6be1   :  { %8379 = vmatpush3.bf16.msra.mxu1 %v10225_v18 }
0x6be2   :  { %8386 = vmatprep.subr.bf16.mxu1 %v9231_v3 }
0x6caf   :  { %v8108_v53 = vpop.f32.mrb[44].mxu1 }
0x6cb0   :  { %v10257_v54 = vadd.f32 %v8108_v53, %v7546_v50  ;;  %v6178_v62 = vpop.f32.mrb[45].mxu1 }
0x6cb1   :  { %v10259_v55 = vadd.f32 %v7546_v50, %v6178_v62 }
0x6cb2   :  { %v6262_v56 = vadd.f32 %v6258_v7, %v10257_v54 }
0x6cb3   :  { %v6261_v63 = vadd.f32 %v6253_v48, %v10259_v55 }
0x6cb4   :  { %9063 = vtanh.f32 %v6262_v56  ;;  %v7550_v59 = vmul.f32 -1.442695, %v6262_v56 }
0x6cb5   :  { %9065 = vtanh.f32 %v6261_v63  ;;  %v7549_v60 = vmul.f32 -1.442695, %v6261_v63 }
0x6cb6   :  { %9067 = vpow2.f32 %v7550_v59 }
0x6cb7   :  { %9069 = vpow2.f32 %v7549_v60 }
0x6cbe   :  { %v9064_v57 = vpop.eup %9063 }
0x6cbf   :  { %v9066_v58 = vpop.eup %9065  ;;  %6283 = vrot.lane.b32.xlu1 %v9064_v57, %s9245_s20 }
0x6cc0   :  { %6281 = vrot.lane.b32.xlu0 %v9066_v58, %s9245_s20  ;;  %v9068_v61 = vpop.eup %9067 }
0x6cc1   :  { %v9070_v0 = vpop.eup %9069  ;;  %v6270_v1 = vadd.f32 1.0, %v9068_v61 }
0x6cc2   :  { %v6269_v2 = vadd.f32 1.0, %v9070_v0 }
0x6cc3   :  { %9071 = vrcp.f32 %v6270_v1 }
0x6cc4   :  { %9073 = vrcp.f32 %v6269_v2 }
0x6ccd   :  { %v9072_v42 = vpop.eup %9071 }
0x6cce   :  { %v9074_v37 = vpop.eup %9073  ;;  %v6278_v15 = vmul.f32 0.0, %v9072_v42 }
0x6ccf   :  { %v6277_v28 = vmul.f32 0.0, %v9074_v37 }
0x6d31   :  { %v6284_v10 = vpop.permute.xlu1 %6283 }
0x6d32   :  { %v6288_v35 = vmul.f32 %v9072_v42, %v6284_v10  ;;  %v6282_v24 = vpop.permute.xlu0 %6281 }
0x6d33   :  { %v6287_v4 = vmul.f32 %v9074_v37, %v6282_v24 }
0x6d34   :  { %6293 = vrot.lane.b32.xlu1 %v6288_v35, %s9243_s4 }
0x6d35   :  { %6291 = vrot.lane.b32.xlu0 %v6287_v4, %s9243_s4 }
0x6da6   :  { %v6294_v44 = vpop.permute.xlu1 %6293 }
0x6da7   :  { %v6298_v14 = vadd.f32 %v6294_v44, %v6278_v15  ;;  %v6292_v16 = vpop.permute.xlu0 %6291 }
0x6da8   :  { %v6297_v17 = vadd.f32 %v6292_v16, %v6277_v28 }
0x6da9   :  { %9075 = vtanh.f32 %v6298_v14  ;;  %v6412_v62 = vrot.slane %v6298_v14, 7 }
0x6daa   :  { %9077 = vtanh.f32 %v6297_v17  ;;  %v6411_v63 = vrot.slane %v6297_v17, 7 }
0x6db3   :  { %v9076_v19 = vpop.eup %9075 }
0x6db4   :  { %v9078_v21 = vpop.eup %9077  ;;  %6305 = vrot.lane.b32.xlu1 %v9076_v19, %s9245_s20 }
0x6db5   :  { %6303 = vrot.lane.b32.xlu0 %v9078_v21, %s9245_s20 }
0x6e26   :  { %v6306_v22 = vpop.permute.xlu1 %6305 }
0x6e27   :  { %v6310_v25 = vmul.f32 %v9072_v42, %v6306_v22  ;;  %v6304_v26 = vpop.permute.xlu0 %6303 }
0x6e28   :  { %v6309_v27 = vmul.f32 %v9074_v37, %v6304_v26 }
0x6e29   :  { %v6313_v29 = vrot.slane %v6310_v25, 7 }
0x6e2b   :  { %v6314_v30 = vsel %vm242_vm5, %v6313_v29, %v6309_v27 }
0x6e2c   :  { %6315 = vrot.lane.b32.xlu1 %v6314_v30, %s9243_s4 }
0x6e9e   :  { %v6316_v31 = vpop.permute.xlu1 %6315 }
0x6e9f   :  { %8129 = vmatmul.mubr.msk.f32.vlgmr.msra.gmra.mrb[46].mxu1 %vm4971_vm14, %v6316_v31 }
0x6ea0   :  { %8388 = vmatpush3.bf16.msra.mxu1 %v10216_v33  ;;  %8150 = vmatprep.mubr.msk.f32.mxu1 %vm9233_vm4, %v9234_v9 }
0x6ea1   :  { %8389 = vmatprep.subr.bf16.mxu1 %v9231_v3 }
0x6ea4   :  { %8391 = vmatpush3.bf16.msra.mxu1 %v10225_v18 }
0x6ea5   :  { %8398 = vmatprep.subr.bf16.mxu1 %v9231_v3 }
0x6f72   :  { %v6385_v20 = vpop.f32.mrb[46].mxu1 }
0x6f73   :  { %v6390_v34 = vrot.slane %v6385_v20, 7  ;;  %v6394_v23 = vadd.f32 %v6385_v20, %v10257_v54  ;;  %v8130_v36 = vpop.f32.mrb[47].mxu1 }
0x6f75   :  { %v6393_v51 = vadd.f32 %v6390_v34, %v10259_v55  ;;  %9079 = vtanh.f32 %v6394_v23  ;;  %v7553_v38 = vmul.f32 -1.442695, %v6394_v23 }
0x6f77   :  { %9081 = vtanh.f32 %v6393_v51  ;;  %v7552_v39 = vmul.f32 -1.442695, %v6393_v51 }
0x6f78   :  { %9083 = vpow2.f32 %v7553_v38 }
0x6f79   :  { %9085 = vpow2.f32 %v7552_v39 }
0x6f7f   :  { %v9080_v11 = vpop.eup %9079 }
0x6f80   :  { %6421 = vrot.lane.b32.xlu1 %v9080_v11, %s9245_s20 }
0x6f81   :  { %v9082_v47 = vpop.eup %9081 }
0x6f82   :  { %6419 = vrot.lane.b32.xlu0 %v9082_v47, %s9245_s20  ;;  %v9084_v8 = vpop.eup %9083 }
0x6f83   :  { %v9086_v45 = vpop.eup %9085  ;;  %v6402_v46 = vadd.f32 1.0, %v9084_v8 }
0x6f84   :  { %v6401_v48 = vadd.f32 1.0, %v9086_v45 }
0x6f85   :  { %9087 = vrcp.f32 %v6402_v46 }
0x6f86   :  { %9089 = vrcp.f32 %v6401_v48 }
0x6f8f   :  { %v9088_v49 = vpop.eup %9087 }
0x6f90   :  { %v9090_v50 = vpop.eup %9089  ;;  %v6416_v56 = vmul.f32 %v9088_v49, %v6412_v62 }
0x6f91   :  { %v6415_v59 = vmul.f32 %v9090_v50, %v6411_v63 }
0x6ff2   :  { %v6422_v52 = vpop.permute.xlu1 %6421 }
0x6ff3   :  { %v6426_v5 = vmul.f32 %v9088_v49, %v6422_v52 }
0x6ff4   :  { %v6420_v7 = vpop.permute.xlu0 %6419 }
0x6ff5   :  { %6431 = vrot.lane.b32.xlu1 %v6426_v5, %s9243_s4  ;;  %v6425_v53 = vmul.f32 %v9090_v50, %v6420_v7 }
0x6ff7   :  { %6429 = vrot.lane.b32.xlu0 %v6425_v53, %s9243_s4 }
0x7067   :  { %v6432_v57 = vpop.permute.xlu1 %6431 }
0x7068   :  { %v6436_v58 = vadd.f32 %v6432_v57, %v6416_v56 }
0x7069   :  { %v6430_v60 = vpop.permute.xlu0 %6429 }
0x706a   :  { %9091 = vtanh.f32 %v6436_v58  ;;  %v6435_v61 = vadd.f32 %v6430_v60, %v6415_v59  ;;  %v6551_v47 = vrot.slane %v6436_v58, 7 }
0x706c   :  { %9093 = vtanh.f32 %v6435_v61  ;;  %v6550_v11 = vrot.slane %v6435_v61, 7 }
0x7074   :  { %v9092_v0 = vpop.eup %9091 }
0x7075   :  { %6443 = vrot.lane.b32.xlu1 %v9092_v0, %s9245_s20 }
0x7076   :  { %v9094_v1 = vpop.eup %9093 }
0x7077   :  { %6441 = vrot.lane.b32.xlu0 %v9094_v1, %s9245_s20 }
0x70e7   :  { %v6444_v2 = vpop.permute.xlu1 %6443 }
0x70e8   :  { %v6448_v37 = vmul.f32 %v9088_v49, %v6444_v2 }
0x70e9   :  { %v6442_v42 = vpop.permute.xlu0 %6441 }
0x70ea   :  { %v6447_v10 = vmul.f32 %v9090_v50, %v6442_v42 }
0x70ec   :  { %v6451_v35 = vrot.slane %v6447_v10, 1 }
0x70ee   :  { %v6452_v24 = vsel %vm242_vm5, %v6448_v37, %v6451_v35 }
0x70ef   :  { %6453 = vrot.lane.b32.xlu0 %v6452_v24, %s9243_s4 }
0x7161   :  { %v6454_v4 = vpop.permute.xlu0 %6453 }
0x7162   :  { %8140 = vmatmul.mubr.msk.f32.vlgmr.msra.gmra.mrb[48].mxu0 %vm4971_vm14, %v6454_v4 }
0x7163   :  { %8394 = vmatpush3.bf16.msra.mxu0 %v10216_v33  ;;  %8161 = vmatprep.mubr.msk.f32.mxu0 %vm9233_vm4, %v9234_v9 }
0x7164   :  { %8395 = vmatprep.subr.bf16.mxu0 %v9231_v3 }
0x7167   :  { %8397 = vmatpush3.bf16.msra.mxu0 %v10225_v18 }
0x7168   :  { %8404 = vmatprep.subr.bf16.mxu0 %v9231_v3 }
0x7235   :  { %v6523_v15 = vpop.f32.mrb[48].mxu0 }
0x7236   :  { %v6528_v44 = vrot.slane %v6523_v15, 6  ;;  %v6529_v28 = vrot.slane %v6523_v15, 7  ;;  %v8141_v14 = vpop.f32.mrb[49].mxu0 }
0x7238   :  { %v6532_v16 = vadd.f32 %v6528_v44, %v10259_v55  ;;  %v6533_v17 = vadd.f32 %v6529_v28, %v10257_v54 }
0x723a   :  { %9095 = vtanh.f32 %v6532_v16  ;;  %v7555_v22 = vmul.f32 -1.442695, %v6532_v16  ;;  %v7556_v25 = vmul.f32 -1.442695, %v6533_v17 }
0x723b   :  { %9097 = vtanh.f32 %v6533_v17 }
0x723c   :  { %9099 = vpow2.f32 %v7555_v22 }
0x723d   :  { %9101 = vpow2.f32 %v7556_v25 }
0x7244   :  { %v9096_v19 = vpop.eup %9095 }
0x7245   :  { %v9098_v21 = vpop.eup %9097  ;;  %6558 = vrot.lane.b32.xlu1 %v9096_v19, %s9245_s20 }
0x7246   :  { %6560 = vrot.lane.b32.xlu0 %v9098_v21, %s9245_s20  ;;  %v9100_v26 = vpop.eup %9099 }
0x7247   :  { %v9102_v27 = vpop.eup %9101  ;;  %v6540_v29 = vadd.f32 1.0, %v9100_v26 }
0x7248   :  { %v6541_v30 = vadd.f32 1.0, %v9102_v27 }
0x7249   :  { %9103 = vrcp.f32 %v6540_v29 }
0x724a   :  { %9105 = vrcp.f32 %v6541_v30 }
0x7253   :  { %v9104_v31 = vpop.eup %9103 }
0x7254   :  { %v9106_v34 = vpop.eup %9105  ;;  %v6554_v38 = vmul.f32 %v9104_v31, %v6550_v11 }
0x7255   :  { %v6555_v39 = vmul.f32 %v9106_v34, %v6551_v47 }
0x72b7   :  { %v6559_v20 = vpop.permute.xlu1 %6558 }
0x72b8   :  { %v6561_v23 = vpop.permute.xlu0 %6560  ;;  %v6564_v36 = vmul.f32 %v9104_v31, %v6559_v20 }
0x72b9   :  { %v6565_v51 = vmul.f32 %v9106_v34, %v6561_v23 }
0x72ba   :  { %6568 = vrot.lane.b32.xlu1 %v6564_v36, %s9243_s4 }
0x72bb   :  { %6570 = vrot.lane.b32.xlu0 %v6565_v51, %s9243_s4 }
0x732c   :  { %v6569_v8 = vpop.permute.xlu1 %6568 }
0x732d   :  { %v6571_v45 = vpop.permute.xlu0 %6570  ;;  %v6574_v46 = vadd.f32 %v6569_v8, %v6554_v38 }
0x732e   :  { %v6575_v48 = vadd.f32 %v6571_v45, %v6555_v39 }
0x732f   :  { %9107 = vtanh.f32 %v6574_v46  ;;  %v6690_v21 = vrot.slane %v6574_v46, 7 }
0x7330   :  { %9109 = vtanh.f32 %v6575_v48  ;;  %v6691_v22 = vrot.slane %v6575_v48, 7 }
0x7339   :  { %v9108_v49 = vpop.eup %9107 }
0x733a   :  { %v9110_v52 = vpop.eup %9109  ;;  %6580 = vrot.lane.b32.xlu1 %v9108_v49, %s9245_s20 }
0x733b   :  { %6582 = vrot.lane.b32.xlu0 %v9110_v52, %s9245_s20 }
0x73ac   :  { %v6581_v5 = vpop.permute.xlu1 %6580 }
0x73ad   :  { %v6583_v50 = vpop.permute.xlu0 %6582  ;;  %v6586_v7 = vmul.f32 %v9104_v31, %v6581_v5 }
0x73ae   :  { %v6587_v53 = vmul.f32 %v9106_v34, %v6583_v50 }
0x73af   :  { %v6590_v62 = vrot.slane %v6586_v7, 2 }
0x73b0   :  { %v6591_v56 = vrot.slane %v6587_v53, 1 }
0x73b2   :  { %v6592_v63 = vsel %vm242_vm5, %v6591_v56, %v6590_v62 }
0x73b3   :  { %6593 = vrot.lane.b32.xlu1 %v6592_v63, %s9243_s4 }
0x7425   :  { %v6594_v57 = vpop.permute.xlu1 %6593 }
0x7426   :  { %8151 = vmatmul.mubr.msk.f32.vlgmr.msra.gmra.mrb[48].mxu1 %vm4971_vm14, %v6594_v57 }
0x7427   :  { %8400 = vmatpush3.bf16.msra.mxu1 %v10216_v33  ;;  %8172 = vmatprep.mubr.msk.f32.mxu1 %vm9233_vm4, %v9234_v9 }
0x7428   :  { %8401 = vmatprep.subr.bf16.mxu1 %v9231_v3 }
0x742b   :  { %8403 = vmatpush3.bf16.msra.mxu1 %v10225_v18 }
0x742c   :  { %8410 = vmatprep.subr.bf16.mxu1 %v9231_v3 }
0x74f9   :  { %v6663_v58 = vpop.f32.mrb[48].mxu1 }
0x74fa   :  { %v6668_v59 = vrot.slane %v6663_v58, 5  ;;  %v6669_v60 = vrot.slane %v6663_v58, 6  ;;  %v8152_v61 = vpop.f32.mrb[49].mxu1 }
0x74fc   :  { %v6672_v0 = vadd.f32 %v6668_v59, %v10259_v55  ;;  %v6673_v1 = vadd.f32 %v6669_v60, %v10257_v54 }
0x74fe   :  { %9111 = vtanh.f32 %v6672_v0  ;;  %v7558_v10 = vmul.f32 -1.442695, %v6672_v0  ;;  %v7559_v37 = vmul.f32 -1.442695, %v6673_v1 }
0x74ff   :  { %9113 = vtanh.f32 %v6673_v1 }
0x7500   :  { %9115 = vpow2.f32 %v7558_v10 }
0x7501   :  { %9117 = vpow2.f32 %v7559_v37 }
0x7508   :  { %v9112_v2 = vpop.eup %9111 }
0x7509   :  { %v9114_v42 = vpop.eup %9113  ;;  %6698 = vrot.lane.b32.xlu0 %v9112_v2, %s9245_s20 }
0x750a   :  { %6700 = vrot.lane.b32.xlu1 %v9114_v42, %s9245_s20  ;;  %v9116_v35 = vpop.eup %9115 }
0x750b   :  { %v9118_v24 = vpop.eup %9117  ;;  %v6680_v4 = vadd.f32 1.0, %v9116_v35 }
0x750c   :  { %v6681_v15 = vadd.f32 1.0, %v9118_v24 }
0x750d   :  { %9119 = vrcp.f32 %v6680_v4 }
0x750e   :  { %9121 = vrcp.f32 %v6681_v15 }
0x7517   :  { %v9120_v44 = vpop.eup %9119 }
0x7518   :  { %v9122_v14 = vpop.eup %9121  ;;  %v6694_v25 = vmul.f32 %v9120_v44, %v6690_v21 }
0x7519   :  { %v6695_v26 = vmul.f32 %v9122_v14, %v6691_v22 }
0x757b   :  { %v6699_v28 = vpop.permute.xlu0 %6698 }
0x757c   :  { %v6701_v16 = vpop.permute.xlu1 %6700  ;;  %v6704_v17 = vmul.f32 %v9120_v44, %v6699_v28 }
0x757d   :  { %v6705_v19 = vmul.f32 %v9122_v14, %v6701_v16 }
0x757e   :  { %6708 = vrot.lane.b32.xlu0 %v6704_v17, %s9243_s4 }
0x757f   :  { %6710 = vrot.lane.b32.xlu1 %v6705_v19, %s9243_s4 }
0x75f0   :  { %v6709_v27 = vpop.permute.xlu0 %6708 }
0x75f1   :  { %v6711_v29 = vpop.permute.xlu1 %6710  ;;  %v6714_v30 = vadd.f32 %v6709_v27, %v6694_v25 }
0x75f2   :  { %v6715_v31 = vadd.f32 %v6711_v29, %v6695_v26 }
0x75f3   :  { %9123 = vtanh.f32 %v6714_v30  ;;  %v6830_v42 = vrot.slane %v6714_v30, 7 }
0x75f4   :  { %9125 = vtanh.f32 %v6715_v31  ;;  %v6831_v10 = vrot.slane %v6715_v31, 7 }
0x75fd   :  { %v9124_v20 = vpop.eup %9123 }
0x75fe   :  { %v9126_v34 = vpop.eup %9125  ;;  %6720 = vrot.lane.b32.xlu0 %v9124_v20, %s9245_s20 }
0x75ff   :  { %6722 = vrot.lane.b32.xlu1 %v9126_v34, %s9245_s20 }
0x7670   :  { %v6721_v23 = vpop.permute.xlu0 %6720 }
0x7671   :  { %v6723_v36 = vpop.permute.xlu1 %6722  ;;  %v6726_v51 = vmul.f32 %v9120_v44, %v6721_v23 }
0x7672   :  { %v6727_v11 = vmul.f32 %v9122_v14, %v6723_v36 }
0x7673   :  { %v6730_v47 = vrot.slane %v6726_v51, 3 }
0x7674   :  { %v6731_v38 = vrot.slane %v6727_v11, 2 }
0x7676   :  { %v6732_v39 = vsel %vm242_vm5, %v6731_v38, %v6730_v47 }
0x7677   :  { %6733 = vrot.lane.b32.xlu0 %v6732_v39, %s9243_s4 }
0x76e9   :  { %v6734_v8 = vpop.permute.xlu0 %6733 }
0x76ea   :  { %8162 = vmatmul.mubr.msk.f32.vlgmr.msra.gmra.mrb[50].mxu0 %vm4971_vm14, %v6734_v8 }
0x76eb   :  { %8406 = vmatpush3.bf16.msra.mxu0 %v10216_v33  ;;  %8183 = vmatprep.mubr.msk.f32.mxu0 %vm9233_vm4, %v9234_v9 }
0x76ec   :  { %8407 = vmatprep.subr.bf16.mxu0 %v9231_v3 }
0x76ef   :  { %8409 = vmatpush3.bf16.msra.mxu0 %v10225_v18 }
0x76f0   :  { %8416 = vmatprep.subr.bf16.mxu0 %v9231_v3 }
0x77bd   :  { %v6803_v45 = vpop.f32.mrb[50].mxu0 }
0x77be   :  { %v6808_v46 = vrot.slane %v6803_v45, 4  ;;  %v6809_v48 = vrot.slane %v6803_v45, 5  ;;  %v8163_v49 = vpop.f32.mrb[51].mxu0 }
0x77c0   :  { %v6812_v52 = vadd.f32 %v6808_v46, %v10259_v55  ;;  %v6813_v5 = vadd.f32 %v6809_v48, %v10257_v54 }
0x77c2   :  { %9127 = vtanh.f32 %v6812_v52  ;;  %v7561_v53 = vmul.f32 -1.442695, %v6812_v52  ;;  %v7562_v62 = vmul.f32 -1.442695, %v6813_v5 }
0x77c3   :  { %9129 = vtanh.f32 %v6813_v5 }
0x77c4   :  { %9131 = vpow2.f32 %v7561_v53 }
0x77c5   :  { %9133 = vpow2.f32 %v7562_v62 }
0x77cc   :  { %v9128_v50 = vpop.eup %9127 }
0x77cd   :  { %v9130_v7 = vpop.eup %9129  ;;  %6838 = vrot.lane.b32.xlu1 %v9128_v50, %s9245_s20 }
0x77ce   :  { %6840 = vrot.lane.b32.xlu0 %v9130_v7, %s9245_s20  ;;  %v9132_v56 = vpop.eup %9131 }
0x77cf   :  { %v9134_v63 = vpop.eup %9133  ;;  %v6820_v57 = vadd.f32 1.0, %v9132_v56 }
0x77d0   :  { %v6821_v58 = vadd.f32 1.0, %v9134_v63 }
0x77d1   :  { %9135 = vrcp.f32 %v6820_v57 }
0x77d2   :  { %9137 = vrcp.f32 %v6821_v58 }
0x77db   :  { %v9136_v59 = vpop.eup %9135 }
0x77dc   :  { %v9138_v61 = vpop.eup %9137  ;;  %v6834_v37 = vmul.f32 %v9136_v59, %v6830_v42 }
0x77dd   :  { %v6835_v35 = vmul.f32 %v9138_v61, %v6831_v10 }
0x783f   :  { %v6839_v60 = vpop.permute.xlu1 %6838 }
0x7840   :  { %v6841_v0 = vpop.permute.xlu0 %6840  ;;  %v6844_v1 = vmul.f32 %v9136_v59, %v6839_v60 }
0x7841   :  { %v6845_v2 = vmul.f32 %v9138_v61, %v6841_v0 }
0x7842   :  { %6848 = vrot.lane.b32.xlu1 %v6844_v1, %s9243_s4 }
0x7843   :  { %6850 = vrot.lane.b32.xlu0 %v6845_v2, %s9243_s4 }
0x78b4   :  { %v6849_v24 = vpop.permute.xlu1 %6848 }
0x78b5   :  { %v6851_v4 = vpop.permute.xlu0 %6850  ;;  %v6854_v15 = vadd.f32 %v6849_v24, %v6834_v37 }
0x78b6   :  { %v6855_v44 = vadd.f32 %v6851_v4, %v6835_v35 }
0x78b7   :  { %9139 = vtanh.f32 %v6854_v15  ;;  %v6970_v5 = vrot.slane %v6854_v15, 7 }
0x78b8   :  { %9141 = vtanh.f32 %v6855_v44  ;;  %v6971_v50 = vrot.slane %v6855_v44, 7 }
0x78c1   :  { %v9140_v28 = vpop.eup %9139 }
0x78c2   :  { %v9142_v14 = vpop.eup %9141  ;;  %6860 = vrot.lane.b32.xlu1 %v9140_v28, %s9245_s20 }
0x78c3   :  { %6862 = vrot.lane.b32.xlu0 %v9142_v14, %s9245_s20 }
0x7934   :  { %v6861_v16 = vpop.permute.xlu1 %6860 }
0x7935   :  { %v6863_v17 = vpop.permute.xlu0 %6862  ;;  %v6866_v19 = vmul.f32 %v9136_v59, %v6861_v16 }
0x7936   :  { %v6867_v21 = vmul.f32 %v9138_v61, %v6863_v17 }
0x7937   :  { %v6870_v22 = vrot.slane %v6866_v19, 4 }
0x7938   :  { %v6871_v25 = vrot.slane %v6867_v21, 3 }
0x793a   :  { %v6872_v26 = vsel %vm242_vm5, %v6871_v25, %v6870_v22 }
0x793b   :  { %6873 = vrot.lane.b32.xlu1 %v6872_v26, %s9243_s4 }
0x79ad   :  { %v6874_v27 = vpop.permute.xlu1 %6873 }
0x79ae   :  { %8173 = vmatmul.mubr.msk.f32.vlgmr.msra.gmra.mrb[50].mxu1 %vm4971_vm14, %v6874_v27 }
0x79af   :  { %8412 = vmatpush3.bf16.msra.mxu1 %v10216_v33  ;;  %8194 = vmatprep.mubr.msk.f32.mxu1 %vm9233_vm4, %v9234_v9 }
0x79b0   :  { %8413 = vmatprep.subr.bf16.mxu1 %v9231_v3 }
0x79b3   :  { %8415 = vmatpush3.bf16.msra.mxu1 %v10225_v18 }
0x7a81   :  { %v6943_v29 = vpop.f32.mrb[50].mxu1 }
0x7a82   :  { %v6948_v30 = vrot.slane %v6943_v29, 3  ;;  %v6949_v31 = vrot.slane %v6943_v29, 4  ;;  %v8174_v20 = vpop.f32.mrb[51].mxu1 }
0x7a84   :  { %v6952_v34 = vadd.f32 %v6948_v30, %v10259_v55  ;;  %v6953_v23 = vadd.f32 %v6949_v31, %v10257_v54 }
0x7a86   :  { %9143 = vtanh.f32 %v6952_v34  ;;  %v7564_v33 = vmul.f32 -1.442695, %v6952_v34  ;;  %v7565_v11 = vmul.f32 -1.442695, %v6953_v23 }
0x7a87   :  { %9145 = vtanh.f32 %v6953_v23 }
0x7a88   :  { %9147 = vpow2.f32 %v7564_v33 }
0x7a89   :  { %9149 = vpow2.f32 %v7565_v11 }
0x7a90   :  { %v9144_v36 = vpop.eup %9143 }
0x7a91   :  { %v9146_v51 = vpop.eup %9145  ;;  %6978 = vrot.lane.b32.xlu0 %v9144_v36, %s9245_s20 }
0x7a92   :  { %6980 = vrot.lane.b32.xlu1 %v9146_v51, %s9245_s20  ;;  %v9148_v18 = vpop.eup %9147 }
0x7a93   :  { %v9150_v47 = vpop.eup %9149  ;;  %v6960_v38 = vadd.f32 1.0, %v9148_v18 }
0x7a94   :  { %v6961_v39 = vadd.f32 1.0, %v9150_v47 }
0x7a95   :  { %9151 = vrcp.f32 %v6960_v38 }
0x7a96   :  { %9153 = vrcp.f32 %v6961_v39 }
0x7a9f   :  { %v9152_v8 = vpop.eup %9151 }
0x7aa0   :  { %v9154_v46 = vpop.eup %9153  ;;  %v6974_v7 = vmul.f32 %v9152_v8, %v6970_v5 }
0x7aa1   :  { %v6975_v53 = vmul.f32 %v9154_v46, %v6971_v50 }
0x7b03   :  { %v6979_v45 = vpop.permute.xlu0 %6978 }
0x7b04   :  { %v6981_v48 = vpop.permute.xlu1 %6980  ;;  %v6984_v49 = vmul.f32 %v9152_v8, %v6979_v45 }
0x7b05   :  { %v6985_v52 = vmul.f32 %v9154_v46, %v6981_v48 }
0x7b06   :  { %6988 = vrot.lane.b32.xlu0 %v6984_v49, %s9243_s4 }
0x7b07   :  { %6990 = vrot.lane.b32.xlu1 %v6985_v52, %s9243_s4 }
0x7b78   :  { %v6989_v62 = vpop.permute.xlu0 %6988 }
0x7b79   :  { %v6991_v56 = vpop.permute.xlu1 %6990  ;;  %v6994_v63 = vadd.f32 %v6989_v62, %v6974_v7 }
0x7b7a   :  { %v6995_v57 = vadd.f32 %v6991_v56, %v6975_v53 }
0x7b7b   :  { %9155 = vtanh.f32 %v6994_v63  ;;  %v7110_v34 = vrot.slane %v6994_v63, 7 }
0x7b7c   :  { %9157 = vtanh.f32 %v6995_v57  ;;  %v7111_v23 = vrot.slane %v6995_v57, 7 }
0x7b85   :  { %v9156_v58 = vpop.eup %9155 }
0x7b86   :  { %v9158_v59 = vpop.eup %9157  ;;  %7000 = vrot.lane.b32.xlu0 %v9156_v58, %s9245_s20 }
0x7b87   :  { %7002 = vrot.lane.b32.xlu1 %v9158_v59, %s9245_s20 }
0x7bf8   :  { %v7001_v60 = vpop.permute.xlu0 %7000 }
0x7bf9   :  { %v7003_v61 = vpop.permute.xlu1 %7002  ;;  %v7006_v0 = vmul.f32 %v9152_v8, %v7001_v60 }
0x7bfa   :  { %v7007_v1 = vmul.f32 %v9154_v46, %v7003_v61 }
0x7bfb   :  { %v7010_v2 = vrot.slane %v7006_v0, 5 }
0x7bfc   :  { %v7011_v42 = vrot.slane %v7007_v1, 4 }
0x7bfe   :  { %v7012_v10 = vsel %vm242_vm5, %v7011_v42, %v7010_v2 }
0x7bff   :  { %7013 = vrot.lane.b32.xlu0 %v7012_v10, %s9243_s4 }
0x7c71   :  { %v7014_v37 = vpop.permute.xlu0 %7013 }
0x7c72   :  { %8184 = vmatmul.mubr.msk.f32.vlgmr.msra.gmra.mrb[52].mxu0 %vm4971_vm14, %v7014_v37 }
0x7c73   :  { %8205 = vmatprep.mubr.msk.f32.mxu0 %vm9233_vm4, %v9234_v9 }
0x7d45   :  { %v7083_v35 = vpop.f32.mrb[52].mxu0 }
0x7d46   :  { %v7088_v24 = vrot.slane %v7083_v35, 2  ;;  %v7089_v4 = vrot.slane %v7083_v35, 3  ;;  %v8185_v15 = vpop.f32.mrb[53].mxu0 }
0x7d48   :  { %v7092_v44 = vadd.f32 %v7088_v24, %v10259_v55  ;;  %v7093_v28 = vadd.f32 %v7089_v4, %v10257_v54 }
0x7d4a   :  { %9159 = vtanh.f32 %v7092_v44  ;;  %v7567_v17 = vmul.f32 -1.442695, %v7092_v44  ;;  %v7568_v19 = vmul.f32 -1.442695, %v7093_v28 }
0x7d4b   :  { %9161 = vtanh.f32 %v7093_v28  ;;  %v4802_v28 = vrot.slane %v10049_v41, 1 }
0x7d4c   :  { %9163 = vpow2.f32 %v7567_v17 }
0x7d4d   :  { %9165 = vpow2.f32 %v7568_v19 }
0x7d54   :  { %v9160_v14 = vpop.eup %9159 }
0x7d55   :  { %v9162_v16 = vpop.eup %9161  ;;  %7118 = vrot.lane.b32.xlu1 %v9160_v14, %s9245_s20 }
0x7d56   :  { %7120 = vrot.lane.b32.xlu0 %v9162_v16, %s9245_s20  ;;  %v9164_v9 = vpop.eup %9163 }
0x7d57   :  { %v9166_v21 = vpop.eup %9165  ;;  %v7100_v22 = vadd.f32 1.0, %v9164_v9 }
0x7d58   :  { %v7101_v25 = vadd.f32 1.0, %v9166_v21  ;;  %v4806_v21 = vadd.f32 %v4802_v28, %v9868_v43 }
0x7d59   :  { %9167 = vrcp.f32 %v7100_v22  ;;  %v7288_v22 = vld [vmem:[%s10433_s1 + $0x108] sm:$0xff] }
0x7d5a   :  { %9169 = vrcp.f32 %v7101_v25  ;;  %v7289_v25 = vld [vmem:[%s10433_s1 + $0x110] sm:$0xff] }
0x7d63   :  { %v9168_v26 = vpop.eup %9167 }
0x7d64   :  { %v9170_v29 = vpop.eup %9169  ;;  %v7114_v36 = vmul.f32 %v9168_v26, %v7110_v34  ;;  %v7518_v34 = vmul.f32 -1.442695, %v4806_v21 }
0x7d65   :  { %v7115_v51 = vmul.f32 %v9170_v29, %v7111_v23 }
0x7dc7   :  { %v7119_v27 = vpop.permute.xlu1 %7118 }
0x7dc8   :  { %v7121_v30 = vpop.permute.xlu0 %7120  ;;  %v7124_v31 = vmul.f32 %v9168_v26, %v7119_v27  ;;  %v8417_v27 = vpack.c.bf16 %v7289_v25, %v7288_v22 }
0x7dc9   :  { %v7125_v20 = vmul.f32 %v9170_v29, %v7121_v30 }
0x7dca   :  { %7128 = vrot.lane.b32.xlu1 %v7124_v31, %s9243_s4  ;;  %8418 = vmatpush3.bf16.msra.mxu0 %v8417_v27 }
0x7dcb   :  { %7130 = vrot.lane.b32.xlu0 %v7125_v20, %s9243_s4  ;;  %8419 = vmatprep.subr.bf16.mxu0 %v9231_v3 }
0x7e3c   :  { %v7129_v33 = vpop.permute.xlu1 %7128 }
0x7e3d   :  { %v7131_v11 = vpop.permute.xlu0 %7130  ;;  %v7134_v18 = vadd.f32 %v7129_v33, %v7114_v36 }
0x7e3e   :  { %v7135_v47 = vadd.f32 %v7131_v11, %v7115_v51  ;;  %v4803_v51 = vrot.slane %v10049_v41, 2 }
0x7e3f   :  { %9171 = vtanh.f32 %v7134_v18  ;;  %v7250_v4 = vrot.slane %v7134_v18, 7 }
0x7e40   :  { %9173 = vtanh.f32 %v7135_v47  ;;  %v7251_v15 = vrot.slane %v7135_v47, 7  ;;  %v4807_v33 = vadd.f32 %v4803_v51, %v9866_v40 }
0x7e42   :  { %v7519_v40 = vmul.f32 -1.442695, %v4807_v33 }
0x7e49   :  { %v9172_v38 = vpop.eup %9171 }
0x7e4a   :  { %v9174_v39 = vpop.eup %9173  ;;  %7140 = vrot.lane.b32.xlu1 %v9172_v38, %s9245_s20 }
0x7e4b   :  { %7142 = vrot.lane.b32.xlu0 %v9174_v39, %s9245_s20 }
0x7ebc   :  { %v7141_v8 = vpop.permute.xlu1 %7140 }
0x7ebd   :  { %v7143_v45 = vpop.permute.xlu0 %7142  ;;  %v7146_v46 = vmul.f32 %v9168_v26, %v7141_v8  ;;  %v7290_v26 = vld [vmem:[%s10433_s1 + $0x118] sm:$0xff] }
0x7ebe   :  { %v7147_v48 = vmul.f32 %v9170_v29, %v7143_v45  ;;  %v7291_v29 = vld [vmem:[%s10433_s1 + $0x120] sm:$0xff] }
0x7ebf   :  { %v7150_v49 = vrot.slane %v7146_v46, 6  ;;  %v8420_v31 = vpack.c.bf16 %v7291_v29, %v7290_v26 }
0x7ec0   :  { %v7151_v52 = vrot.slane %v7147_v48, 5 }
0x7ec1   :  { %8421 = vmatpush3.bf16.msra.mxu0 %v8420_v31 }
0x7ec2   :  { %v7152_v5 = vsel %vm242_vm5, %v7151_v52, %v7150_v49 }
0x7ec3   :  { %7153 = vrot.lane.b32.xlu1 %v7152_v5, %s9243_s4  ;;  %v4824_v5 = vrot.slane %v9997_v12, 7 }
0x7f35   :  { %v7154_v50 = vpop.permute.xlu1 %7153 }
0x7f36   :  { %8195 = vmatmul.mubr.msk.f32.vlgmr.msra.gmra.mrb[52].mxu1 %vm4971_vm14, %v7154_v50 }
0x8009   :  { %v7223_v7 = vpop.f32.mrb[52].mxu1 }
0x800a   :  { %v7228_v53 = vrot.slane %v7223_v7, 1  ;;  %v7229_v62 = vrot.slane %v7223_v7, 2  ;;  %v8196_v56 = vpop.f32.mrb[53].mxu1 }
0x800c   :  { %v7232_v63 = vadd.f32 %v7228_v53, %v10259_v55  ;;  %v7233_v57 = vadd.f32 %v7229_v62, %v10257_v54 }
0x800e   :  { %9175 = vtanh.f32 %v7232_v63  ;;  %v7570_v60 = vmul.f32 -1.442695, %v7232_v63  ;;  %v7571_v61 = vmul.f32 -1.442695, %v7233_v57 }
0x800f   :  { %9177 = vtanh.f32 %v7233_v57 }
0x8010   :  { %9179 = vpow2.f32 %v7570_v60 }
0x8011   :  { %9181 = vpow2.f32 %v7571_v61 }
0x8018   :  { %v9176_v58 = vpop.eup %9175 }
0x8019   :  { %v9178_v59 = vpop.eup %9177  ;;  %7258 = vrot.lane.b32.xlu0 %v9176_v58, %s9245_s20 }
0x801a   :  { %7260 = vrot.lane.b32.xlu1 %v9178_v59, %s9245_s20  ;;  %v9180_v0 = vpop.eup %9179  ;;  %v4825_v59 = vrot.slane %v9999_v13, 7 }
0x801b   :  { %v9182_v1 = vpop.eup %9181  ;;  %v7240_v2 = vadd.f32 1.0, %v9180_v0 }
0x801c   :  { %v7241_v42 = vadd.f32 1.0, %v9182_v1 }
0x801d   :  { %9183 = vrcp.f32 %v7240_v2 }
0x801e   :  { %9185 = vrcp.f32 %v7241_v42 }
0x8027   :  { %v9184_v55 = vpop.eup %9183 }
0x8028   :  { %v9186_v10 = vpop.eup %9185  ;;  %v7254_v44 = vmul.f32 %v9184_v55, %v7250_v4 }
0x8029   :  { %v7255_v14 = vmul.f32 %v9186_v10, %v7251_v15 }
0x808b   :  { %v7259_v54 = vpop.permute.xlu0 %7258 }
0x808c   :  { %v7261_v37 = vpop.permute.xlu1 %7260  ;;  %v7264_v35 = vmul.f32 %v9184_v55, %v7259_v54 }
0x808d   :  { %v7265_v24 = vmul.f32 %v9186_v10, %v7261_v37 }
0x808e   :  { %7268 = vrot.lane.b32.xlu0 %v7264_v35, %s9243_s4 }
0x808f   :  { %7270 = vrot.lane.b32.xlu1 %v7265_v24, %s9243_s4 }
0x8100   :  { %v7269_v16 = vpop.permute.xlu0 %7268 }
0x8101   :  { %v7271_v17 = vpop.permute.xlu1 %7270  ;;  %v7274_v19 = vadd.f32 %v7269_v16, %v7254_v44 }
0x8102   :  { %v7275_v9 = vadd.f32 %v7271_v17, %v7255_v14 }
0x8103   :  { %9187 = vtanh.f32 %v7274_v19 }
0x8104   :  { %9189 = vtanh.f32 %v7275_v9 }
0x8105   :  { %9191 = vtanh.f32 %v4806_v21 }
0x8106   :  { %9193 = vpow2.f32 %v7518_v34 }
0x810d   :  { %v9188_v43 = vpop.eup %9187 }
0x810e   :  { %v9190_v30 = vpop.eup %9189  ;;  %7280 = vrot.lane.b32.xlu0 %v9188_v43, %s9245_s20 }
0x810f   :  { %7282 = vrot.lane.b32.xlu1 %v9190_v30, %s9245_s20  ;;  %v9192_v20 = vpop.eup %9191 }
0x8110   :  { %v9194_v23 = vpop.eup %9193 }
0x8111   :  { %v4814_v36 = vadd.f32 1.0, %v9194_v23 }
0x8113   :  { %4832 = vrot.lane.b32.xlu1 %v9192_v20, %s9242_s28  ;;  %9195 = vrcp.f32 %v4814_v36 }
0x8114   :  { %9197 = vtanh.f32 %v4807_v33 }
0x8115   :  { %9199 = vpow2.f32 %v7519_v40 }
0x811d   :  { %v9196_v8 = vpop.eup %9195 }
0x811e   :  { %v9198_v41 = vpop.eup %9197  ;;  %v4828_v7 = vmul.f32 %v9196_v8, %v4824_v5 }
0x811f   :  { %v9200_v49 = vpop.eup %9199 }
0x8120   :  { %v4815_v52 = vadd.f32 1.0, %v9200_v49 }
0x8122   :  { %9201 = vrcp.f32 %v4815_v52 }
0x812c   :  { %v9202_v56 = vpop.eup %9201 }
0x812d   :  { %v4829_v60 = vmul.f32 %v9202_v56, %v4825_v59 }
0x8180   :  { %v7281_v11 = vpop.permute.xlu0 %7280 }
0x8181   :  { %v7283_v18 = vpop.permute.xlu1 %7282  ;;  %v7286_v47 = vmul.f32 %v9184_v55, %v7281_v11  ;;  %v7572_v55 = vld [vmem:[%s10433_s1 + $0x128] ss:$0 sm:$0xff] }
0x8182   :  { %v7287_v38 = vmul.f32 %v9186_v10, %v7283_v18 }
0x8183   :  { %v7299_v39 = vrot.slane %v7286_v47, 7 }
0x8184   :  { %v7300_v3 = vrot.slane %v7287_v38, 6 }
0x8185   :  { %v4833_v45 = vpop.permute.xlu1 %4832 }
0x8186   :  { %v4838_v46 = vmul.f32 %v9196_v8, %v4833_v45  ;;  %v7301_v48 = vsel %vm242_vm5, %v7300_v3, %v7299_v39 }
0x8187   :  { %7302 = vrot.lane.b32.xlu0 %v7301_v48, %s9243_s4 }
0x8188   :  { %4842 = vrot.lane.b32.xlu1 %v4838_v46, %s9241_s12 }
0x818b   :  { %4834 = vrot.lane.b32.xlu0 %v9198_v41, %s9242_s28 }
0x81f9   :  { %v7303_v50 = vpop.permute.xlu0 %7302 }
0x81fa   :  { %v4843_v53 = vpop.permute.xlu1 %4842  ;;  %8206 = vmatmul.mubr.msk.f32.vlgmr.msra.gmra.mrb[54].mxu0 %vm4971_vm14, %v7303_v50 }
0x81fb   :  { %v4848_v62 = vadd.f32 %v4843_v53, %v4828_v7 }
0x81fd   :  { %9203 = vtanh.f32 %v4848_v62  ;;  %v4835_v63 = vpop.permute.xlu0 %4834 }
0x81fe   :  { %v4839_v57 = vmul.f32 %v9202_v56, %v4835_v63 }
0x8200   :  { %4844 = vrot.lane.b32.xlu0 %v4839_v57, %s9241_s12 }
0x8207   :  { %v9204_v58 = vpop.eup %9203 }
0x8208   :  { %4854 = vrot.lane.b32.xlu1 %v9204_v58, %s9243_s4 }
0x8272   :  { %v4845_v61 = vpop.permute.xlu0 %4844 }
0x8273   :  { %v4849_v12 = vadd.f32 %v4845_v61, %v4829_v60 }
0x8275   :  { %9205 = vtanh.f32 %v4849_v12 }
0x827a   :  { %v4855_v0 = vpop.permute.xlu1 %4854 }
0x827b   :  { %v4860_v1 = vmul.f32 %v9196_v8, %v4855_v0 }
0x827d   :  { %v4874_v2 = vsel %vm1234_vm12, %v10027_v6, %v4860_v1 }
0x827e   :  { %4878 = vrot.lane.b32.xlu1 %v4874_v2, %s9244_s5 }
0x827f   :  { %v9206_v42 = vpop.eup %9205 }
0x8280   :  { %4856 = vrot.lane.b32.xlu0 %v9206_v42, %s9243_s4  ;;  %s9246_s4 = smov [#allocation2]  }
0x8281   :  { %s7385_s1 = sshll.u32 %s9246_s4, 4  ;;  %s7386_s1 = int_to_ptr.vmem [resolvable:$true] %s7385_s1 }
0x8282   :  { %s9207_s25 = scalar_lea.vmem %s7386_s1, 256  ;;  %p9212_p1 = scmp.lt.s32.totalorder %s7386_s1, %s7386_s1 }
0x8283   :  { %p9208_p0 = scmp.ne.s32.totalorder %s7386_s1, %s9207_s25  ;;  %p9213_p2 = scmp.lt.s32.totalorder %s9207_s25, %s9207_s25 }
0x8285   :  { %p9214_p3 = por %p9213_p2, %p9212_p1 }
0x8287   :  { %p9215_p4 = pnand %p9214_p3, %p9208_p0 }
0x82cd   :  { %v7372_v54 = vpop.f32.mrb[54].mxu0 }
0x82ce   :  { %v7373_v13 = vadd.f32 %v7572_v55, %v7372_v54  ;;  %v8207_v10 = vpop.f32.mrb[55].mxu0 }
0x82d0   :  { %7377 = vst.msk [vmem:[%s10434_s2] sm:$0x3] %vm7376_vm15, %v7373_v13 }
0x82f0   :  { %v4879_v37 = vpop.permute.xlu1 %4878 }
0x82f1   :  { %4884 = vst.msk [vmem:[#allocation2] sm:$0xff] %vm25_vm3, %v4879_v37 }
0x82f2   :  { %v4857_v6 = vpop.permute.xlu0 %4856 }
0x82f3   :  { %v4861_v35 = vmul.f32 %v9202_v56, %v4857_v6 }
0x82f5   :  { %v4875_v24 = vsel %vm1234_vm12, %v10031_v32, %v4861_v35 }
0x82f6   :  { %4880 = vrot.lane.b32.xlu0 %v4875_v24, %s9244_s5 }
0x8368   :  { %v4881_v4 = vpop.permute.xlu0 %4880 }
0x8369   :  { %4885 = vst.msk [vmem:[#allocation2 + $0x8] sm:$0xff] %vm25_vm3, %v4881_v4 }
0x836a   :  { %9218 = shalt.err (!%p9215_p4)
}
0x836b   :  { %s9219_s29 = scalar_lea.hbm %s10435_s3, 256 }
0x836c   :  { %p9220_p5 = scmp.ne.s32.totalorder %s10435_s3, %s9219_s29  ;;  %p9223_p6 = scmp.lt.u32.totalorder %s9219_s29, %s10435_s3 }
0x836e   :  { %p9225_p7 = pnand %p9223_p6, %p9220_p5 }
0x8370   :  { %9228 = shalt.err (!%p9225_p7)
}
0x8371   :  { %s9247_s7 = smov 128  }
0x8372   :  { %7391 = dma.vmem_to_hbm [thread:$0]  %s7386_s1, 256, %s10435_s3, [#allocation3], %s9247_s7, %s9247_s7, %s9240_s11  }
0x8373   :  { %9229 = dma.done.wait [#allocation3], 256  }
0x8374   :  { %9230 = vsyncadd [#allocation3], 4294967040 }
0x8375   :  { %7397 = vsyncpa [#allocation3], 1 }

</bundles_post_ra>
